<compile_context>
chip_gen: v6e
topology: v6e:2x2x1
jax: 0.10.0
libtpu: 0.0.40
codegen_flags: <defaults>
</compile_context>

<pallas_src>
import functools
import math

import jax
import jax.numpy as jnp
from jax import lax
from jax.experimental import pallas as pl
from jax.experimental.pallas import tpu as pltpu


# ---------------------------------------------------------------------------
# Kernel 1: ball-query (first K within radius) + gather + delta features.
# ---------------------------------------------------------------------------
def _delta_feats_kernel(q_ref, all_ref, feat_ref, *, radius_sq, K):
    # q_ref:    (1, tile_n, 2)   f32  query xy
    # all_ref:  (1, 2, N)        f32  all xy of this batch (coordinate-major)
    # feat_ref: (1, tile_n, 2K)  bf16 output features [dx_0..dx_{K-1}, dy_0..dy_{K-1}]
    q = q_ref[0]                              # (tile_n, 2)
    xq = q[:, 0:1]                            # (tile_n, 1)
    yq = q[:, 1:2]
    allp = all_ref[0]                         # (2, N)
    xa = allp[0:1, :]                         # (1, N)
    ya = allp[1:2, :]
    n = xa.shape[1]

    d2 = (xq - xa) ** 2 + (yq - ya) ** 2      # (tile_n, N)
    within = d2 < radius_sq
    within_f = within.astype(jnp.float32)

    # rank[q, j] = #{m <= j : within[q, m]} (inclusive prefix count) via one MXU
    # matmul against a lower-triangular ones mask.  NOTE: O(N^2) per batch --
    # fine for the moderate point-cloud sizes this module sees.
    row = lax.broadcasted_iota(jnp.int32, (n, n), 0)
    col = lax.broadcasted_iota(jnp.int32, (n, n), 1)
    tri = (row <= col).astype(jnp.float32)
    rank = jnp.dot(within_f, tri, preferred_element_type=jnp.float32)   # (tile_n, N)
    count = rank[:, n - 1:n]                                            # (tile_n, 1)

    dxs, dys = [], []
    for k in range(K):  # K is small and static -> unrolled
        sel = jnp.where(within & (rank == float(k + 1)), 1.0, 0.0)      # one-hot over N
        gx = jnp.sum(sel * xa, axis=1, keepdims=True)                   # (tile_n, 1)
        gy = jnp.sum(sel * ya, axis=1, keepdims=True)
        has = count >= float(k + 1)
        # missing neighbour -> self index in the module -> delta exactly 0
        dxs.append(jnp.where(has, xq - gx, 0.0))
        dys.append(jnp.where(has, yq - gy, 0.0))
    feats = jnp.concatenate(dxs + dys, axis=1)                          # (tile_n, 2K)
    feat_ref[0] = feats.astype(feat_ref.dtype)


# ---------------------------------------------------------------------------
# Kernel 2 (default): fused linear1 + BN-stats + BN + ReLU + linear2.
# Grid = (2, n_tiles): phase 0 writes y into a resident VMEM scratch and
# accumulates BN sums; the phase boundary folds them into scale/shift; phase 1
# normalises + ReLU + linear2 straight out of VMEM (no HBM round trip for y).
# Everything is in "row-grouped" layout: r rows packed into the lane dim.
# ---------------------------------------------------------------------------
def _fused_mlp_kernel(xg_ref, w1g_ref, b1g_ref, b1_ref, gamma_ref, beta_ref,
                      fold_ref, unfold_ref, w2g_ref, b2g_ref,
                      og_ref, y_vmem, stats_vmem, *, inv_m, eps):
    phase = pl.program_id(0)
    i = pl.program_id(1)
    tile_g = xg_ref.shape[0]

    # ---- phase 0: linear1 (bf16 MXU feed, f32 accumulate) + running BN sums ----
    @pl.when(phase == 0)
    def _():
        @pl.when(i == 0)
        def _():
            stats_vmem[...] = jnp.zeros_like(stats_vmem)
        z = jnp.dot(xg_ref[...], w1g_ref[...], preferred_element_type=jnp.float32)
        y = z + b1g_ref[...]
        row0 = pl.multiple_of(i * tile_g, tile_g)
        y_vmem[pl.ds(row0, tile_g), :] = y
        # (8, rH)-padded scratch; rows 0/1 hold sum(y) and bias-centred sum(z^2).
        stats_vmem[0:1, :] += jnp.sum(y, axis=0, keepdims=True)
        stats_vmem[1:2, :] += jnp.sum(z * z, axis=0, keepdims=True)

    # ---- phase boundary: fold grouped sums into per-feature scale/shift --------
    @pl.when(jnp.logical_and(phase == 1, i == 0))
    def _():
        s1 = jnp.dot(stats_vmem[0:1, :], fold_ref[...],
                     preferred_element_type=jnp.float32)                # (1, H)
        s2 = jnp.dot(stats_vmem[1:2, :], fold_ref[...],
                     preferred_element_type=jnp.float32)                # (1, H)
        mean = s1 * inv_m
        var = s2 * inv_m - (mean - b1_ref[...]) ** 2                    # biased var
        inv_std = lax.rsqrt(var + eps)
        scale = gamma_ref[...] * inv_std
        shift = beta_ref[...] - mean * scale
        stats_vmem[2:3, :] = jnp.dot(scale, unfold_ref[...],
                                     preferred_element_type=jnp.float32)
        stats_vmem[3:4, :] = jnp.dot(shift, unfold_ref[...],
                                     preferred_element_type=jnp.float32)

    # ---- phase 1: normalise + ReLU + linear2 from VMEM-resident y --------------
    @pl.when(phase == 1)
    def _():
        row0 = pl.multiple_of(i * tile_g, tile_g)
        y = y_vmem[pl.ds(row0, tile_g), :]
        h = jnp.maximum(y * stats_vmem[2:3, :] + stats_vmem[3:4, :], 0.0)
        o = jnp.dot(h.astype(w2g_ref.dtype), w2g_ref[...],
                    preferred_element_type=jnp.float32) + b2g_ref[...]
        og_ref[...] = o


# ---------------------------------------------------------------------------
# Two-pass fallback for very large M (y does not fit the VMEM budget): y is
# stored in HBM as bfloat16 (halves the write + re-read of the dominant
# intermediate); stats accumulate in an (8, rH) f32 block written once.
# ---------------------------------------------------------------------------
def _mlp_pass1_kernel(xg_ref, w1g_ref, b1g_ref, yg_ref, stats_ref):
    @pl.when(pl.program_id(0) == 0)
    def _():
        stats_ref[...] = jnp.zeros_like(stats_ref)
    z = jnp.dot(xg_ref[...], w1g_ref[...], preferred_element_type=jnp.float32)
    y = z + b1g_ref[...]
    yg_ref[...] = y.astype(yg_ref.dtype)
    stats_ref[0:1, :] += jnp.sum(y, axis=0, keepdims=True)
    stats_ref[1:2, :] += jnp.sum(z * z, axis=0, keepdims=True)


def _mlp_pass2_kernel(yg_ref, scale_ref, shift_ref, w2g_ref, b2g_ref, og_ref):
    y = yg_ref[...].astype(jnp.float32)
    h = jnp.maximum(y * scale_ref[...] + shift_ref[...], 0.0)
    og_ref[...] = jnp.dot(h.astype(w2g_ref.dtype), w2g_ref[...],
                          preferred_element_type=jnp.float32) + b2g_ref[...]


# ---------------------------------------------------------------------------
# Helpers.
# ---------------------------------------------------------------------------
def _pick_tile(dim, target):
    """Largest block <= target that divides `dim` and is a multiple of 8
    (second-minor block-dim rule), else the full extent (always legal)."""
    if dim <= target:
        return dim
    for cand in range(target - target % 8, 7, -8):
        if dim % cand == 0:
            return cand
    return dim


def _pick_group(m, f_in, hidden, f_out, max_weight_bytes=8 << 20):
    """Row-group factor r: packs r rows into lanes; block-diagonal weights grow
    as r^2, so keep them bounded."""
    for r in (8, 4, 2, 1):
        if m % r:
            continue
        wbytes = 2 * r * r * (f_in * hidden + hidden * f_out)   # bf16
        if wbytes <= max_weight_bytes:
            return r
    return 1


# ---------------------------------------------------------------------------
# Forward wrapper.
# ---------------------------------------------------------------------------
def spatial_embedding_forward(xytp, params, *, height, K, eps=1e-5,
                              tile_rows_target=4096, tile_n_target=512,
                              max_resident_y_bytes=40 << 20):
    """Pallas SpatialEmbedding forward.

    max_resident_y_bytes: VMEM budget for keeping the (M, H) hidden activations
    resident in the fused kernel.  Default 40 MiB is safe on v7x (64 MiB VMEM)
    as well as v5e/v6e (128 MiB); it may be raised to ~100 MiB on v5e/v6e.
    """
    B, N, C = xytp.shape
    assert C >= 3, "xytp must carry (t, x, y, ...) channels"
    w1, b1 = params["w1"], params["b1"]
    gamma, beta = params["gamma"], params["beta"]
    w2, b2 = params["w2"], params["b2"]
    hidden, f_in = w1.shape
    f_out = w2.shape[0]
    assert f_in == 2 * K and w2.shape[1] == hidden

    # ---- step 1: ball query + gather + delta features (per-batch kernel) ------
    xy = xytp[..., 1:3].astype(jnp.float32)                 # (B, N, 2)
    xy_t = jnp.swapaxes(xy, 1, 2)                           # (B, 2, N) candidate set
    radius = 5.0 / float(height)
    tile_n = _pick_tile(N, tile_n_target)

    # NOTE: the 2K-wide feature store is lane-sparse; it is the small intermediate
    # (bf16) and the MLP below consumes it in lane-dense grouped form.
    feats = pl.pallas_call(
        functools.partial(_delta_feats_kernel, radius_sq=radius * radius, K=K),
        out_shape=jax.ShapeDtypeStruct((B, N, 2 * K), jnp.bfloat16),
        grid_spec=pltpu.PrefetchScalarGridSpec(
            num_scalar_prefetch=0,
            grid=(B, N // tile_n),
            in_specs=[pl.BlockSpec((1, tile_n, 2), lambda b, i: (b, i, 0)),
                      pl.BlockSpec((1, 2, N), lambda b, i: (b, 0, 0))],
            out_specs=pl.BlockSpec((1, tile_n, 2 * K), lambda b, i: (b, i, 0)),
        ),
        compiler_params=pltpu.CompilerParams(
            dimension_semantics=("parallel", "parallel")),
    )(xy, xy_t)

    # ---- step 2: grouped (lane-dense) MLP --------------------------------------
    M = B * N
    r = _pick_group(M, f_in, hidden, f_out)
    Mg, rF, rH, rFo = M // r, r * f_in, r * hidden, r * f_out

    # The kernel emits features as [dx_0..dx_{K-1}, dy_0..dy_{K-1}]; permute W1's
    # input rows once in the wrapper so no in-kernel relayout is ever needed.
    perm = jnp.concatenate([2 * jnp.arange(K), 2 * jnp.arange(K) + 1])
    w1t = jnp.transpose(w1)[perm, :]                        # (f_in, hidden)
    w2t = jnp.transpose(w2)                                 # (hidden, f_out)
    eye_r = jnp.eye(r, dtype=jnp.float32)
    w1g = jnp.kron(eye_r, w1t).astype(jnp.bfloat16)         # (rF, rH) block-diagonal
    w2g = jnp.kron(eye_r, w2t).astype(jnp.bfloat16)         # (rH, rFo)
    b1g = jnp.tile(b1, r)[None, :].astype(jnp.float32)      # (1, rH)
    b2g = jnp.tile(b2, r)[None, :].astype(jnp.float32)      # (1, rFo)
    fold = jnp.tile(jnp.eye(hidden, dtype=jnp.float32), (r, 1))    # (rH, hidden)
    unfold = jnp.tile(jnp.eye(hidden, dtype=jnp.float32), (1, r))  # (hidden, rH)
    b1_row = b1[None, :].astype(jnp.float32)
    gamma_row = gamma[None, :].astype(jnp.float32)
    beta_row = beta[None, :].astype(jnp.float32)

    # (B, N, 2K) -> (Mg, rF) is a free row-major reinterpretation.
    xg = feats.reshape(Mg, rF)

    tile_g = _pick_tile(Mg, max(8, tile_rows_target // r))
    n_tiles = Mg // tile_g
    y_bytes = Mg * rH * 4

    if y_bytes <= max_resident_y_bytes:
        # Fused path: y never leaves VMEM.  Both grid axes stay "arbitrary"
        # because of the resident scratch (the fallback's pass 2 is megacore-
        # parallel instead).
        aux_bytes = (2 * (int(w1g.size) + int(w2g.size))
                     + 4 * (int(fold.size) + int(unfold.size))
                     + 4 * tile_g * (2 * rF + 4 * rFo) + 4 * 8 * rH)
        vmem_limit = int(min(120 << 20,
                             max(32 << 20, y_bytes + aux_bytes + (8 << 20))))
        og = pl.pallas_call(
            functools.partial(_fused_mlp_kernel, inv_m=1.0 / M, eps=eps),
            out_shape=jax.ShapeDtypeStruct((Mg, rFo), jnp.float32),
            grid_spec=pltpu.PrefetchScalarGridSpec(
                num_scalar_prefetch=0,
                grid=(2, n_tiles),
                in_specs=[
                    # x only needed in phase 0: park its block index in phase 1.
                    pl.BlockSpec((tile_g, rF), lambda p, i: (i * (1 - p), 0)),
                    pl.BlockSpec((rF, rH), lambda p, i: (0, 0)),        # w1g
                    pl.BlockSpec((1, rH), lambda p, i: (0, 0)),         # b1g
                    pl.BlockSpec((1, hidden), lambda p, i: (0, 0)),     # b1
                    pl.BlockSpec((1, hidden), lambda p, i: (0, 0)),     # gamma
                    pl.BlockSpec((1, hidden), lambda p, i: (0, 0)),     # beta
                    pl.BlockSpec((rH, hidden), lambda p, i: (0, 0)),    # fold
                    pl.BlockSpec((hidden, rH), lambda p, i: (0, 0)),    # unfold
                    pl.BlockSpec((rH, rFo), lambda p, i: (0, 0)),       # w2g
                    pl.BlockSpec((1, rFo), lambda p, i: (0, 0)),        # b2g
                ],
                # output only produced in phase 1: park its block index before.
                out_specs=pl.BlockSpec((tile_g, rFo), lambda p, i: (i * p, 0)),
                scratch_shapes=[pltpu.VMEM((Mg, rH), jnp.float32),
                                pltpu.VMEM((8, rH), jnp.float32)],
            ),
            compiler_params=pltpu.CompilerParams(
                dimension_semantics=("arbitrary", "arbitrary"),
                vmem_limit_bytes=vmem_limit),
        )(xg, w1g, b1g, b1_row, gamma_row, beta_row, fold, unfold, w2g, b2g)
    else:
        # Two-pass fallback: y goes through HBM as bf16.
        # TODO(synk): pass 1 keeps its stats accumulator resident ("arbitrary");
        # per-core partial sums would let it shard across v7x's two TensorCores.
        yg, stats = pl.pallas_call(
            _mlp_pass1_kernel,
            out_shape=(jax.ShapeDtypeStruct((Mg, rH), jnp.bfloat16),
                       jax.ShapeDtypeStruct((8, rH), jnp.float32)),
            grid_spec=pltpu.PrefetchScalarGridSpec(
                num_scalar_prefetch=0,
                grid=(n_tiles,),
                in_specs=[pl.BlockSpec((tile_g, rF), lambda i: (i, 0)),
                          pl.BlockSpec((rF, rH), lambda i: (0, 0)),
                          pl.BlockSpec((1, rH), lambda i: (0, 0))],
                out_specs=(pl.BlockSpec((tile_g, rH), lambda i: (i, 0)),
                           pl.BlockSpec((8, rH), lambda i: (0, 0))),
            ),
            compiler_params=pltpu.CompilerParams(
                dimension_semantics=("arbitrary",)),
        )(xg, w1g, b1g)

        s1 = jnp.sum(stats[0].reshape(r, hidden), axis=0)
        s2 = jnp.sum(stats[1].reshape(r, hidden), axis=0)
        mean = s1 / M
        var = s2 / M - (mean - b1) ** 2
        inv_std = lax.rsqrt(var + eps)
        scale = gamma * inv_std
        shift = beta - mean * scale
        scale_g = jnp.tile(scale, r)[None, :]
        shift_g = jnp.tile(shift, r)[None, :]

        og = pl.pallas_call(
            _mlp_pass2_kernel,
            out_shape=jax.ShapeDtypeStruct((Mg, rFo), jnp.float32),
            grid_spec=pltpu.PrefetchScalarGridSpec(
                num_scalar_prefetch=0,
                grid=(n_tiles,),
                in_specs=[pl.BlockSpec((tile_g, rH), lambda i: (i, 0)),
                          pl.BlockSpec((1, rH), lambda i: (0, 0)),
                          pl.BlockSpec((1, rH), lambda i: (0, 0)),
                          pl.BlockSpec((rH, rFo), lambda i: (0, 0)),
                          pl.BlockSpec((1, rFo), lambda i: (0, 0))],
                out_specs=pl.BlockSpec((tile_g, rFo), lambda i: (i, 0)),
            ),
            compiler_params=pltpu.CompilerParams(
                dimension_semantics=("parallel",)),
        )(yg, scale_g, shift_g, w2g, b2g)

    # (Mg, r*f_out) row-major == (B, N, f_out) row-major: free reshape.
    return og.reshape(B, N, f_out)


# ---------------------------------------------------------------------------
# Deterministic parameter init (MLP(in=2K, hidden=2*out, out=out); nn.Linear
# default init, BatchNorm1d defaults gamma=1, beta=0).
# ---------------------------------------------------------------------------
def init_params(key, K, out_channel):
    in_channel = 2 * K
    hidden = 2 * out_channel
    k1, k2, k3, k4 = jax.random.split(key, 4)
    bound1 = 1.0 / math.sqrt(in_channel)
    bound2 = 1.0 / math.sqrt(hidden)
    w1 = jax.random.uniform(k1, (hidden, in_channel), jnp.float32, -bound1, bound1)
    b1 = jax.random.uniform(k2, (hidden,), jnp.float32, -bound1, bound1)
    w2 = jax.random.uniform(k3, (out_channel, hidden), jnp.float32, -bound2, bound2)
    b2 = jax.random.uniform(k4, (out_channel,), jnp.float32, -bound2, bound2)
    return dict(w1=w1, b1=b1, w2=w2, b2=b2,
                gamma=jnp.ones((hidden,), jnp.float32),
                beta=jnp.zeros((hidden,), jnp.float32))


def _reference(xytp, params, *, height, K, eps=1e-5):
    """Pure-JAX (f32) replica of SpatialEmbedding.forward (training-mode BN)."""
    B, N, _ = xytp.shape
    xy = xytp[..., 1:3].astype(jnp.float32)
    radius = 5.0 / float(height)
    d2 = jnp.sum((xy[:, :, None, :] - xy[:, None, :, :]) ** 2, axis=-1)
    within = d2 < radius * radius
    col = jnp.arange(N)
    # pytorch3d ball_query: FIRST K points (index order) within radius, pad -1;
    # the module replaces -1 with the query's own index.
    sort_key = jnp.where(within, col[None, None, :], N + col[None, None, :])
    first_k = jnp.sort(sort_key, axis=-1)[..., :K]
    count = jnp.sum(within, axis=-1, keepdims=True)
    valid = jnp.arange(K)[None, None, :] < count
    self_idx = jnp.broadcast_to(col[None, :, None], (B, N, K))
    idx = jnp.where(valid, first_k, self_idx)
    gathered = jax.vmap(lambda pts, ind: pts[ind])(xy, idx)      # (B, N, K, 2)
    delta = xy[:, :, None, :] - gathered
    feats = delta.reshape(B * N, 2 * K)

    y = feats @ params["w1"].T + params["b1"]
    mean = y.mean(axis=0)
    var = y.var(axis=0)                                          # biased
    h = (y - mean) / jnp.sqrt(var + eps) * params["gamma"] + params["beta"]
    h = jnp.maximum(h, 0.0)
    out = h @ params["w2"].T + params["b2"]
    return out.reshape(B, N, -1)


if __name__ == "__main__":
    key = jax.random.PRNGKey(0)
    kxy, kt, kp, kparams = jax.random.split(key, 4)

    B, N, K, out_channel = 2, 64, 8, 16
    height = width = 8          # radius = 5/8, so both "found" and "self" paths run

    t = jax.random.uniform(kt, (B, N, 1), jnp.float32)
    xy = jax.random.uniform(kxy, (B, N, 2), jnp.float32, minval=0.0, maxval=2.0)
    pol = jax.random.uniform(kp, (B, N, 1), jnp.float32)
    xytp = jnp.concatenate([t, xy, pol], axis=-1)                # (B, N, 4)
    params = init_params(kparams, K, out_channel)

    ref = _reference(xytp, params, height=height, K=K)

    def _check(out, tag):
        assert out.shape == (B, N, out_channel)
        err = float(jnp.max(jnp.abs(out - ref)))
        # Tolerance sized for bf16 MXU feeds (~1% relative) against the f32 ref.
        scale = float(jnp.max(jnp.abs(ref))) + 1.0
        assert err < 5e-2 * scale, f"{tag}: max abs err {err} vs ref scale {scale}"

    # fused (y resident in VMEM) path
    out_fused = spatial_embedding_forward(xytp, params, height=height, K=K)
    out_fused = jax.block_until_ready(out_fused)
    _check(out_fused, "fused path")

    # two-pass fallback path (bf16 y through HBM), forced via a zero budget
    out_two = spatial_embedding_forward(xytp, params, height=height, K=K,
                                        max_resident_y_bytes=0)
    out_two = jax.block_until_ready(out_two)
    _check(out_two, "two-pass path")

    print("KERNEL_OK")
</pallas_src>

<mosaic_0001>
module attributes {stable_mosaic.version = 11 : i64} {
  func.func @_delta_feats_kernel(%arg0: i32, %arg1: i32, %arg2: memref<1x64x2xf32, #tpu.memory_space<vmem>>, %arg3: memref<1x2x64xf32, #tpu.memory_space<vmem>>, %arg4: memref<1x64x16xbf16, #tpu.memory_space<vmem>>) attributes {dimension_semantics = [#tpu.dimension_semantics<parallel>, #tpu.dimension_semantics<parallel>], iteration_bounds = array<i64: 2, 1>, scalar_prefetch = 0 : i64, scratch_operands = 0 : i64, tpu.core_type = #tpu.core_type<tc>, window_params = [{transform_indices = @transform_0, window_bounds = array<i64: 1, 64, 2>}, {transform_indices = @transform_1, window_bounds = array<i64: 1, 2, 64>}, {transform_indices = @transform_2, window_bounds = array<i64: 1, 64, 16>}]} {
    %c0 = arith.constant 0 : index
    %c0_0 = arith.constant 0 : index
    %c0_1 = arith.constant 0 : index
    %0 = vector.load %arg2[%c0, %c0_0, %c0_1] : memref<1x64x2xf32, #tpu.memory_space<vmem>>, vector<1x64x2xf32>
    %1 = vector.shape_cast %0 : vector<1x64x2xf32> to vector<64x2xf32>
    %2 = vector.extract_strided_slice %1 {offsets = [0, 0], sizes = [64, 1], strides = [1, 1]} : vector<64x2xf32> to vector<64x1xf32>
    %3 = vector.extract_strided_slice %1 {offsets = [0, 1], sizes = [64, 1], strides = [1, 1]} : vector<64x2xf32> to vector<64x1xf32>
    %c0_2 = arith.constant 0 : index
    %c0_3 = arith.constant 0 : index
    %c0_4 = arith.constant 0 : index
    %4 = vector.load %arg3[%c0_2, %c0_3, %c0_4] : memref<1x2x64xf32, #tpu.memory_space<vmem>>, vector<1x2x64xf32>
    %5 = vector.shape_cast %4 : vector<1x2x64xf32> to vector<2x64xf32>
    %6 = vector.extract_strided_slice %5 {offsets = [0, 0], sizes = [1, 64], strides = [1, 1]} : vector<2x64xf32> to vector<1x64xf32>
    %7 = vector.extract_strided_slice %5 {offsets = [1, 0], sizes = [1, 64], strides = [1, 1]} : vector<2x64xf32> to vector<1x64xf32>
    %8 = vector.broadcast %2 : vector<64x1xf32> to vector<64x64xf32>
    %9 = vector.broadcast %6 : vector<1x64xf32> to vector<64x64xf32>
    %10 = arith.subf %8, %9 : vector<64x64xf32>
    %11 = arith.mulf %10, %10 : vector<64x64xf32>
    %12 = vector.broadcast %3 : vector<64x1xf32> to vector<64x64xf32>
    %13 = vector.broadcast %7 : vector<1x64xf32> to vector<64x64xf32>
    %14 = arith.subf %12, %13 : vector<64x64xf32>
    %15 = arith.mulf %14, %14 : vector<64x64xf32>
    %16 = arith.addf %11, %15 : vector<64x64xf32>
    %cst = arith.constant 3.906250e-01 : f32
    %17 = vector.broadcast %cst : f32 to vector<64x64xf32>
    %18 = arith.cmpf olt, %16, %17 : vector<64x64xf32>
    %19 = arith.extui %18 : vector<64x64xi1> to vector<64x64xi32>
    %20 = arith.sitofp %19 : vector<64x64xi32> to vector<64x64xf32>
    %21 = tpu.iota {dimensions = array<i32: 0>} : vector<64x64xi32>
    %22 = tpu.iota {dimensions = array<i32: 1>} : vector<64x64xi32>
    %23 = arith.cmpi sle, %21, %22 : vector<64x64xi32>
    %24 = arith.extui %23 : vector<64x64xi1> to vector<64x64xi32>
    %25 = arith.sitofp %24 : vector<64x64xi32> to vector<64x64xf32>
    %cst_5 = arith.constant dense<0.000000e+00> : vector<64x64xf32>
    %26 = tpu.matmul %20, %25, %cst_5 {dimension_numbers = #tpu.dot_dimension_numbers<[1], [0], [0], [1], [0, 0, 1, 1], [], []>} : vector<64x64xf32>, vector<64x64xf32>, vector<64x64xf32> -> vector<64x64xf32>
    %27 = vector.extract_strided_slice %26 {offsets = [0, 63], sizes = [64, 1], strides = [1, 1]} : vector<64x64xf32> to vector<64x1xf32>
    %cst_6 = arith.constant 1.000000e+00 : f32
    %28 = vector.broadcast %cst_6 : f32 to vector<64x64xf32>
    %29 = arith.cmpf oeq, %26, %28 : vector<64x64xf32>
    %30 = arith.andi %18, %29 : vector<64x64xi1>
    %cst_7 = arith.constant 1.000000e+00 : f32
    %cst_8 = arith.constant 0.000000e+00 : f32
    %31 = vector.broadcast %cst_7 : f32 to vector<64x64xf32>
    %32 = vector.broadcast %cst_8 : f32 to vector<64x64xf32>
    %33 = arith.select %30, %31, %32 : vector<64x64xi1>, vector<64x64xf32>
    %34 = vector.broadcast %6 : vector<1x64xf32> to vector<64x64xf32>
    %35 = arith.mulf %33, %34 : vector<64x64xf32>
    %cst_9 = arith.constant dense<0.000000e+00> : vector<64xf32>
    %36 = vector.multi_reduction <add>, %35, %cst_9 [1] : vector<64x64xf32> to vector<64xf32>
    %37 = vector.shape_cast %36 : vector<64xf32> to vector<64x1xf32>
    %38 = vector.broadcast %7 : vector<1x64xf32> to vector<64x64xf32>
    %39 = arith.mulf %33, %38 : vector<64x64xf32>
    %cst_10 = arith.constant dense<0.000000e+00> : vector<64xf32>
    %40 = vector.multi_reduction <add>, %39, %cst_10 [1] : vector<64x64xf32> to vector<64xf32>
    %41 = vector.shape_cast %40 : vector<64xf32> to vector<64x1xf32>
    %cst_11 = arith.constant 1.000000e+00 : f32
    %42 = vector.broadcast %cst_11 : f32 to vector<64x1xf32>
    %43 = arith.cmpf oge, %27, %42 : vector<64x1xf32>
    %44 = arith.subf %2, %37 : vector<64x1xf32>
    %cst_12 = arith.constant 0.000000e+00 : f32
    %45 = vector.broadcast %cst_12 : f32 to vector<64x1xf32>
    %46 = arith.select %43, %44, %45 : vector<64x1xi1>, vector<64x1xf32>
    %47 = arith.subf %3, %41 : vector<64x1xf32>
    %cst_13 = arith.constant 0.000000e+00 : f32
    %48 = vector.broadcast %cst_13 : f32 to vector<64x1xf32>
    %49 = arith.select %43, %47, %48 : vector<64x1xi1>, vector<64x1xf32>
    %cst_14 = arith.constant 2.000000e+00 : f32
    %50 = vector.broadcast %cst_14 : f32 to vector<64x64xf32>
    %51 = arith.cmpf oeq, %26, %50 : vector<64x64xf32>
    %52 = arith.andi %18, %51 : vector<64x64xi1>
    %cst_15 = arith.constant 1.000000e+00 : f32
    %cst_16 = arith.constant 0.000000e+00 : f32
    %53 = vector.broadcast %cst_15 : f32 to vector<64x64xf32>
    %54 = vector.broadcast %cst_16 : f32 to vector<64x64xf32>
    %55 = arith.select %52, %53, %54 : vector<64x64xi1>, vector<64x64xf32>
    %56 = vector.broadcast %6 : vector<1x64xf32> to vector<64x64xf32>
    %57 = arith.mulf %55, %56 : vector<64x64xf32>
    %cst_17 = arith.constant dense<0.000000e+00> : vector<64xf32>
    %58 = vector.multi_reduction <add>, %57, %cst_17 [1] : vector<64x64xf32> to vector<64xf32>
    %59 = vector.shape_cast %58 : vector<64xf32> to vector<64x1xf32>
    %60 = vector.broadcast %7 : vector<1x64xf32> to vector<64x64xf32>
    %61 = arith.mulf %55, %60 : vector<64x64xf32>
    %cst_18 = arith.constant dense<0.000000e+00> : vector<64xf32>
    %62 = vector.multi_reduction <add>, %61, %cst_18 [1] : vector<64x64xf32> to vector<64xf32>
    %63 = vector.shape_cast %62 : vector<64xf32> to vector<64x1xf32>
    %cst_19 = arith.constant 2.000000e+00 : f32
    %64 = vector.broadcast %cst_19 : f32 to vector<64x1xf32>
    %65 = arith.cmpf oge, %27, %64 : vector<64x1xf32>
    %66 = arith.subf %2, %59 : vector<64x1xf32>
    %cst_20 = arith.constant 0.000000e+00 : f32
    %67 = vector.broadcast %cst_20 : f32 to vector<64x1xf32>
    %68 = arith.select %65, %66, %67 : vector<64x1xi1>, vector<64x1xf32>
    %69 = arith.subf %3, %63 : vector<64x1xf32>
    %cst_21 = arith.constant 0.000000e+00 : f32
    %70 = vector.broadcast %cst_21 : f32 to vector<64x1xf32>
    %71 = arith.select %65, %69, %70 : vector<64x1xi1>, vector<64x1xf32>
    %cst_22 = arith.constant 3.000000e+00 : f32
    %72 = vector.broadcast %cst_22 : f32 to vector<64x64xf32>
    %73 = arith.cmpf oeq, %26, %72 : vector<64x64xf32>
    %74 = arith.andi %18, %73 : vector<64x64xi1>
    %cst_23 = arith.constant 1.000000e+00 : f32
    %cst_24 = arith.constant 0.000000e+00 : f32
    %75 = vector.broadcast %cst_23 : f32 to vector<64x64xf32>
    %76 = vector.broadcast %cst_24 : f32 to vector<64x64xf32>
    %77 = arith.select %74, %75, %76 : vector<64x64xi1>, vector<64x64xf32>
    %78 = vector.broadcast %6 : vector<1x64xf32> to vector<64x64xf32>
    %79 = arith.mulf %77, %78 : vector<64x64xf32>
    %cst_25 = arith.constant dense<0.000000e+00> : vector<64xf32>
    %80 = vector.multi_reduction <add>, %79, %cst_25 [1] : vector<64x64xf32> to vector<64xf32>
    %81 = vector.shape_cast %80 : vector<64xf32> to vector<64x1xf32>
    %82 = vector.broadcast %7 : vector<1x64xf32> to vector<64x64xf32>
    %83 = arith.mulf %77, %82 : vector<64x64xf32>
    %cst_26 = arith.constant dense<0.000000e+00> : vector<64xf32>
    %84 = vector.multi_reduction <add>, %83, %cst_26 [1] : vector<64x64xf32> to vector<64xf32>
    %85 = vector.shape_cast %84 : vector<64xf32> to vector<64x1xf32>
    %cst_27 = arith.constant 3.000000e+00 : f32
    %86 = vector.broadcast %cst_27 : f32 to vector<64x1xf32>
    %87 = arith.cmpf oge, %27, %86 : vector<64x1xf32>
    %88 = arith.subf %2, %81 : vector<64x1xf32>
    %cst_28 = arith.constant 0.000000e+00 : f32
    %89 = vector.broadcast %cst_28 : f32 to vector<64x1xf32>
    %90 = arith.select %87, %88, %89 : vector<64x1xi1>, vector<64x1xf32>
    %91 = arith.subf %3, %85 : vector<64x1xf32>
    %cst_29 = arith.constant 0.000000e+00 : f32
    %92 = vector.broadcast %cst_29 : f32 to vector<64x1xf32>
    %93 = arith.select %87, %91, %92 : vector<64x1xi1>, vector<64x1xf32>
    %cst_30 = arith.constant 4.000000e+00 : f32
    %94 = vector.broadcast %cst_30 : f32 to vector<64x64xf32>
    %95 = arith.cmpf oeq, %26, %94 : vector<64x64xf32>
    %96 = arith.andi %18, %95 : vector<64x64xi1>
    %cst_31 = arith.constant 1.000000e+00 : f32
    %cst_32 = arith.constant 0.000000e+00 : f32
    %97 = vector.broadcast %cst_31 : f32 to vector<64x64xf32>
    %98 = vector.broadcast %cst_32 : f32 to vector<64x64xf32>
    %99 = arith.select %96, %97, %98 : vector<64x64xi1>, vector<64x64xf32>
    %100 = vector.broadcast %6 : vector<1x64xf32> to vector<64x64xf32>
    %101 = arith.mulf %99, %100 : vector<64x64xf32>
    %cst_33 = arith.constant dense<0.000000e+00> : vector<64xf32>
    %102 = vector.multi_reduction <add>, %101, %cst_33 [1] : vector<64x64xf32> to vector<64xf32>
    %103 = vector.shape_cast %102 : vector<64xf32> to vector<64x1xf32>
    %104 = vector.broadcast %7 : vector<1x64xf32> to vector<64x64xf32>
    %105 = arith.mulf %99, %104 : vector<64x64xf32>
    %cst_34 = arith.constant dense<0.000000e+00> : vector<64xf32>
    %106 = vector.multi_reduction <add>, %105, %cst_34 [1] : vector<64x64xf32> to vector<64xf32>
    %107 = vector.shape_cast %106 : vector<64xf32> to vector<64x1xf32>
    %cst_35 = arith.constant 4.000000e+00 : f32
    %108 = vector.broadcast %cst_35 : f32 to vector<64x1xf32>
    %109 = arith.cmpf oge, %27, %108 : vector<64x1xf32>
    %110 = arith.subf %2, %103 : vector<64x1xf32>
    %cst_36 = arith.constant 0.000000e+00 : f32
    %111 = vector.broadcast %cst_36 : f32 to vector<64x1xf32>
    %112 = arith.select %109, %110, %111 : vector<64x1xi1>, vector<64x1xf32>
    %113 = arith.subf %3, %107 : vector<64x1xf32>
    %cst_37 = arith.constant 0.000000e+00 : f32
    %114 = vector.broadcast %cst_37 : f32 to vector<64x1xf32>
    %115 = arith.select %109, %113, %114 : vector<64x1xi1>, vector<64x1xf32>
    %cst_38 = arith.constant 5.000000e+00 : f32
    %116 = vector.broadcast %cst_38 : f32 to vector<64x64xf32>
    %117 = arith.cmpf oeq, %26, %116 : vector<64x64xf32>
    %118 = arith.andi %18, %117 : vector<64x64xi1>
    %cst_39 = arith.constant 1.000000e+00 : f32
    %cst_40 = arith.constant 0.000000e+00 : f32
    %119 = vector.broadcast %cst_39 : f32 to vector<64x64xf32>
    %120 = vector.broadcast %cst_40 : f32 to vector<64x64xf32>
    %121 = arith.select %118, %119, %120 : vector<64x64xi1>, vector<64x64xf32>
    %122 = vector.broadcast %6 : vector<1x64xf32> to vector<64x64xf32>
    %123 = arith.mulf %121, %122 : vector<64x64xf32>
    %cst_41 = arith.constant dense<0.000000e+00> : vector<64xf32>
    %124 = vector.multi_reduction <add>, %123, %cst_41 [1] : vector<64x64xf32> to vector<64xf32>
    %125 = vector.shape_cast %124 : vector<64xf32> to vector<64x1xf32>
    %126 = vector.broadcast %7 : vector<1x64xf32> to vector<64x64xf32>
    %127 = arith.mulf %121, %126 : vector<64x64xf32>
    %cst_42 = arith.constant dense<0.000000e+00> : vector<64xf32>
    %128 = vector.multi_reduction <add>, %127, %cst_42 [1] : vector<64x64xf32> to vector<64xf32>
    %129 = vector.shape_cast %128 : vector<64xf32> to vector<64x1xf32>
    %cst_43 = arith.constant 5.000000e+00 : f32
    %130 = vector.broadcast %cst_43 : f32 to vector<64x1xf32>
    %131 = arith.cmpf oge, %27, %130 : vector<64x1xf32>
    %132 = arith.subf %2, %125 : vector<64x1xf32>
    %cst_44 = arith.constant 0.000000e+00 : f32
    %133 = vector.broadcast %cst_44 : f32 to vector<64x1xf32>
    %134 = arith.select %131, %132, %133 : vector<64x1xi1>, vector<64x1xf32>
    %135 = arith.subf %3, %129 : vector<64x1xf32>
    %cst_45 = arith.constant 0.000000e+00 : f32
    %136 = vector.broadcast %cst_45 : f32 to vector<64x1xf32>
    %137 = arith.select %131, %135, %136 : vector<64x1xi1>, vector<64x1xf32>
    %cst_46 = arith.constant 6.000000e+00 : f32
    %138 = vector.broadcast %cst_46 : f32 to vector<64x64xf32>
    %139 = arith.cmpf oeq, %26, %138 : vector<64x64xf32>
    %140 = arith.andi %18, %139 : vector<64x64xi1>
    %cst_47 = arith.constant 1.000000e+00 : f32
    %cst_48 = arith.constant 0.000000e+00 : f32
    %141 = vector.broadcast %cst_47 : f32 to vector<64x64xf32>
    %142 = vector.broadcast %cst_48 : f32 to vector<64x64xf32>
    %143 = arith.select %140, %141, %142 : vector<64x64xi1>, vector<64x64xf32>
    %144 = vector.broadcast %6 : vector<1x64xf32> to vector<64x64xf32>
    %145 = arith.mulf %143, %144 : vector<64x64xf32>
    %cst_49 = arith.constant dense<0.000000e+00> : vector<64xf32>
    %146 = vector.multi_reduction <add>, %145, %cst_49 [1] : vector<64x64xf32> to vector<64xf32>
    %147 = vector.shape_cast %146 : vector<64xf32> to vector<64x1xf32>
    %148 = vector.broadcast %7 : vector<1x64xf32> to vector<64x64xf32>
    %149 = arith.mulf %143, %148 : vector<64x64xf32>
    %cst_50 = arith.constant dense<0.000000e+00> : vector<64xf32>
    %150 = vector.multi_reduction <add>, %149, %cst_50 [1] : vector<64x64xf32> to vector<64xf32>
    %151 = vector.shape_cast %150 : vector<64xf32> to vector<64x1xf32>
    %cst_51 = arith.constant 6.000000e+00 : f32
    %152 = vector.broadcast %cst_51 : f32 to vector<64x1xf32>
    %153 = arith.cmpf oge, %27, %152 : vector<64x1xf32>
    %154 = arith.subf %2, %147 : vector<64x1xf32>
    %cst_52 = arith.constant 0.000000e+00 : f32
    %155 = vector.broadcast %cst_52 : f32 to vector<64x1xf32>
    %156 = arith.select %153, %154, %155 : vector<64x1xi1>, vector<64x1xf32>
    %157 = arith.subf %3, %151 : vector<64x1xf32>
    %cst_53 = arith.constant 0.000000e+00 : f32
    %158 = vector.broadcast %cst_53 : f32 to vector<64x1xf32>
    %159 = arith.select %153, %157, %158 : vector<64x1xi1>, vector<64x1xf32>
    %cst_54 = arith.constant 7.000000e+00 : f32
    %160 = vector.broadcast %cst_54 : f32 to vector<64x64xf32>
    %161 = arith.cmpf oeq, %26, %160 : vector<64x64xf32>
    %162 = arith.andi %18, %161 : vector<64x64xi1>
    %cst_55 = arith.constant 1.000000e+00 : f32
    %cst_56 = arith.constant 0.000000e+00 : f32
    %163 = vector.broadcast %cst_55 : f32 to vector<64x64xf32>
    %164 = vector.broadcast %cst_56 : f32 to vector<64x64xf32>
    %165 = arith.select %162, %163, %164 : vector<64x64xi1>, vector<64x64xf32>
    %166 = vector.broadcast %6 : vector<1x64xf32> to vector<64x64xf32>
    %167 = arith.mulf %165, %166 : vector<64x64xf32>
    %cst_57 = arith.constant dense<0.000000e+00> : vector<64xf32>
    %168 = vector.multi_reduction <add>, %167, %cst_57 [1] : vector<64x64xf32> to vector<64xf32>
    %169 = vector.shape_cast %168 : vector<64xf32> to vector<64x1xf32>
    %170 = vector.broadcast %7 : vector<1x64xf32> to vector<64x64xf32>
    %171 = arith.mulf %165, %170 : vector<64x64xf32>
    %cst_58 = arith.constant dense<0.000000e+00> : vector<64xf32>
    %172 = vector.multi_reduction <add>, %171, %cst_58 [1] : vector<64x64xf32> to vector<64xf32>
    %173 = vector.shape_cast %172 : vector<64xf32> to vector<64x1xf32>
    %cst_59 = arith.constant 7.000000e+00 : f32
    %174 = vector.broadcast %cst_59 : f32 to vector<64x1xf32>
    %175 = arith.cmpf oge, %27, %174 : vector<64x1xf32>
    %176 = arith.subf %2, %169 : vector<64x1xf32>
    %cst_60 = arith.constant 0.000000e+00 : f32
    %177 = vector.broadcast %cst_60 : f32 to vector<64x1xf32>
    %178 = arith.select %175, %176, %177 : vector<64x1xi1>, vector<64x1xf32>
    %179 = arith.subf %3, %173 : vector<64x1xf32>
    %cst_61 = arith.constant 0.000000e+00 : f32
    %180 = vector.broadcast %cst_61 : f32 to vector<64x1xf32>
    %181 = arith.select %175, %179, %180 : vector<64x1xi1>, vector<64x1xf32>
    %cst_62 = arith.constant 8.000000e+00 : f32
    %182 = vector.broadcast %cst_62 : f32 to vector<64x64xf32>
    %183 = arith.cmpf oeq, %26, %182 : vector<64x64xf32>
    %184 = arith.andi %18, %183 : vector<64x64xi1>
    %cst_63 = arith.constant 1.000000e+00 : f32
    %cst_64 = arith.constant 0.000000e+00 : f32
    %185 = vector.broadcast %cst_63 : f32 to vector<64x64xf32>
    %186 = vector.broadcast %cst_64 : f32 to vector<64x64xf32>
    %187 = arith.select %184, %185, %186 : vector<64x64xi1>, vector<64x64xf32>
    %188 = vector.broadcast %6 : vector<1x64xf32> to vector<64x64xf32>
    %189 = arith.mulf %187, %188 : vector<64x64xf32>
    %cst_65 = arith.constant dense<0.000000e+00> : vector<64xf32>
    %190 = vector.multi_reduction <add>, %189, %cst_65 [1] : vector<64x64xf32> to vector<64xf32>
    %191 = vector.shape_cast %190 : vector<64xf32> to vector<64x1xf32>
    %192 = vector.broadcast %7 : vector<1x64xf32> to vector<64x64xf32>
    %193 = arith.mulf %187, %192 : vector<64x64xf32>
    %cst_66 = arith.constant dense<0.000000e+00> : vector<64xf32>
    %194 = vector.multi_reduction <add>, %193, %cst_66 [1] : vector<64x64xf32> to vector<64xf32>
    %195 = vector.shape_cast %194 : vector<64xf32> to vector<64x1xf32>
    %cst_67 = arith.constant 8.000000e+00 : f32
    %196 = vector.broadcast %cst_67 : f32 to vector<64x1xf32>
    %197 = arith.cmpf oge, %27, %196 : vector<64x1xf32>
    %198 = arith.subf %2, %191 : vector<64x1xf32>
    %cst_68 = arith.constant 0.000000e+00 : f32
    %199 = vector.broadcast %cst_68 : f32 to vector<64x1xf32>
    %200 = arith.select %197, %198, %199 : vector<64x1xi1>, vector<64x1xf32>
    %201 = arith.subf %3, %195 : vector<64x1xf32>
    %cst_69 = arith.constant 0.000000e+00 : f32
    %202 = vector.broadcast %cst_69 : f32 to vector<64x1xf32>
    %203 = arith.select %197, %201, %202 : vector<64x1xi1>, vector<64x1xf32>
    %204 = tpu.concatenate %46, %68, %90, %112, %134, %156, %178, %200, %49, %71, %93, %115, %137, %159, %181, %203 in 1 : vector<64x1xf32>, vector<64x1xf32>, vector<64x1xf32>, vector<64x1xf32>, vector<64x1xf32>, vector<64x1xf32>, vector<64x1xf32>, vector<64x1xf32>, vector<64x1xf32>, vector<64x1xf32>, vector<64x1xf32>, vector<64x1xf32>, vector<64x1xf32>, vector<64x1xf32>, vector<64x1xf32>, vector<64x1xf32> -> vector<64x16xf32>
    %205 = arith.truncf %204 : vector<64x16xf32> to vector<64x16xbf16>
    %c0_70 = arith.constant 0 : index
    %c0_71 = arith.constant 0 : index
    %c0_72 = arith.constant 0 : index
    %206 = vector.load %arg4[%c0_70, %c0_71, %c0_72] : memref<1x64x16xbf16, #tpu.memory_space<vmem>>, vector<1x64x16xbf16>
    %207 = vector.shape_cast %206 : vector<1x64x16xbf16> to vector<64x16xbf16>
    %208 = vector.shape_cast %205 : vector<64x16xbf16> to vector<1x64x16xbf16>
    tpu.vector_store %arg4[%c0_70, %c0_71, %c0_72], %208 {strides = array<i32>} : memref<1x64x16xbf16, #tpu.memory_space<vmem>>, vector<1x64x16xbf16>,
    return
  }
  func.func @transform_0(%arg0: i32, %arg1: i32) -> (i32, i32, i32) {
    %c0_i32 = arith.constant 0 : i32
    %c0_i32_0 = arith.constant 0 : i32
    return %arg0, %arg1, %c0_i32 : i32, i32, i32
  }
  func.func @transform_1(%arg0: i32, %arg1: i32) -> (i32, i32, i32) {
    %c0_i32 = arith.constant 0 : i32
    %c0_i32_0 = arith.constant 0 : i32
    %c0_i32_1 = arith.constant 0 : i32
    return %arg0, %c0_i32, %c0_i32_0 : i32, i32, i32
  }
  func.func @transform_2(%arg0: i32, %arg1: i32) -> (i32, i32, i32) {
    %c0_i32 = arith.constant 0 : i32
    %c0_i32_0 = arith.constant 0 : i32
    return %arg0, %arg1, %c0_i32 : i32, i32, i32
  }
}

</mosaic_0001>

<bundles_post_ra>
// kernel: tpu_custom_call.1
= control target key start
LH: loop header
LB: loop body
LE: loop exit
PB: predicated region body
PF: predicated region fallthrough
CT: control target
= control target key end

     0   :  { %s3730_s9 = smov 0   ;;  %s3732_s10 = smov 0   ;;  %s5689_s0 = inlined_call_operand.vmem [shape: f32[2,64,2], index: 0, kind: input, shape index: {}]   ;;  %s5690_s1 = inlined_call_operand.vmem [shape: f32[2,2,64], index: 1, kind: input, shape index: {}]   ;;  %s5691_s2 = inlined_call_operand.vmem [shape: bf16[2,64,16], index: 2, kind: output, shape index: {}]  }
   0x1   :  { %s3734_s11 = smov 0  }
   0x2 LB: > { %s24_s12 = sadd.s32 1, %s3687_s10  ;;  %p2845_p0 = scmp.ge.s32.totalorder %s3691_s11, 1  ;;  %s3691_s11 = sphi %s3734_s11, %s12_s11   ;;  %s3687_s10 = sphi %s3732_s10, %s5976_s10   ;;  %s3683_s9 = sphi %s3730_s9, %s5975_s9  }
   0x3   : > { %p26_p1 = scmp.ge.s32.totalorder %s24_s12, 2  ;;  %p142_p2 = scmp.lt.s32.totalorder %s3691_s11, 3 }
   0x5   : > { %s5978_s12 = smov (%p26_p1, %s24_s12), 0  ;;  %p143_p3 = pnand %p2845_p0, %p142_p2 }
   0x7   : > { %146 = sbr.rel (%p143_p3) target bundleno = 1568 (0x620), region = 28 }
   0xc   : > { %p177_p4 = scmp.lt.s32.totalorder %s3683_s9, 1  ;;  %v3693_v0 = vmov 0   ;;  %v249_v1 = vlaneseq  ;;  %v3694_v12 = vmov 1.0   ;;  %v3695_v19 = vmov 1   ;;  %s3697_s21 = smov 63  }
   0xd   : > { %3010 = vset.pattern.permute.xlu1 %v3693_v0  ;;  %3009 = vset.pattern.permute.xlu0 %v3693_v0  ;;  %vm388_vm8 = vcmask 523264   ;;  %v5704_v60 = vmov 0.0   ;;  %s3698_s22 = smov 62   ;;  %s3699_s23 = smov 65  }
   0xe   : > { %s5980_s9 = smov (!%p177_p4, %s3683_s9), 1  ;;  %v3760_v6 = vshrl.u32 %v249_v1, 7  ;;  %v3763_v8 = vand.u32 127, %v249_v1  ;;  %s3700_s24 = smov 66  }
   0xf   : > { %s2893_s13 = sshll.u32 %s5980_s9, 6  ;;  %s2848_s17 = sshll.u32 %s5980_s9, 1 }
  0x10   : > { %s3754_s16 = scalar_lea.vmem %s5689_s0, %s2893_s13  ;;  %v361_v7 = vadd.s32 56, %v3760_v6  ;;  %v360_v11 = vadd.s32 48, %v3760_v6  ;;  %v359_v13 = vadd.s32 40, %v3760_v6  ;;  %v358_v16 = vadd.s32 32, %v3760_v6  ;;  %s189_s20 = scalar_lea.vmem %s5690_s1, %s2848_s17 }
  0x11   : > { %v202_v2 = vld [vmem:[%s3754_s16 + $0x10] sm:$0xff]  ;;  %v200_v3 = vld [vmem:[%s3754_s16] sm:$0xff]  ;;  %v203_v4 = vld [vmem:[%s3754_s16 + $0x18] sm:$0xff]  ;;  %v357_v17 = vadd.s32 24, %v3760_v6  ;;  %v356_v18 = vadd.s32 16, %v3760_v6  ;;  %v355_v20 = vadd.s32 8, %v3760_v6  ;;  %vm364_vm7 = vcmp.le.s32.totalorder %v3760_v6, %v3763_v8 }
  0x12   : > { %221 = vperm.xlu1 %3010, %v202_v2   ;;  %211 = vperm.xlu0 %3009, %v200_v3   ;;  %v201_v5 = vld [vmem:[%s3754_s16 + $0x8] sm:$0xff]  ;;  %v204_v10 = vld [vmem:[%s3754_s16 + $0x20] sm:$0xff]  ;;  %vm371_vm0 = vcmp.le.s32.totalorder %v361_v7, %v3763_v8  ;;  %vm370_vm1 = vcmp.le.s32.totalorder %v360_v11, %v3763_v8  ;;  %v207_v14 = vld [vmem:[%s3754_s16 + $0x38] sm:$0xff]  ;;  %vm369_vm2 = vcmp.le.s32.totalorder %v359_v13, %v3763_v8  ;;  %v251_v25 = vsub.s32 0, %v3760_v6  ;;  %s3701_s25 = smov 67   ;;  %s3702_s26 = smov 68  }
  0x13   : > { %v205_v9 = vld [vmem:[%s3754_s16 + $0x28] sm:$0xff]  ;;  %2919 = vmatprep.subr.msk.mxu0 %vm371_vm0, %v3694_v12  ;;  %2947 = vmatprep.subr.msk.mxu1 %vm371_vm0, %v3694_v12  ;;  %v206_v15 = vld [vmem:[%s3754_s16 + $0x30] sm:$0xff]  ;;  %vm368_vm3 = vcmp.le.s32.totalorder %v358_v16, %v3763_v8  ;;  %vm367_vm4 = vcmp.le.s32.totalorder %v357_v17, %v3763_v8  ;;  %vm366_vm5 = vcmp.le.s32.totalorder %v356_v18, %v3763_v8  ;;  %v208_v28 = vld [vmem:[%s189_s20] sm:$0x3]  ;;  %v303_v29 = vsub.s32 1, %v3760_v6  ;;  %s3703_s27 = smov 69  }
  0x14   : > { %2920 = vmatpush3.msk.msra.mxu0 %vm371_vm0, %v3694_v12  ;;  %2955 = vmatpush3.msk.msra.mxu1 %vm371_vm0, %v3694_v12  ;;  %vm365_vm6 = vcmp.le.s32.totalorder %v355_v20, %v3763_v8  ;;  %v3790_v30 = vrot.slane %v208_v28, %v251_v25  ;;  %s3704_s28 = smov 70   ;;  %s3705_s29 = smov 71  }
  0x15   : > { %2921 = vmatprep.subr.msk.mxu0 %vm370_vm1, %v3694_v12  ;;  %2948 = vmatprep.subr.msk.mxu1 %vm370_vm1, %v3694_v12  ;;  %v3792_v33 = vrot.slane %v208_v28, %v303_v29  ;;  %s3706_s30 = smov 72   ;;  %s3707_s3 = smov 73  }
  0x16   : > { %226 = vperm.xlu1 %3010, %v203_v4   ;;  %216 = vperm.xlu0 %3009, %v201_v5   ;;  %s3708_s4 = smov 74   ;;  %s3709_s5 = smov 75  }
  0x17   : > { %2922 = vmatpush3.msk.msra.mxu0 %vm370_vm1, %v3694_v12  ;;  %2956 = vmatpush3.msk.msra.mxu1 %vm370_vm1, %v3694_v12  ;;  %s3710_s6 = smov 76   ;;  %s3711_s7 = smov 77  }
  0x18   : > { %2923 = vmatprep.subr.msk.mxu0 %vm369_vm2, %v3694_v12  ;;  %2949 = vmatprep.subr.msk.mxu1 %vm369_vm2, %v3694_v12  ;;  %s3712_s8 = smov 78   ;;  %s3713_s13 = smov 79  }
  0x19   : > { %2924 = vmatpush3.msk.msra.mxu0 %vm369_vm2, %v3694_v12  ;;  %2957 = vmatpush3.msk.msra.mxu1 %vm369_vm2, %v3694_v12  ;;  %s3714_s14 = smov 80   ;;  %s2894_s15 = sshll.u32 %s5980_s9, 5 }
  0x1a   : > { %236 = vperm.xlu1 %3010, %v205_v9   ;;  %231 = vperm.xlu0 %3009, %v204_v10   ;;  %s5646_s9 = scalar_lea.vmem %s5691_s2, %s2894_s15 }
  0x1b   : > { %2925 = vmatprep.subr.msk.mxu0 %vm368_vm3, %v3694_v12  ;;  %2950 = vmatprep.subr.msk.mxu1 %vm368_vm3, %v3694_v12 }
  0x1c   : > { %2926 = vmatpush3.msk.msra.mxu0 %vm368_vm3, %v3694_v12  ;;  %2958 = vmatpush3.msk.msra.mxu1 %vm368_vm3, %v3694_v12 }
  0x1d   : > { %2927 = vmatprep.subr.msk.mxu0 %vm367_vm4, %v3694_v12  ;;  %2951 = vmatprep.subr.msk.mxu1 %vm367_vm4, %v3694_v12 }
  0x1e   : > { %246 = vperm.xlu1 %3010, %v207_v14   ;;  %241 = vperm.xlu0 %3009, %v206_v15  }
  0x1f   : > { %2928 = vmatpush3.msk.msra.mxu0 %vm367_vm4, %v3694_v12  ;;  %2959 = vmatpush3.msk.msra.mxu1 %vm367_vm4, %v3694_v12 }
  0x20   : > { %2929 = vmatprep.subr.msk.mxu0 %vm366_vm5, %v3694_v12  ;;  %2952 = vmatprep.subr.msk.mxu1 %vm366_vm5, %v3694_v12 }
  0x21   : > { %2930 = vmatpush3.msk.msra.mxu0 %vm366_vm5, %v3694_v12  ;;  %2960 = vmatpush3.msk.msra.mxu1 %vm366_vm5, %v3694_v12 }
  0x22   : > { %3012 = vset.pattern.permute.xlu1 %v3695_v19  ;;  %3011 = vset.pattern.permute.xlu0 %v3695_v19 }
  0x23   : > { %274 = vperm.xlu1 %3012, %v201_v5   ;;  %270 = vperm.xlu0 %3011, %v200_v3  }
  0x24   : > { %2931 = vmatprep.subr.msk.mxu0 %vm365_vm6, %v3694_v12  ;;  %2953 = vmatprep.subr.msk.mxu1 %vm365_vm6, %v3694_v12 }
  0x25   : > { %2932 = vmatpush3.msk.msra.mxu0 %vm365_vm6, %v3694_v12  ;;  %2961 = vmatpush3.msk.msra.mxu1 %vm365_vm6, %v3694_v12 }
  0x26   : > { %2933 = vmatprep.subr.msk.mxu0 %vm364_vm7, %v3694_v12  ;;  %2954 = vmatprep.subr.msk.mxu1 %vm364_vm7, %v3694_v12 }
  0x27   : > { %278 = vperm.xlu1 %3012, %v202_v2   ;;  %282 = vperm.xlu0 %3011, %v203_v4  }
  0x28   : > { %2934 = vmatpush3.msk.msra.mxu0 %vm364_vm7, %v3694_v12  ;;  %2962 = vmatpush3.msk.msra.mxu1 %vm364_vm7, %v3694_v12 }
  0x2b   : > { %286 = vperm.xlu1 %3012, %v204_v10   ;;  %290 = vperm.xlu0 %3011, %v205_v9  }
  0x2f   : > { %294 = vperm.xlu1 %3012, %v206_v15   ;;  %298 = vperm.xlu0 %3011, %v207_v14  }
  0x8d   : > { %v222_v21 = vpop.permute.xlu1 %221  ;;  %v212_v22 = vpop.permute.xlu0 %211 }
  0x8e   : > { %v253_v34 = vsub.f32 %v212_v22, %v3790_v30  ;;  %v255_v40 = vsub.f32 %v222_v21, %v3790_v30 }
  0x90   : > { %v261_v42 = vmul.f32 %v253_v34, %v253_v34  ;;  %v263_v52 = vmul.f32 %v255_v40, %v255_v40 }
  0x91   : > { %v227_v23 = vpop.permute.xlu1 %226  ;;  %v217_v24 = vpop.permute.xlu0 %216 }
  0x92   : > { %v254_v35 = vsub.f32 %v217_v24, %v3790_v30  ;;  %v256_v41 = vsub.f32 %v227_v23, %v3790_v30 }
  0x94   : > { %v262_v43 = vmul.f32 %v254_v35, %v254_v35  ;;  %v264_v53 = vmul.f32 %v256_v41, %v256_v41 }
  0x95   : > { %v237_v26 = vpop.permute.xlu1 %236  ;;  %v232_v27 = vpop.permute.xlu0 %231 }
  0x96   : > { %v258_v54 = vsub.f32 %v237_v26, %v3790_v30  ;;  %v257_v55 = vsub.f32 %v232_v27, %v3790_v30 }
  0x98   : > { %v266_v3 = vmul.f32 %v258_v54, %v258_v54  ;;  %v265_v4 = vmul.f32 %v257_v55, %v257_v55 }
  0x99   : > { %v247_v31 = vpop.permute.xlu1 %246  ;;  %v242_v32 = vpop.permute.xlu0 %241 }
  0x9a   : > { %v260_v5 = vsub.f32 %v247_v31, %v3790_v30  ;;  %v259_v6 = vsub.f32 %v242_v32, %v3790_v30 }
  0x9c   : > { %v268_v17 = vmul.f32 %v260_v5, %v260_v5  ;;  %v267_v18 = vmul.f32 %v259_v6, %v259_v6 }
  0x9e   : > { %v275_v36 = vpop.permute.xlu1 %274  ;;  %v271_v37 = vpop.permute.xlu0 %270 }
  0x9f   : > { %v306_v38 = vsub.f32 %v275_v36, %v3792_v33  ;;  %v305_v39 = vsub.f32 %v271_v37, %v3792_v33 }
  0xa1   : > { %v314_v44 = vmul.f32 %v306_v38, %v306_v38  ;;  %v313_v45 = vmul.f32 %v305_v39, %v305_v39 }
  0xa2   : > { %v279_v46 = vpop.permute.xlu1 %278  ;;  %v283_v47 = vpop.permute.xlu0 %282 }
  0xa3   : > { %v3800_v48 = vadd.f32 %v314_v44, %v262_v43  ;;  %v3802_v49 = vadd.f32 %v313_v45, %v261_v42  ;;  %v307_v50 = vsub.f32 %v279_v46, %v3792_v33  ;;  %v308_v51 = vsub.f32 %v283_v47, %v3792_v33 }
  0xa5   : > { %vm330_vm9 = vcmp.lt.f32.partialorder %v3800_v48, 0.390625  ;;  %vm5700_vm10 = vcmp.lt.f32.partialorder %v3802_v49, 0.390625  ;;  %v315_v56 = vmul.f32 %v307_v50, %v307_v50  ;;  %v316_v57 = vmul.f32 %v308_v51, %v308_v51 }
  0xa6   : > { %v287_v58 = vpop.permute.xlu1 %286  ;;  %v291_v59 = vpop.permute.xlu0 %290  ;;  %v2851_v61 = vsel %vm5700_vm10, 1.0, %v5704_v60  ;;  %v2852_v62 = vsel %vm330_vm9, 1.0, %v5704_v60 }
  0xa7   : > { %v3816_v63 = vadd.f32 %v315_v56, %v263_v52  ;;  %v3818_v0 = vadd.f32 %v316_v57, %v264_v53  ;;  %v309_v1 = vsub.f32 %v287_v58, %v3792_v33  ;;  %v310_v2 = vsub.f32 %v291_v59, %v3792_v33  ;;  %2935 = vmatprep.mubr.msk.f32.mxu0 %vm388_vm8, %v2851_v61 }
  0xa8   : > { %2936 = vmatmul.mubr.msk.f32.vlgmr.msra.gmra.mxu0 %vm388_vm8, %v2852_v62 }
  0xa9   : > { %vm331_vm11 = vcmp.lt.f32.partialorder %v3816_v63, 0.390625  ;;  %vm5701_vm12 = vcmp.lt.f32.partialorder %v3818_v0, 0.390625  ;;  %v317_v7 = vmul.f32 %v309_v1, %v309_v1  ;;  %v318_v8 = vmul.f32 %v310_v2, %v310_v2 }
  0xaa   : > { %v295_v9 = vpop.permute.xlu1 %294  ;;  %v299_v10 = vpop.permute.xlu0 %298  ;;  %v2853_v11 = vsel %vm331_vm11, 1.0, %v5704_v60  ;;  %v2854_v12 = vsel %vm5701_vm12, 1.0, %v5704_v60 }
  0xab   : > { %v3834_v13 = vadd.f32 %v317_v7, %v265_v4  ;;  %v3836_v14 = vadd.f32 %v318_v8, %v266_v3  ;;  %v311_v15 = vsub.f32 %v295_v9, %v3792_v33  ;;  %v312_v16 = vsub.f32 %v299_v10, %v3792_v33  ;;  %2938 = vmatprep.mubr.msk.f32.mxu0 %vm388_vm8, %v2853_v11 }
  0xac   : > { %2939 = vmatmul.mubr.msk.f32.gmra.mxu0 %vm388_vm8, %v2854_v12 }
  0xad   : > { %vm333_vm13 = vcmp.lt.f32.partialorder %v3834_v13, 0.390625  ;;  %vm334_vm14 = vcmp.lt.f32.partialorder %v3836_v14, 0.390625  ;;  %v319_v19 = vmul.f32 %v311_v15, %v311_v15  ;;  %v320_v20 = vmul.f32 %v312_v16, %v312_v16 }
  0xae   : > { %v2855_v21 = vsel %vm333_vm13, 1.0, %v5704_v60  ;;  %v2856_v22 = vsel %vm334_vm14, 1.0, %v5704_v60 }
  0xaf   : > { %v3850_v23 = vadd.f32 %v319_v19, %v267_v18  ;;  %v3852_v24 = vadd.f32 %v320_v20, %v268_v17  ;;  %2941 = vmatprep.mubr.msk.f32.mxu1 %vm388_vm8, %v2855_v21 }
  0xb0   : > { %2942 = vmatmul.mubr.msk.f32.vlgmr.msra.gmra.mxu1 %vm388_vm8, %v2856_v22 }
  0xb1   : > { %vm5770_vm15 = vcmp.lt.f32.partialorder %v3850_v23, 0.390625  ;;  %vm5769_vm0 = vcmp.lt.f32.partialorder %v3852_v24, 0.390625 }
  0xb2   : > { %v2857_v25 = vsel %vm5770_vm15, 1.0, %v5704_v60  ;;  %v2858_v26 = vsel %vm5769_vm0, 1.0, %v5704_v60 }
  0xb3   : > { %2944 = vmatprep.mubr.msk.f32.mxu1 %vm388_vm8, %v2857_v25 }
  0xb4   : > { %2945 = vmatmul.mubr.msk.f32.gmra.mxu1 %vm388_vm8, %v2858_v26 }
 0x168   : > { %v3866_v27 = vpop.f32.mrf.mxu0 }
 0x169   : > { %vm519_vm1 = vcmp.eq.f32.partialorder %v3866_v27, 1.0  ;;  %vm711_vm2 = vcmp.eq.f32.partialorder %v3866_v27, 2.0  ;;  %vm903_vm3 = vcmp.eq.f32.partialorder %v3866_v27, 3.0  ;;  %vm1095_vm7 = vcmp.eq.f32.partialorder %v3866_v27, 4.0 }
 0x16a   : > { %vm527_vm4 = vmand %vm330_vm9, %vm519_vm1  ;;  %v3908_v43 = vpop.f32.mrf.mxu0 }
 0x16b   : > { %v535_v28 = vsel %vm527_vm4, 1.0, %v5704_v60  ;;  %vm719_vm5 = vmand %vm330_vm9, %vm711_vm2  ;;  %vm1287_vm4 = vcmp.eq.f32.partialorder %v3866_v27, 5.0 }
 0x16c   : > { %v543_v29 = vmul.f32 %v535_v28, %v3790_v30  ;;  %v727_v31 = vsel %vm719_vm5, 1.0, %v5704_v60  ;;  %vm911_vm6 = vmand %vm330_vm9, %vm903_vm3  ;;  %v575_v47 = vmul.f32 %v535_v28, %v3792_v33 }
 0x16d   : > { %v735_v34 = vmul.f32 %v727_v31, %v3790_v30  ;;  %v3884_v35 = vsel %vm911_vm6, 1.0, %v5704_v60  ;;  %vm1103_vm1 = vmand %vm330_vm9, %vm1095_vm7  ;;  %v767_v3 = vmul.f32 %v727_v31, %v3792_v33 }
 0x16e   : > { %v553_v32 = vsel %vm388_vm8, %v543_v29, 0.0  ;;  %v927_v39 = vmul.f32 %v3884_v35, %v3790_v30  ;;  %v3901_v41 = vsel %vm1103_vm1, 1.0, %v5704_v60  ;;  %vm1295_vm5 = vmand %vm330_vm9, %vm1287_vm4  ;;  %vm518_vm4 = vcmp.eq.f32.partialorder %v3908_v43, 1.0 }
 0x16f   : > { %554 = vadd.xlane.f32.xlu0 %v553_v32  ;;  %v745_v38 = vsel %vm388_vm8, %v735_v34, 0.0  ;;  %v1119_v46 = vmul.f32 %v3901_v41, %v3790_v30  ;;  %v3916_v50 = vsel %vm1295_vm5, 1.0, %v5704_v60  ;;  %v585_v52 = vsel %vm388_vm8, %v575_v47, 0.0 }
 0x170   : > { %v3886_v36 = vpop.f32.mrf.mxu1  ;;  %v937_v44 = vsel %vm388_vm8, %v927_v39, 0.0  ;;  %v1311_v53 = vmul.f32 %v3916_v50, %v3790_v30  ;;  %v777_v5 = vsel %vm388_vm8, %v767_v3, 0.0  ;;  %v959_v20 = vmul.f32 %v3884_v35, %v3792_v33  ;;  %v4029_v3 = vpop.f32.mrf.mxu0 }
 0x171   : > { %vm523_vm2 = vcmp.eq.f32.partialorder %v3886_v36, 1.0  ;;  %vm715_vm6 = vcmp.eq.f32.partialorder %v3886_v36, 2.0  ;;  %v1129_v51 = vsel %vm388_vm8, %v1119_v46, 0.0  ;;  %vm907_vm5 = vcmp.eq.f32.partialorder %v3886_v36, 3.0 }
 0x172   : > { %v3892_v37 = vpop.f32.mrf.mxu1  ;;  %vm531_vm3 = vmand %vm334_vm14, %vm523_vm2  ;;  %v1321_v57 = vsel %vm388_vm8, %v1311_v53, 0.0  ;;  %v969_v22 = vsel %vm388_vm8, %v959_v20, 0.0 }
 0x173   : > { %746 = vadd.xlane.f32.xlu0 %v745_v38  ;;  %v539_v40 = vsel %vm531_vm3, 1.0, %v5704_v60  ;;  %vm522_vm7 = vcmp.eq.f32.partialorder %v3892_v37, 1.0  ;;  %vm723_vm1 = vmand %vm334_vm14, %vm715_vm6  ;;  %vm714_vm6 = vcmp.eq.f32.partialorder %v3892_v37, 2.0 }
 0x174   : > { %v547_v42 = vmul.f32 %v539_v40, %v3790_v30  ;;  %vm530_vm2 = vmand %vm333_vm13, %vm522_vm7  ;;  %v579_v54 = vmul.f32 %v539_v40, %v3792_v33  ;;  %v731_v55 = vsel %vm723_vm1, 1.0, %v5704_v60 }
 0x175   : > { %v538_v56 = vsel %vm530_vm2, 1.0, %v5704_v60  ;;  %vm526_vm3 = vmand %vm5700_vm10, %vm518_vm4  ;;  %v739_v59 = vmul.f32 %v731_v55, %v3790_v30  ;;  %vm710_vm2 = vcmp.eq.f32.partialorder %v3908_v43, 2.0  ;;  %v771_v7 = vmul.f32 %v731_v55, %v3792_v33 }
 0x176   : > { %v565_v45 = vsel %vm388_vm8, %v547_v42, 0.0  ;;  %v597_v58 = vsel %vm388_vm8, %v579_v54, 0.0  ;;  %v546_v61 = vmul.f32 %v538_v56, %v3790_v30  ;;  %v3937_v62 = vsel %vm526_vm3, 1.0, %v5704_v60  ;;  %vm915_vm7 = vmand %vm334_vm14, %vm907_vm5 }
 0x177   : > { %938 = vadd.xlane.f32.xlu0 %v937_v44  ;;  %566 = vadd.xlane.f32.xlu1 %v565_v45  ;;  %v757_v1 = vsel %vm388_vm8, %v739_v59, 0.0  ;;  %v574_v4 = vmul.f32 %v3937_v62, %v3792_v33  ;;  %vm722_vm1 = vmand %vm333_vm13, %vm714_vm6  ;;  %v578_v8 = vmul.f32 %v538_v56, %v3792_v33  ;;  %v923_v9 = vsel %vm915_vm7, 1.0, %v5704_v60 }
 0x178   : > { %v562_v2 = vsel %vm388_vm8, %v546_v61, 0.0  ;;  %v730_v10 = vsel %vm722_vm1, 1.0, %v5704_v60  ;;  %vm718_vm4 = vmand %vm5700_vm10, %vm710_vm2  ;;  %v789_v11 = vsel %vm388_vm8, %v771_v7, 0.0  ;;  %v931_v15 = vmul.f32 %v923_v9, %v3790_v30 }
 0x179   : > { %v582_v6 = vsel %vm388_vm8, %v574_v4, 0.0  ;;  %v594_v12 = vsel %vm388_vm8, %v578_v8, 0.0  ;;  %v738_v16 = vmul.f32 %v730_v10, %v3790_v30  ;;  %v3964_v17 = vsel %vm718_vm4, 1.0, %v5704_v60  ;;  %v4039_v8 = vpop.f32.mrf.mxu0 }
 0x17a   : > { %vm1099_vm3 = vcmp.eq.f32.partialorder %v3886_v36, 4.0  ;;  %vm906_vm5 = vcmp.eq.f32.partialorder %v3892_v37, 3.0  ;;  %v949_v18 = vsel %vm388_vm8, %v931_v15, 0.0  ;;  %v766_v21 = vmul.f32 %v3964_v17, %v3792_v33 }
 0x17b   : > { %1130 = vadd.xlane.f32.xlu0 %v1129_v51  ;;  %586 = vadd.xlane.f32.xlu1 %v585_v52  ;;  %v754_v19 = vsel %vm388_vm8, %v738_v16, 0.0  ;;  %vm1107_vm6 = vmand %vm334_vm14, %vm1099_vm3  ;;  %vm902_vm1 = vcmp.eq.f32.partialorder %v3908_v43, 3.0  ;;  %v963_v26 = vmul.f32 %v923_v9, %v3792_v33  ;;  %v770_v28 = vmul.f32 %v730_v10, %v3792_v33  ;;  %v4041_v9 = vpop.f32.mrf.mxu1 }
 0x17c   : > { %vm914_vm7 = vmand %vm333_vm13, %vm906_vm5  ;;  %v774_v25 = vsel %vm388_vm8, %v766_v21, 0.0  ;;  %v1115_v29 = vsel %vm1107_vm6, 1.0, %v5704_v60  ;;  %vm1291_vm4 = vcmp.eq.f32.partialorder %v3886_v36, 5.0  ;;  %vm1098_vm3 = vcmp.eq.f32.partialorder %v3892_v37, 4.0 }
 0x17d   : > { %v922_v31 = vsel %vm914_vm7, 1.0, %v5704_v60  ;;  %vm910_vm2 = vmand %vm5700_vm10, %vm902_vm1  ;;  %v981_v32 = vsel %vm388_vm8, %v963_v26, 0.0  ;;  %v786_v34 = vsel %vm388_vm8, %v770_v28, 0.0  ;;  %v1123_v35 = vmul.f32 %v1115_v29, %v3790_v30  ;;  %v4050_v16 = vpop.f32.mrf.mxu1 }
 0x17e   : > { %v930_v38 = vmul.f32 %v922_v31, %v3790_v30  ;;  %v918_v39 = vsel %vm910_vm2, 1.0, %v5704_v60  ;;  %v1151_v44 = vmul.f32 %v3901_v41, %v3792_v33  ;;  %vm1299_vm5 = vmand %vm334_vm14, %vm1291_vm4  ;;  %vm1094_vm7 = vcmp.eq.f32.partialorder %v3908_v43, 4.0 }
 0x17f   : > { %1322 = vadd.xlane.f32.xlu0 %v1321_v57  ;;  %598 = vadd.xlane.f32.xlu1 %v597_v58  ;;  %v1141_v40 = vsel %vm388_vm8, %v1123_v35, 0.0  ;;  %v958_v45 = vmul.f32 %v918_v39, %v3792_v33  ;;  %vm1106_vm6 = vmand %vm333_vm13, %vm1098_vm3  ;;  %v1155_v51 = vmul.f32 %v1115_v29, %v3792_v33  ;;  %v962_v41 = vmul.f32 %v922_v31, %v3792_v33 }
 0x180   : > { %v946_v42 = vsel %vm388_vm8, %v930_v38, 0.0  ;;  %v1161_v46 = vsel %vm388_vm8, %v1151_v44, 0.0  ;;  %v4009_v52 = vsel %vm1299_vm5, 1.0, %v5704_v60  ;;  %v1114_v53 = vsel %vm1106_vm6, 1.0, %v5704_v60  ;;  %vm1102_vm1 = vmand %vm5700_vm10, %vm1094_vm7 }
 0x181   : > { %v966_v47 = vsel %vm388_vm8, %v958_v45, 0.0  ;;  %v1173_v54 = vsel %vm388_vm8, %v1155_v51, 0.0  ;;  %v978_v55 = vsel %vm388_vm8, %v962_v41, 0.0  ;;  %v1315_v56 = vmul.f32 %v4009_v52, %v3790_v30 }
 0x182   : > { %v1122_v57 = vmul.f32 %v1114_v53, %v3790_v30  ;;  %v1110_v58 = vsel %vm1102_vm1, 1.0, %v5704_v60  ;;  %vm1290_vm2 = vcmp.eq.f32.partialorder %v3892_v37, 5.0  ;;  %vm1286_vm3 = vcmp.eq.f32.partialorder %v3908_v43, 5.0 }
 0x183   : > { %758 = vadd.xlane.f32.xlu1 %v757_v1  ;;  %563 = vadd.xlane.f32.xlu0 %v562_v2  ;;  %v1333_v59 = vsel %vm388_vm8, %v1315_v56, 0.0  ;;  %v1343_v1 = vmul.f32 %v3916_v50, %v3792_v33  ;;  %v1150_v2 = vmul.f32 %v1110_v58, %v3792_v33  ;;  %vm1298_vm4 = vmand %vm333_vm13, %vm1290_vm2  ;;  %v1154_v50 = vmul.f32 %v1114_v53, %v3792_v33 }
 0x184   : > { %v1138_v61 = vsel %vm388_vm8, %v1122_v57, 0.0  ;;  %v1306_v7 = vsel %vm1298_vm4, 1.0, %v5704_v60  ;;  %vm1294_vm5 = vmand %vm5700_vm10, %vm1286_vm3  ;;  %vm520_vm6 = vcmp.eq.f32.partialorder %v4039_v8, 1.0  ;;  %v926_v20 = vmul.f32 %v918_v39, %v3790_v30 }
 0x185   : > { %v1353_v4 = vsel %vm388_vm8, %v1343_v1, 0.0  ;;  %v1302_v15 = vsel %vm1294_vm5, 1.0, %v5704_v60  ;;  %vm528_vm7 = vmand %vm331_vm11, %vm520_vm6  ;;  %vm521_vm1 = vcmp.eq.f32.partialorder %v4029_v3, 1.0  ;;  %vm524_vm2 = vcmp.eq.f32.partialorder %v4050_v16, 1.0 }
 0x186   : > { %v1342_v21 = vmul.f32 %v1302_v15, %v3792_v33  ;;  %v1346_v26 = vmul.f32 %v1306_v7, %v3792_v33  ;;  %v536_v28 = vsel %vm528_vm7, 1.0, %v5704_v60  ;;  %vm529_vm4 = vmand %vm5701_vm12, %vm521_vm1  ;;  %vm525_vm5 = vcmp.eq.f32.partialorder %v4041_v9, 1.0 }
 0x187   : > { %778 = vadd.xlane.f32.xlu1 %v777_v5  ;;  %583 = vadd.xlane.f32.xlu0 %v582_v6  ;;  %v1158_v5 = vsel %vm388_vm8, %v1150_v2, 0.0  ;;  %v542_v6 = vmul.f32 %v3937_v62, %v3790_v30  ;;  %v734_v62 = vmul.f32 %v3964_v17, %v3790_v30  ;;  %v934_v17 = vsel %vm388_vm8, %v926_v20, 0.0  ;;  %vm532_vm3 = vmand %vm5770_vm15, %vm524_vm2 }
 0x188   : > { %v1362_v31 = vsel %vm388_vm8, %v1346_v26, 0.0  ;;  %v537_v35 = vsel %vm529_vm4, 1.0, %v5704_v60  ;;  %v540_v38 = vsel %vm532_vm3, 1.0, %v5704_v60  ;;  %vm533_vm6 = vmand %vm5769_vm0, %vm525_vm5  ;;  %vm712_vm7 = vcmp.eq.f32.partialorder %v4039_v8, 2.0 }
 0x189   : > { %v550_v10 = vsel %vm388_vm8, %v542_v6, 0.0  ;;  %v548_v44 = vmul.f32 %v540_v38, %v3790_v30  ;;  %v541_v45 = vsel %vm533_vm6, 1.0, %v5704_v60  ;;  %v576_v41 = vmul.f32 %v536_v28, %v3792_v33  ;;  %vm720_vm1 = vmand %vm331_vm11, %vm712_vm7 }
 0x18a   : > { %v549_v51 = vmul.f32 %v541_v45, %v3790_v30  ;;  %vm713_vm2 = vcmp.eq.f32.partialorder %v4029_v3, 2.0  ;;  %vm716_vm4 = vcmp.eq.f32.partialorder %v4050_v16, 2.0  ;;  %v580_v56 = vmul.f32 %v540_v38, %v3792_v33 }
 0x18b   : > { %790 = vadd.xlane.f32.xlu1 %v789_v11  ;;  %595 = vadd.xlane.f32.xlu0 %v594_v12  ;;  %v1170_v11 = vsel %vm388_vm8, %v1154_v50, 0.0  ;;  %v1314_v12 = vmul.f32 %v1306_v7, %v3790_v30  ;;  %v728_v57 = vsel %vm720_vm1, 1.0, %v5704_v60  ;;  %vm721_vm3 = vmand %vm5701_vm12, %vm713_vm2  ;;  %vm717_vm6 = vcmp.eq.f32.partialorder %v4041_v9, 2.0 }
 0x18c   : > { %v571_v53 = vsel %vm388_vm8, %v549_v51, 0.0  ;;  %vm724_vm5 = vmand %vm5770_vm15, %vm716_vm4  ;;  %v736_v1 = vmul.f32 %v728_v57, %v3790_v30  ;;  %v729_v2 = vsel %vm721_vm3, 1.0, %v5704_v60  ;;  %vm904_vm1 = vcmp.eq.f32.partialorder %v4039_v8, 3.0 }
 0x18d   : > { %vm725_vm7 = vmand %vm5769_vm0, %vm717_vm6  ;;  %v737_v50 = vmul.f32 %v729_v2, %v3790_v30  ;;  %vm905_vm4 = vcmp.eq.f32.partialorder %v4029_v3, 3.0  ;;  %vm908_vm3 = vcmp.eq.f32.partialorder %v4050_v16, 3.0  ;;  %v769_v20 = vmul.f32 %v729_v2, %v3792_v33 }
 0x18e   : > { %v748_v6 = vsel %vm388_vm8, %v736_v1, 0.0  ;;  %vm912_vm2 = vmand %vm331_vm11, %vm904_vm1 }
 0x18f   : > { %950 = vadd.xlane.f32.xlu1 %v949_v18  ;;  %755 = vadd.xlane.f32.xlu0 %v754_v19  ;;  %v742_v18 = vsel %vm388_vm8, %v734_v62, 0.0  ;;  %v1330_v19 = vsel %vm388_vm8, %v1314_v12, 0.0  ;;  %vm916_vm6 = vmand %vm5770_vm15, %vm908_vm3  ;;  %vm1097_vm3 = vcmp.eq.f32.partialorder %v4029_v3, 4.0 }
 0x193   : > { %970 = vadd.xlane.f32.xlu1 %v969_v22  ;;  %775 = vadd.xlane.f32.xlu0 %v774_v25  ;;  %v1350_v22 = vsel %vm388_vm8, %v1342_v21, 0.0  ;;  %v1118_v25 = vmul.f32 %v1110_v58, %v3790_v30 }
 0x195   : > { %v1126_v29 = vsel %vm388_vm8, %v1118_v25, 0.0 }
 0x197   : > { %982 = vadd.xlane.f32.xlu1 %v981_v32  ;;  %787 = vadd.xlane.f32.xlu0 %v786_v34  ;;  %v1310_v32 = vmul.f32 %v1302_v15, %v3790_v30  ;;  %v544_v34 = vmul.f32 %v536_v28, %v3790_v30  ;;  %v768_v15 = vmul.f32 %v728_v57, %v3792_v33 }
 0x199   : > { %v1318_v39 = vsel %vm388_vm8, %v1310_v32, 0.0 }
 0x19b   : > { %1142 = vadd.xlane.f32.xlu1 %v1141_v40  ;;  %947 = vadd.xlane.f32.xlu0 %v946_v42  ;;  %v556_v40 = vsel %vm388_vm8, %v544_v34, 0.0  ;;  %v545_v42 = vmul.f32 %v537_v35, %v3790_v30 }
 0x19f   : > { %1162 = vadd.xlane.f32.xlu1 %v1161_v46  ;;  %967 = vadd.xlane.f32.xlu0 %v966_v47  ;;  %v559_v46 = vsel %vm388_vm8, %v545_v42, 0.0  ;;  %v568_v47 = vsel %vm388_vm8, %v548_v44, 0.0 }
 0x1a3   : > { %1174 = vadd.xlane.f32.xlu1 %v1173_v54  ;;  %979 = vadd.xlane.f32.xlu0 %v978_v55  ;;  %v588_v54 = vsel %vm388_vm8, %v576_v41, 0.0  ;;  %v577_v55 = vmul.f32 %v537_v35, %v3792_v33 }
 0x1a5   : > { %v591_v58 = vsel %vm388_vm8, %v577_v55, 0.0 }
 0x1a7   : > { %1334 = vadd.xlane.f32.xlu1 %v1333_v59  ;;  %1139 = vadd.xlane.f32.xlu0 %v1138_v61  ;;  %v600_v59 = vsel %vm388_vm8, %v580_v56, 0.0  ;;  %v581_v61 = vmul.f32 %v541_v45, %v3792_v33 }
 0x1ab   : > { %1354 = vadd.xlane.f32.xlu1 %v1353_v4  ;;  %1159 = vadd.xlane.f32.xlu0 %v1158_v5  ;;  %v732_v4 = vsel %vm724_vm5, 1.0, %v5704_v60  ;;  %v603_v5 = vsel %vm388_vm8, %v581_v61, 0.0  ;;  %vm913_vm5 = vmand %vm5701_vm12, %vm905_vm4 }
 0x1ac   : > { %v740_v7 = vmul.f32 %v732_v4, %v3790_v30  ;;  %v772_v21 = vmul.f32 %v732_v4, %v3792_v33 }
 0x1ae   : > { %v760_v62 = vsel %vm388_vm8, %v740_v7, 0.0  ;;  %v792_v25 = vsel %vm388_vm8, %v772_v21, 0.0 }
 0x1af   : > { %551 = vadd.xlane.f32.xlu1 %v550_v10  ;;  %1171 = vadd.xlane.f32.xlu0 %v1170_v11  ;;  %v733_v10 = vsel %vm725_vm7, 1.0, %v5704_v60  ;;  %v751_v11 = vsel %vm388_vm8, %v737_v50, 0.0  ;;  %vm909_vm7 = vcmp.eq.f32.partialorder %v4041_v9, 3.0 }
 0x1b0   : > { %v741_v12 = vmul.f32 %v733_v10, %v3790_v30  ;;  %v773_v26 = vmul.f32 %v733_v10, %v3792_v33  ;;  %vm917_vm1 = vmand %vm5769_vm0, %vm909_vm7 }
 0x1b2   : > { %v795_v32 = vsel %vm388_vm8, %v773_v26, 0.0 }
 0x1b3   : > { %743 = vadd.xlane.f32.xlu1 %v742_v18  ;;  %1331 = vadd.xlane.f32.xlu0 %v1330_v19  ;;  %v763_v18 = vsel %vm388_vm8, %v741_v12, 0.0  ;;  %v780_v19 = vsel %vm388_vm8, %v768_v15, 0.0 }
 0x1b7   : > { %935 = vadd.xlane.f32.xlu1 %v934_v17  ;;  %1351 = vadd.xlane.f32.xlu0 %v1350_v22  ;;  %v920_v17 = vsel %vm912_vm2, 1.0, %v5704_v60  ;;  %v783_v22 = vsel %vm388_vm8, %v769_v20, 0.0  ;;  %vm1096_vm2 = vcmp.eq.f32.partialorder %v4039_v8, 4.0 }
 0x1b8   : > { %v928_v28 = vmul.f32 %v920_v17, %v3790_v30  ;;  %v960_v45 = vmul.f32 %v920_v17, %v3792_v33  ;;  %vm1104_vm4 = vmand %vm331_vm11, %vm1096_vm2 }
 0x1ba   : > { %v940_v34 = vsel %vm388_vm8, %v928_v28, 0.0 }
 0x1bb   : > { %1127 = vadd.xlane.f32.xlu1 %v1126_v29  ;;  %1363 = vadd.xlane.f32.xlu0 %v1362_v31  ;;  %v921_v29 = vsel %vm913_vm5, 1.0, %v5704_v60  ;;  %v924_v31 = vsel %vm916_vm6, 1.0, %v5704_v60  ;;  %vm1100_vm5 = vcmp.eq.f32.partialorder %v4050_v16, 4.0  ;;  %vm1105_vm6 = vmand %vm5701_vm12, %vm1097_vm3 }
 0x1bc   : > { %v929_v35 = vmul.f32 %v921_v29, %v3790_v30  ;;  %v932_v38 = vmul.f32 %v924_v31, %v3790_v30  ;;  %v961_v51 = vmul.f32 %v921_v29, %v3792_v33  ;;  %v964_v41 = vmul.f32 %v924_v31, %v3792_v33  ;;  %vm1108_vm7 = vmand %vm5770_vm15, %vm1100_vm5 }
 0x1bd   : > { %vm1289_vm5 = vcmp.eq.f32.partialorder %v4029_v3, 5.0 }
 0x1be   : > { %v952_v42 = vsel %vm388_vm8, %v932_v38, 0.0  ;;  %v984_v55 = vsel %vm388_vm8, %v964_v41, 0.0 }
 0x1bf   : > { %1319 = vadd.xlane.f32.xlu1 %v1318_v39  ;;  %557 = vadd.xlane.f32.xlu0 %v556_v40  ;;  %v925_v39 = vsel %vm917_vm1, 1.0, %v5704_v60  ;;  %v943_v40 = vsel %vm388_vm8, %v929_v35, 0.0  ;;  %vm1101_vm1 = vcmp.eq.f32.partialorder %v4041_v9, 4.0 }
 0x1c0   : > { %v933_v44 = vmul.f32 %v925_v39, %v3790_v30  ;;  %v965_v56 = vmul.f32 %v925_v39, %v3792_v33  ;;  %vm1109_vm2 = vmand %vm5769_vm0, %vm1101_vm1 }
 0x1c2   : > { %v987_v61 = vsel %vm388_vm8, %v965_v56, 0.0 }
 0x1c3   : > { %560 = vadd.xlane.f32.xlu1 %v559_v46  ;;  %569 = vadd.xlane.f32.xlu0 %v568_v47  ;;  %v955_v46 = vsel %vm388_vm8, %v933_v44, 0.0  ;;  %v972_v47 = vsel %vm388_vm8, %v960_v45, 0.0 }
 0x1c7   : > { %572 = vadd.xlane.f32.xlu1 %v571_v53  ;;  %589 = vadd.xlane.f32.xlu0 %v588_v54  ;;  %v1112_v53 = vsel %vm1104_vm4, 1.0, %v5704_v60  ;;  %v975_v54 = vsel %vm388_vm8, %v961_v51, 0.0  ;;  %vm1288_vm4 = vcmp.eq.f32.partialorder %v4039_v8, 5.0 }
 0x1c8   : > { %v1120_v57 = vmul.f32 %v1112_v53, %v3790_v30  ;;  %v1152_v10 = vmul.f32 %v1112_v53, %v3792_v33  ;;  %vm1296_vm3 = vmand %vm331_vm11, %vm1288_vm4 }
 0x1ca   : > { %v1132_v1 = vsel %vm388_vm8, %v1120_v57, 0.0 }
 0x1cb   : > { %592 = vadd.xlane.f32.xlu1 %v591_v58  ;;  %601 = vadd.xlane.f32.xlu0 %v600_v59  ;;  %v1113_v58 = vsel %vm1105_vm6, 1.0, %v5704_v60  ;;  %v1116_v59 = vsel %vm1108_vm7, 1.0, %v5704_v60  ;;  %vm1292_vm6 = vcmp.eq.f32.partialorder %v4050_v16, 5.0  ;;  %vm1297_vm7 = vmand %vm5701_vm12, %vm1289_vm5  ;;  %vm5697_vm5 = vcmp.ge.f32.partialorder %v3866_v27, 1.0 }
 0x1cc   : > { %v1121_v2 = vmul.f32 %v1113_v58, %v3790_v30  ;;  %v1124_v4 = vmul.f32 %v1116_v59, %v3790_v30  ;;  %v1153_v12 = vmul.f32 %v1113_v58, %v3792_v33  ;;  %v1156_v15 = vmul.f32 %v1116_v59, %v3792_v33  ;;  %vm1300_vm1 = vmand %vm5770_vm15, %vm1292_vm6 }
 0x1cd   : > { %v1308_v26 = vsel %vm1300_vm1, 1.0, %v5704_v60  ;;  %v1347_v59 = vmul.f32 %v4009_v52, %v3792_v33  ;;  %vm5692_vm6 = vcmp.ge.f32.partialorder %v3892_v37, 1.0  ;;  %vm5696_vm1 = vcmp.ge.f32.partialorder %v3908_v43, 2.0 }
 0x1ce   : > { %v1144_v50 = vsel %vm388_vm8, %v1124_v4, 0.0  ;;  %v1167_v20 = vsel %vm388_vm8, %v1153_v12, 0.0  ;;  %v1176_v21 = vsel %vm388_vm8, %v1156_v15, 0.0  ;;  %v4237_v15 = vld [vmem:[%s3754_s16 + $0x20] sm:$0xff] }
 0x1cf   : > { %604 = vadd.xlane.f32.xlu1 %v603_v5  ;;  %749 = vadd.xlane.f32.xlu0 %v748_v6  ;;  %v1117_v5 = vsel %vm1109_vm2, 1.0, %v5704_v60  ;;  %v1135_v6 = vsel %vm388_vm8, %v1121_v2, 0.0  ;;  %vm1293_vm2 = vcmp.eq.f32.partialorder %v4041_v9, 5.0  ;;  %v1365_v2 = vsel %vm388_vm8, %v1347_v59, 0.0 }
 0x1d0   : > { %v1125_v7 = vmul.f32 %v1117_v5, %v3790_v30  ;;  %v1157_v17 = vmul.f32 %v1117_v5, %v3792_v33  ;;  %vm1301_vm4 = vmand %vm5769_vm0, %vm1293_vm2  ;;  %vm5694_vm2 = vcmp.ge.f32.partialorder %v3866_v27, 2.0 }
 0x1d1   : > { %v1309_v35 = vsel %vm1301_vm4, 1.0, %v5704_v60  ;;  %vm1479_vm4 = vcmp.eq.f32.partialorder %v3866_v27, 6.0 }
 0x1d2   : > { %v1179_v29 = vsel %vm388_vm8, %v1157_v17, 0.0  ;;  %v1317_v44 = vmul.f32 %v1309_v35, %v3790_v30  ;;  %v1349_v4 = vmul.f32 %v1309_v35, %v3792_v33 }
 0x1d3   : > { %752 = vadd.xlane.f32.xlu1 %v751_v11  ;;  %761 = vadd.xlane.f32.xlu0 %v760_v62  ;;  %v1147_v11 = vsel %vm388_vm8, %v1125_v7, 0.0  ;;  %v1164_v62 = vsel %vm388_vm8, %v1152_v10, 0.0 }
 0x1d4   : > { %v1339_v51 = vsel %vm388_vm8, %v1317_v44, 0.0 }
 0x1d7   : > { %764 = vadd.xlane.f32.xlu1 %v763_v18  ;;  %781 = vadd.xlane.f32.xlu0 %v780_v19  ;;  %v1304_v18 = vsel %vm1296_vm3, 1.0, %v5704_v60  ;;  %vm5695_vm3 = vcmp.ge.f32.partialorder %v3908_v43, 1.0 }
 0x1d8   : > { %v1344_v45 = vmul.f32 %v1304_v18, %v3792_v33 }
 0x1da   : > { %v1356_v41 = vsel %vm388_vm8, %v1344_v45, 0.0 }
 0x1db   : > { %784 = vadd.xlane.f32.xlu1 %v783_v22  ;;  %793 = vadd.xlane.f32.xlu0 %v792_v25  ;;  %v1312_v22 = vmul.f32 %v1304_v18, %v3790_v30  ;;  %v1305_v25 = vsel %vm1297_vm7, 1.0, %v5704_v60  ;;  %vm5693_vm7 = vcmp.ge.f32.partialorder %v3886_v36, 1.0 }
 0x1dc   : > { %v1345_v53 = vmul.f32 %v1305_v25, %v3792_v33 }
 0x1dd   : > { %v1324_v31 = vsel %vm388_vm8, %v1312_v22, 0.0 }
 0x1de   : > { %v1359_v57 = vsel %vm388_vm8, %v1345_v53, 0.0 }
 0x1df   : > { %796 = vadd.xlane.f32.xlu1 %v795_v32  ;;  %941 = vadd.xlane.f32.xlu0 %v940_v34  ;;  %v1313_v32 = vmul.f32 %v1305_v25, %v3790_v30  ;;  %v1316_v34 = vmul.f32 %v1308_v26, %v3790_v30 }
 0x1e3   : > { %944 = vadd.xlane.f32.xlu1 %v943_v40  ;;  %953 = vadd.xlane.f32.xlu0 %v952_v42  ;;  %v1327_v40 = vsel %vm388_vm8, %v1313_v32, 0.0  ;;  %v1336_v42 = vsel %vm388_vm8, %v1316_v34, 0.0 }
 0x1e7   : > { %956 = vadd.xlane.f32.xlu1 %v955_v46  ;;  %973 = vadd.xlane.f32.xlu0 %v972_v47 }
 0x1eb   : > { %976 = vadd.xlane.f32.xlu1 %v975_v54  ;;  %985 = vadd.xlane.f32.xlu0 %v984_v55  ;;  %v1348_v54 = vmul.f32 %v1308_v26, %v3792_v33  ;;  %v4247_v26 = vld [vmem:[%s3754_s16] sm:$0xff] }
 0x1ed   : > { %v1368_v58 = vsel %vm388_vm8, %v1348_v54, 0.0 }
 0x1ef   : > { %988 = vadd.xlane.f32.xlu1 %v987_v61  ;;  %1133 = vadd.xlane.f32.xlu0 %v1132_v1 }
 0x1f3   : > { %1136 = vadd.xlane.f32.xlu1 %v1135_v6  ;;  %1145 = vadd.xlane.f32.xlu0 %v1144_v50  ;;  %v1371_v50 = vsel %vm388_vm8, %v1349_v4, 0.0 }
 0x1f7   : > { %1148 = vadd.xlane.f32.xlu1 %v1147_v11  ;;  %1165 = vadd.xlane.f32.xlu0 %v1164_v62 }
 0x1f8   : > { %v4195_v19 = vpop.xlane.xlu0 %554 }
 0x1fb   : > { %1168 = vadd.xlane.f32.xlu1 %v1167_v20  ;;  %1177 = vadd.xlane.f32.xlu0 %v1176_v21  ;;  %v4241_v20 = vld [vmem:[%s3754_s16 + $0x28] sm:$0xff] }
 0x1fc   : > { %v4206_v28 = vpop.xlane.xlu0 %746 }
 0x1ff   : > { %1180 = vadd.xlane.f32.xlu1 %v1179_v29  ;;  %1325 = vadd.xlane.f32.xlu0 %v1324_v31  ;;  %v4251_v31 = vld [vmem:[%s3754_s16 + $0x8] sm:$0xff] }
 0x200   : > { %v567_v38 = vpop.xlane.xlu1 %566  ;;  %v4215_v39 = vpop.xlane.xlu0 %938 }
 0x201   : > { %v619_v21 = vsub.f32 %v4241_v20, %v567_v38 }
 0x203   : > { %1328 = vadd.xlane.f32.xlu1 %v1327_v40  ;;  %1337 = vadd.xlane.f32.xlu0 %v1336_v42 }
 0x204   : > { %v587_v46 = vpop.xlane.xlu1 %586  ;;  %v4221_v47 = vpop.xlane.xlu0 %1130 }
 0x205   : > { %v663_v32 = vsub.f32 %v4251_v31, %v587_v46 }
 0x207   : > { %1340 = vadd.xlane.f32.xlu1 %v1339_v51  ;;  %1357 = vadd.xlane.f32.xlu0 %v1356_v41 }
 0x208   : > { %v599_v55 = vpop.xlane.xlu1 %598  ;;  %v4227_v56 = vpop.xlane.xlu0 %1322 }
 0x209   : > { %v667_v42 = vsub.f32 %v4241_v20, %v599_v55 }
 0x20b   : > { %1360 = vadd.xlane.f32.xlu1 %v1359_v57  ;;  %1369 = vadd.xlane.f32.xlu0 %v1368_v58 }
 0x20c   : > { %v759_v61 = vpop.xlane.xlu1 %758  ;;  %v564_v1 = vpop.xlane.xlu0 %563 }
 0x20d   : > { %v618_v18 = vsub.f32 %v4237_v15, %v564_v1  ;;  %v811_v41 = vsub.f32 %v4241_v20, %v759_v61 }
 0x20f   : > { %1366 = vadd.xlane.f32.xlu1 %v1365_v2  ;;  %v3018_v25 = vpack.i.bf16 %v619_v21, %v618_v18  ;;  %v615_v21 = vsub.f32 %v4251_v31, %v4195_v19 }
 0x210   : > { %v779_v5 = vpop.xlane.xlu1 %778  ;;  %v584_v6 = vpop.xlane.xlu0 %583 }
 0x211   : > { %v662_v29 = vsub.f32 %v4247_v26, %v584_v6  ;;  %v855_v55 = vsub.f32 %v4251_v31, %v779_v5 }
 0x213   : > { %1372 = vadd.xlane.f32.xlu1 %v1371_v50  ;;  %v3023_v40 = vpack.i.bf16 %v663_v32, %v662_v29 }
 0x214   : > { %v791_v7 = vpop.xlane.xlu1 %790  ;;  %v596_v52 = vpop.xlane.xlu0 %595 }
 0x215   : > { %v666_v38 = vsub.f32 %v4237_v15, %v596_v52  ;;  %v859_v61 = vsub.f32 %v4241_v20, %v791_v7 }
 0x217   : > { %v3028_v51 = vpack.i.bf16 %v667_v42, %v666_v38 }
 0x218   : > { %v951_v10 = vpop.xlane.xlu1 %950  ;;  %v756_v11 = vpop.xlane.xlu0 %755 }
 0x219   : > { %v810_v46 = vsub.f32 %v4237_v15, %v756_v11  ;;  %v1003_v5 = vsub.f32 %v4241_v20, %v951_v10  ;;  %v807_v10 = vsub.f32 %v4251_v31, %v4206_v28 }
 0x21b   : > { %v3038_v57 = vpack.i.bf16 %v811_v41, %v810_v46  ;;  %v999_v41 = vsub.f32 %v4251_v31, %v4215_v39 }
 0x21c   : > { %v971_v62 = vpop.xlane.xlu1 %970  ;;  %v776_v12 = vpop.xlane.xlu0 %775 }
 0x21d   : > { %v854_v58 = vsub.f32 %v4247_v26, %v776_v12  ;;  %v1047_v32 = vsub.f32 %v4251_v31, %v971_v62 }
 0x21f   : > { %v3043_v2 = vpack.i.bf16 %v855_v55, %v854_v58 }
 0x220   : > { %v4244_v17 = vpop.xlane.xlu1 %982  ;;  %v788_v22 = vpop.xlane.xlu0 %787 }
 0x221   : > { %v858_v4 = vsub.f32 %v4237_v15, %v788_v22 }
 0x223   : > { %v3048_v52 = vpack.i.bf16 %v859_v61, %v858_v4  ;;  %v1191_v4 = vsub.f32 %v4251_v31, %v4221_v47 }
 0x224   : > { %v4254_v34 = vpop.xlane.xlu1 %1142  ;;  %3019 = vrot.lane.b32.xlu1 %v3018_v25, %s3697_s21  ;;  %v948_v35 = vpop.xlane.xlu0 %947 }
 0x225   : > { %v1002_v11 = vsub.f32 %v4237_v15, %v948_v35  ;;  %v1195_v55 = vsub.f32 %v4241_v20, %v4254_v34 }
 0x227   : > { %v3058_v7 = vpack.i.bf16 %v1003_v5, %v1002_v11 }
 0x228   : > { %v4259_v44 = vpop.xlane.xlu1 %1162  ;;  %3024 = vrot.lane.b32.xlu1 %v3023_v40, %s3698_s22  ;;  %v968_v45 = vpop.xlane.xlu0 %967 }
 0x229   : > { %v1046_v25 = vsub.f32 %v4247_v26, %v968_v45  ;;  %v1051_v45 = vsub.f32 %v4241_v20, %v4244_v17  ;;  %v1239_v11 = vsub.f32 %v4251_v31, %v4259_v44 }
 0x22b   : > { %v3063_v19 = vpack.i.bf16 %v1047_v32, %v1046_v25 }
 0x22c   : > { %v4264_v53 = vpop.xlane.xlu1 %1174  ;;  %3029 = vrot.lane.b32.xlu1 %v3028_v51, %s3698_s22  ;;  %v980_v54 = vpop.xlane.xlu0 %979 }
 0x22d   : > { %v1050_v42 = vsub.f32 %v4237_v15, %v980_v54  ;;  %v1243_v44 = vsub.f32 %v4241_v20, %v4264_v53 }
 0x230   : > { %v4269_v59 = vpop.xlane.xlu1 %1334  ;;  %3039 = vrot.lane.b32.xlu1 %v3038_v57, %s3697_s21  ;;  %v1140_v1 = vpop.xlane.xlu0 %1139  ;;  %v3068_v57 = vpack.i.bf16 %v1051_v45, %v1050_v42 }
 0x231   : > { %v1194_v58 = vsub.f32 %v4237_v15, %v1140_v1  ;;  %v1387_v32 = vsub.f32 %v4241_v20, %v4269_v59 }
 0x233   : > { %v3078_v61 = vpack.i.bf16 %v1195_v55, %v1194_v58 }
 0x234   : > { %v4274_v6 = vpop.xlane.xlu1 %1354  ;;  %3044 = vrot.lane.b32.xlu1 %v3043_v2, %s3698_s22  ;;  %v1160_v50 = vpop.xlane.xlu0 %1159 }
 0x238   : > { %v552_v12 = vpop.xlane.xlu1 %551  ;;  %3049 = vrot.lane.b32.xlu1 %v3048_v52, %s3698_s22  ;;  %v1172_v18 = vpop.xlane.xlu0 %1171  ;;  %v1238_v52 = vsub.f32 %v4247_v26, %v1160_v50 }
 0x239   : > { %v614_v22 = vsub.f32 %v4247_v26, %v552_v12  ;;  %v1383_v12 = vsub.f32 %v4251_v31, %v4227_v56  ;;  %v1242_v50 = vsub.f32 %v4237_v15, %v1172_v18 }
 0x23b   : > { %v3013_v29 = vpack.i.bf16 %v615_v21, %v614_v22  ;;  %v3083_v21 = vpack.i.bf16 %v1239_v11, %v1238_v52  ;;  %v3088_v56 = vpack.i.bf16 %v1243_v44, %v1242_v50 }
 0x23c   : > { %v744_v40 = vpop.xlane.xlu1 %743  ;;  %3059 = vrot.lane.b32.xlu1 %v3058_v7, %s3697_s21  ;;  %v1332_v35 = vpop.xlane.xlu0 %1331 }
 0x23d   : > { %v806_v38 = vsub.f32 %v4247_v26, %v744_v40  ;;  %3014 = vrot.lane.b32.xlu0 %v3013_v29, %s3697_s21  ;;  %v1386_v29 = vsub.f32 %v4237_v15, %v1332_v35 }
 0x23f   : > { %v3033_v51 = vpack.i.bf16 %v807_v10, %v806_v38  ;;  %v4328_v10 = vld [vmem:[%s3754_s16 + $0x30] sm:$0xff]  ;;  %v4332_v38 = vld [vmem:[%s3754_s16 + $0x38] sm:$0xff]  ;;  %v3098_v42 = vpack.i.bf16 %v1387_v32, %v1386_v29 }
 0x240   : > { %v936_v46 = vpop.xlane.xlu1 %935  ;;  %3064 = vrot.lane.b32.xlu1 %v3063_v19, %s3698_s22  ;;  %v4294_v62 = vpop.xlane.xlu0 %1351 }
 0x241   : > { %v998_v28 = vsub.f32 %v4247_v26, %v936_v46  ;;  %3034 = vrot.lane.b32.xlu0 %v3033_v51, %s3697_s21  ;;  %v4336_v51 = vld [vmem:[%s3754_s16 + $0x18] sm:$0xff]  ;;  %v4340_v46 = vld [vmem:[%s3754_s16 + $0x10] sm:$0xff] }
 0x243   : > { %v3053_v54 = vpack.i.bf16 %v999_v41, %v998_v28 }
 0x244   : > { %v1128_v17 = vpop.xlane.xlu1 %1127  ;;  %3069 = vrot.lane.b32.xlu1 %v3068_v57, %s3698_s22  ;;  %v4304_v2 = vpop.xlane.xlu0 %1363 }
 0x245   : > { %v1190_v39 = vsub.f32 %v4247_v26, %v1128_v17  ;;  %3054 = vrot.lane.b32.xlu0 %v3053_v54, %s3697_s21 }
 0x247   : > { %v3073_v1 = vpack.i.bf16 %v1191_v4, %v1190_v39 }
 0x248   : > { %v1320_v34 = vpop.xlane.xlu1 %1319  ;;  %3079 = vrot.lane.b32.xlu1 %v3078_v61, %s3697_s21  ;;  %v558_v5 = vpop.xlane.xlu0 %557 }
 0x249   : > { %v1382_v47 = vsub.f32 %v4247_v26, %v1320_v34  ;;  %3074 = vrot.lane.b32.xlu0 %v3073_v1, %s3697_s21  ;;  %v616_v59 = vsub.f32 %v4340_v46, %v558_v5 }
 0x24b   : > { %v3093_v22 = vpack.i.bf16 %v1383_v12, %v1382_v47 }
 0x24c   : > { %v561_v7 = vpop.xlane.xlu1 %560  ;;  %3084 = vrot.lane.b32.xlu1 %v3083_v21, %s3698_s22  ;;  %v570_v25 = vpop.xlane.xlu0 %569 }
 0x24d   : > { %3094 = vrot.lane.b32.xlu0 %v3093_v22, %s3697_s21  ;;  %v620_v53 = vsub.f32 %v4328_v10, %v570_v25  ;;  %v617_v35 = vsub.f32 %v4336_v51, %v561_v7 }
 0x24f   : > { %v3103_v54 = vpack.i.bf16 %v617_v35, %v616_v59 }
 0x250   : > { %v573_v40 = vpop.xlane.xlu1 %572  ;;  %3089 = vrot.lane.b32.xlu1 %v3088_v56, %s3698_s22  ;;  %v590_v18 = vpop.xlane.xlu0 %589 }
 0x251   : > { %v621_v19 = vsub.f32 %v4332_v38, %v573_v40  ;;  %v664_v57 = vsub.f32 %v4340_v46, %v590_v18 }
 0x253   : > { %v3108_v45 = vpack.i.bf16 %v621_v19, %v620_v53 }
 0x254   : > { %v593_v41 = vpop.xlane.xlu1 %592  ;;  %3099 = vrot.lane.b32.xlu1 %v3098_v42, %s3697_s21  ;;  %v602_v28 = vpop.xlane.xlu0 %601 }
 0x255   : > { %v665_v58 = vsub.f32 %v4336_v51, %v593_v41  ;;  %3109 = vrot.lane.b32.xlu0 %v3108_v45, %s3697_s21  ;;  %v668_v39 = vsub.f32 %v4328_v10, %v602_v28 }
 0x257   : > { %v3113_v55 = vpack.i.bf16 %v665_v58, %v664_v57 }
 0x258   : > { %v605_v17 = vpop.xlane.xlu1 %604  ;;  %3104 = vrot.lane.b32.xlu1 %v3103_v54, %s3697_s21  ;;  %v750_v4 = vpop.xlane.xlu0 %749 }
 0x259   : > { %v669_v61 = vsub.f32 %v4332_v38, %v605_v17  ;;  %3114 = vrot.lane.b32.xlu0 %v3113_v55, %s3698_s22  ;;  %v808_v34 = vsub.f32 %v4340_v46, %v750_v4 }
 0x25b   : > { %v3118_v52 = vpack.i.bf16 %v669_v61, %v668_v39 }
 0x25c   : > { %v753_v1 = vpop.xlane.xlu1 %752  ;;  %v762_v11 = vpop.xlane.xlu0 %761 }
 0x25d   : > { %v809_v5 = vsub.f32 %v4336_v51, %v753_v1  ;;  %3119 = vrot.lane.b32.xlu0 %v3118_v52, %s3698_s22  ;;  %v812_v50 = vsub.f32 %v4328_v10, %v762_v11 }
 0x25f   : > { %v3123_v12 = vpack.i.bf16 %v809_v5, %v808_v34 }
 0x260   : > { %v765_v47 = vpop.xlane.xlu1 %764  ;;  %v782_v21 = vpop.xlane.xlu0 %781 }
 0x261   : > { %v813_v22 = vsub.f32 %v4332_v38, %v765_v47  ;;  %3124 = vrot.lane.b32.xlu1 %v3123_v12, %s3697_s21  ;;  %v856_v56 = vsub.f32 %v4340_v46, %v782_v21 }
 0x263   : > { %v3128_v44 = vpack.i.bf16 %v813_v22, %v812_v50 }
 0x264   : > { %v785_v7 = vpop.xlane.xlu1 %784  ;;  %v794_v25 = vpop.xlane.xlu0 %793 }
 0x265   : > { %v857_v29 = vsub.f32 %v4336_v51, %v785_v7  ;;  %3129 = vrot.lane.b32.xlu0 %v3128_v44, %s3697_s21  ;;  %v860_v53 = vsub.f32 %v4328_v10, %v794_v25 }
 0x267   : > { %v3133_v32 = vpack.i.bf16 %v857_v29, %v856_v56 }
 0x268   : > { %v797_v40 = vpop.xlane.xlu1 %796  ;;  %v942_v18 = vpop.xlane.xlu0 %941 }
 0x269   : > { %v861_v19 = vsub.f32 %v4332_v38, %v797_v40  ;;  %3134 = vrot.lane.b32.xlu0 %v3133_v32, %s3698_s22  ;;  %v1000_v59 = vsub.f32 %v4340_v46, %v942_v18 }
 0x26b   : > { %v3138_v42 = vpack.i.bf16 %v861_v19, %v860_v53 }
 0x26c   : > { %v945_v35 = vpop.xlane.xlu1 %944  ;;  %v954_v45 = vpop.xlane.xlu0 %953 }
 0x26d   : > { %v1001_v41 = vsub.f32 %v4336_v51, %v945_v35  ;;  %3139 = vrot.lane.b32.xlu0 %v3138_v42, %s3698_s22  ;;  %v1004_v54 = vsub.f32 %v4328_v10, %v954_v45 }
 0x26f   : > { %v3143_v28 = vpack.i.bf16 %v1001_v41, %v1000_v59 }
 0x270   : > { %v957_v57 = vpop.xlane.xlu1 %956  ;;  %v974_v58 = vpop.xlane.xlu0 %973 }
 0x271   : > { %v1005_v55 = vsub.f32 %v4332_v38, %v957_v57  ;;  %3144 = vrot.lane.b32.xlu1 %v3143_v28, %s3697_s21  ;;  %v1048_v61 = vsub.f32 %v4340_v46, %v974_v58 }
 0x273   : > { %v3148_v17 = vpack.i.bf16 %v1005_v55, %v1004_v54 }
 0x274   : > { %v977_v4 = vpop.xlane.xlu1 %976  ;;  %v986_v39 = vpop.xlane.xlu0 %985 }
 0x275   : > { %v1049_v52 = vsub.f32 %v4336_v51, %v977_v4  ;;  %3149 = vrot.lane.b32.xlu0 %v3148_v17, %s3697_s21  ;;  %v1052_v5 = vsub.f32 %v4328_v10, %v986_v39  ;;  %v1430_v4 = vsub.f32 %v4247_v26, %v4294_v62 }
 0x277   : > { %v3153_v1 = vpack.i.bf16 %v1049_v52, %v1048_v61  ;;  %v1431_v52 = vsub.f32 %v4251_v31, %v4274_v6 }
 0x278   : > { %v989_v11 = vpop.xlane.xlu1 %988  ;;  %v1134_v34 = vpop.xlane.xlu0 %1133 }
 0x279   : > { %v1053_v12 = vsub.f32 %v4332_v38, %v989_v11  ;;  %3154 = vrot.lane.b32.xlu0 %v3153_v1, %s3698_s22  ;;  %v1192_v22 = vsub.f32 %v4340_v46, %v1134_v34 }
 0x27b   : > { %v3158_v47 = vpack.i.bf16 %v1053_v12, %v1052_v5  ;;  %v3193_v5 = vpack.i.bf16 %v1431_v52, %v1430_v4 }
 0x27c   : > { %v1137_v21 = vpop.xlane.xlu1 %1136  ;;  %v1146_v50 = vpop.xlane.xlu0 %1145 }
 0x27d   : > { %v1193_v44 = vsub.f32 %v4336_v51, %v1137_v21  ;;  %3159 = vrot.lane.b32.xlu0 %v3158_v47, %s3698_s22  ;;  %v1196_v29 = vsub.f32 %v4328_v10, %v1146_v50 }
 0x27f   : > { %v3163_v7 = vpack.i.bf16 %v1193_v44, %v1192_v22  ;;  %v1434_v22 = vsub.f32 %v4237_v15, %v4304_v2 }
 0x280   : > { %v1149_v25 = vpop.xlane.xlu1 %1148  ;;  %v1166_v56 = vpop.xlane.xlu0 %1165 }
 0x281   : > { %v1197_v32 = vsub.f32 %v4332_v38, %v1149_v25  ;;  %3164 = vrot.lane.b32.xlu1 %v3163_v7, %s3697_s21  ;;  %v1240_v19 = vsub.f32 %v4340_v46, %v1166_v56 }
 0x283   : > { %v3168_v40 = vpack.i.bf16 %v1197_v32, %v1196_v29 }
 0x284   : > { %v1169_v18 = vpop.xlane.xlu1 %1168  ;;  %v1178_v53 = vpop.xlane.xlu0 %1177 }
 0x285   : > { %v1241_v42 = vsub.f32 %v4336_v51, %v1169_v18  ;;  %3169 = vrot.lane.b32.xlu0 %v3168_v40, %s3697_s21  ;;  %v1244_v41 = vsub.f32 %v4328_v10, %v1178_v53 }
 0x287   : > { %v3173_v35 = vpack.i.bf16 %v1241_v42, %v1240_v19 }
 0x288   : > { %v1181_v45 = vpop.xlane.xlu1 %1180  ;;  %v1326_v59 = vpop.xlane.xlu0 %1325 }
 0x289   : > { %v1245_v28 = vsub.f32 %v4332_v38, %v1181_v45  ;;  %3174 = vrot.lane.b32.xlu0 %v3173_v35, %s3698_s22  ;;  %v1384_v55 = vsub.f32 %v4340_v46, %v1326_v59 }
 0x28b   : > { %v3178_v57 = vpack.i.bf16 %v1245_v28, %v1244_v41 }
 0x28c   : > { %v1329_v58 = vpop.xlane.xlu1 %1328  ;;  %v1338_v54 = vpop.xlane.xlu0 %1337 }
 0x28d   : > { %v1385_v17 = vsub.f32 %v4336_v51, %v1329_v58  ;;  %3179 = vrot.lane.b32.xlu0 %v3178_v57, %s3698_s22  ;;  %v1388_v1 = vsub.f32 %v4328_v10, %v1338_v54 }
 0x28f   : > { %v3183_v39 = vpack.i.bf16 %v1385_v17, %v1384_v55 }
 0x290   : > { %v1341_v61 = vpop.xlane.xlu1 %1340  ;;  %v1358_v34 = vpop.xlane.xlu0 %1357 }
 0x291   : > { %v1389_v11 = vsub.f32 %v4332_v38, %v1341_v61  ;;  %3184 = vrot.lane.b32.xlu1 %v3183_v39, %s3697_s21  ;;  %v1432_v21 = vsub.f32 %v4340_v46, %v1358_v34 }
 0x293   : > { %v3188_v12 = vpack.i.bf16 %v1389_v11, %v1388_v1 }
 0x294   : > { %v1361_v47 = vpop.xlane.xlu1 %1360  ;;  %v1370_v7 = vpop.xlane.xlu0 %1369 }
 0x295   : > { %v1433_v50 = vsub.f32 %v4336_v51, %v1361_v47  ;;  %3194 = vrot.lane.b32.xlu1 %v3193_v5, %s3698_s22  ;;  %3189 = vrot.lane.b32.xlu0 %v3188_v12, %s3697_s21  ;;  %v1436_v29 = vsub.f32 %v4328_v10, %v1370_v7 }
 0x297   : > { %v3198_v62 = vpack.i.bf16 %v1433_v50, %v1432_v21 }
 0x298   : > { %v1367_v6 = vpop.xlane.xlu1 %1366 }
 0x299   : > { %v1435_v44 = vsub.f32 %v4241_v20, %v1367_v6  ;;  %3199 = vrot.lane.b32.xlu0 %v3198_v62, %s3698_s22 }
 0x29b   : > { %v3203_v25 = vpack.i.bf16 %v1435_v44, %v1434_v22 }
 0x29c   : > { %v1373_v56 = vpop.xlane.xlu1 %1372 }
 0x29d   : > { %v1437_v32 = vsub.f32 %v4332_v38, %v1373_v56  ;;  %3204 = vrot.lane.b32.xlu1 %v3203_v25, %s3698_s22 }
 0x29f   : > { %v3208_v40 = vpack.i.bf16 %v1437_v32, %v1436_v29 }
 0x2a0   : > { %v4408_v18 = vpop.permute.xlu1 %3019 }
 0x2a1   : > { %3209 = vrot.lane.b32.xlu0 %v3208_v40, %s3698_s22 }
 0x2a4   : > { %v3025_v53 = vpop.permute.xlu1 %3024 }
 0x2a5   : > { %v3027_v2 = vunpack.i.h.bf16 %v3025_v53  ;;  %v3026_v19 = vunpack.i.l.bf16 %v3025_v53 }
 0x2a7   : > { %v4415_v42 = vsel %vm5697_vm5, %v3027_v2, 0.0  ;;  %v4419_v35 = vsel %vm5695_vm3, %v3026_v19, 0.0  ;;  %vm5699_vm3 = vcmp.ge.f32.partialorder %v3886_v36, 2.0  ;;  %vm1480_vm5 = vcmp.eq.f32.partialorder %v4039_v8, 6.0 }
 0x2a8   : > { %5793 = vst [vmem:[#allocation2_spill] sm:$0xff] %v4415_v42  ;;  %5794 = vst [vmem:[#allocation3_spill] sm:$0xff] %v4419_v35  ;;  %v3030_v59 = vpop.permute.xlu1 %3029 }
 0x2a9   : > { %v3032_v41 = vunpack.i.h.bf16 %v3030_v59  ;;  %v3031_v28 = vunpack.i.l.bf16 %v3030_v59 }
 0x2ab   : > { %v4427_v57 = vsel %vm5693_vm7, %v3032_v41, 0.0  ;;  %v4431_v58 = vsel %vm5692_vm6, %v3031_v28, 0.0  ;;  %vm1478_vm6 = vcmp.eq.f32.partialorder %v3908_v43, 6.0  ;;  %vm1487_vm7 = vmand %vm330_vm9, %vm1479_vm4  ;;  %vm1481_vm4 = vcmp.eq.f32.partialorder %v4029_v3, 6.0 }
 0x2ac   : > { %5795 = vst [vmem:[#allocation4_spill] sm:$0xff] %v4427_v57  ;;  %5796 = vst [vmem:[#allocation5_spill] sm:$0xff] %v4431_v58  ;;  %v4435_v55 = vpop.permute.xlu1 %3039  ;;  %v4478_v44 = vsel %vm1487_vm7, 1.0, %v5704_v60  ;;  %vm5717_vm7 = vcmp.ge.f32.partialorder %v3908_v43, 3.0 }
 0x2ad   : > { %v1503_v25 = vmul.f32 %v4478_v44, %v3790_v30 }
 0x2af   : > { %v4437_v17 = vpop.permute.xlu0 %3014 }
 0x2b0   : > { %v3045_v4 = vpop.permute.xlu1 %3044 }
 0x2b1   : > { %v3047_v39 = vunpack.i.h.bf16 %v3045_v4  ;;  %v3046_v61 = vunpack.i.l.bf16 %v3045_v4  ;;  %v1513_v4 = vsel %vm388_vm8, %v1503_v25, 0.0 }
 0x2b3   : > { %v4444_v52 = vsel %vm5694_vm2, %v3047_v39, 0.0  ;;  %v4448_v1 = vsel %vm5696_vm1, %v3046_v61, 0.0  ;;  %v4450_v11 = vpop.permute.xlu0 %3034  ;;  %vm5698_vm2 = vcmp.ge.f32.partialorder %v3892_v37, 2.0  ;;  %vm1486_vm1 = vmand %vm5700_vm10, %vm1478_vm6  ;;  %vm1483_vm10 = vcmp.eq.f32.partialorder %v3886_v36, 6.0 }
 0x2b4   : > { %5797 = vst [vmem:[#allocation6_spill] sm:$0xff] %v4444_v52  ;;  %5798 = vst [vmem:[#allocation7_spill] sm:$0xff] %v4448_v1  ;;  %v3050_v5 = vpop.permute.xlu1 %3049  ;;  %v4481_v7 = vsel %vm1486_vm1, 1.0, %v5704_v60  ;;  %vm5718_vm1 = vcmp.ge.f32.partialorder %v3866_v27, 3.0 }
 0x2b5   : > { %v3052_v12 = vunpack.i.h.bf16 %v3050_v5  ;;  %v3051_v47 = vunpack.i.l.bf16 %v3050_v5  ;;  %vm1488_vm6 = vmand %vm331_vm11, %vm1480_vm5  ;;  %v1502_v29 = vmul.f32 %v4481_v7, %v3790_v30 }
 0x2b6   : > { %v4494_v32 = vsel %vm1488_vm6, 1.0, %v5704_v60  ;;  %vm1484_vm6 = vcmp.eq.f32.partialorder %v4050_v16, 6.0 }
 0x2b7   : > { %v4464_v21 = vsel %vm5699_vm3, %v3052_v12, 0.0  ;;  %v4468_v50 = vsel %vm5698_vm2, %v3051_v47, 0.0  ;;  %v4470_v62 = vpop.permute.xlu0 %3054  ;;  %vm1489_vm2 = vmand %vm5701_vm12, %vm1481_vm4  ;;  %vm1482_vm3 = vcmp.eq.f32.partialorder %v3892_v37, 6.0  ;;  %vm1485_vm12 = vcmp.eq.f32.partialorder %v4041_v9, 6.0 }
 0x2b8   : > { %5799 = vst [vmem:[#allocation8_spill] sm:$0xff] %v4464_v21  ;;  %5800 = vst [vmem:[#allocation9_spill] sm:$0xff] %v4468_v50  ;;  %v4475_v22 = vpop.permute.xlu1 %3059  ;;  %v4499_v19 = vsel %vm1489_vm2, 1.0, %v5704_v60  ;;  %v1504_v39 = vmul.f32 %v4494_v32, %v3790_v30  ;;  %v1510_v12 = vsel %vm388_vm8, %v1502_v29, 0.0  ;;  %vm5716_vm2 = vcmp.ge.f32.partialorder %v3886_v36, 3.0 }
 0x2b9   : > { %vm1490_vm5 = vmand %vm333_vm13, %vm1482_vm3  ;;  %v1505_v47 = vmul.f32 %v4499_v19, %v3790_v30  ;;  %vm5715_vm3 = vcmp.ge.f32.partialorder %v3892_v37, 3.0 }
 0x2ba   : > { %vm4507_vm4 = vmand %vm334_vm14, %vm1483_vm10 }
 0x2bb   : > { %v4496_v40 = vpop.permute.xlu0 %3074  ;;  %v4535_v25 = vsel %vm4507_vm4, 1.0, %v5704_v60  ;;  %vm1492_vm10 = vmand %vm5770_vm15, %vm1484_vm6  ;;  %v1519_v34 = vsel %vm388_vm8, %v1505_v47, 0.0  ;;  %vm5709_vm4 = vcmp.ge.f32.partialorder %v3866_v27, 4.0  ;;  %vm5714_vm6 = vcmp.ge.f32.partialorder %v3892_v37, 4.0 }
 0x2bc   : > { %v3065_v56 = vpop.permute.xlu1 %3064  ;;  %v1500_v54 = vsel %vm1492_vm10, 1.0, %v5704_v60  ;;  %vm5711_vm10 = vcmp.ge.f32.partialorder %v3886_v36, 4.0  ;;  %vm1674_vm15 = vcmp.eq.f32.partialorder %v3892_v37, 7.0 }
 0x2bd   : > { %v3067_v53 = vunpack.i.h.bf16 %v3065_v56  ;;  %v3066_v2 = vunpack.i.l.bf16 %v3065_v56  ;;  %v4530_v56 = vsel %vm1490_vm5, 1.0, %v5704_v60  ;;  %vm1493_vm5 = vmand %vm5769_vm0, %vm1485_vm12  ;;  %v1508_v61 = vmul.f32 %v1500_v54, %v3790_v30 }
 0x2be   : > { %vm5712_vm12 = vcmp.ge.f32.partialorder %v3908_v43, 4.0 }
 0x2bf   : > { %v4515_v41 = vsel %vm5718_vm1, %v3067_v53, 0.0  ;;  %v4519_v28 = vsel %vm5717_vm7, %v3066_v2, 0.0  ;;  %v4547_v29 = vpop.permute.xlu0 %3094  ;;  %vm5721_vm7 = vcmp.ge.f32.partialorder %v4041_v9, 2.0  ;;  %vm5729_vm1 = vcmp.ge.f32.partialorder %v4039_v8, 3.0 }
 0x2c0   : > { %5803 = vst [vmem:[#allocation10_spill] sm:$0xff] %v4515_v41  ;;  %5804 = vst [vmem:[#allocation11_spill] sm:$0xff] %v4519_v28  ;;  %v3070_v5 = vpop.permute.xlu1 %3069  ;;  %1514 = vadd.xlane.f32.xlu0 %v1513_v4 }
 0x2c1   : > { %v3072_v53 = vunpack.i.h.bf16 %v3070_v5  ;;  %v3071_v2 = vunpack.i.l.bf16 %v3070_v5  ;;  %1511 = vadd.xlane.f32.xlu1 %v1510_v12  ;;  %v1516_v5 = vsel %vm388_vm8, %v1504_v39, 0.0  ;;  %v1506_v12 = vmul.f32 %v4530_v56, %v3790_v30 }
 0x2c3   : > { %v4551_v59 = vsel %vm5716_vm2, %v3072_v53, 0.0  ;;  %v4555_v4 = vsel %vm5715_vm3, %v3071_v2, 0.0  ;;  %v1507_v53 = vmul.f32 %v4535_v25, %v3790_v30  ;;  %v4569_v2 = vsel %vm1493_vm5, 1.0, %v5704_v60 }
 0x2c4   : > { %5805 = vst [vmem:[#allocation12_spill] sm:$0xff] %v4551_v59  ;;  %5806 = vst [vmem:[#allocation13_spill] sm:$0xff] %v4555_v4  ;;  %v4562_v6 = vpop.permute.xlu1 %3079  ;;  %1517 = vadd.xlane.f32.xlu0 %v1516_v5  ;;  %v1522_v45 = vsel %vm388_vm8, %v1506_v12, 0.0  ;;  %v1509_v47 = vmul.f32 %v4569_v2, %v3790_v30  ;;  %v1534_v12 = vmul.f32 %v4481_v7, %v3792_v33  ;;  %v1528_v60 = vsel %vm388_vm8, %v1508_v61, 0.0 }
 0x2c5   : > { %1520 = vadd.xlane.f32.xlu1 %v1519_v34  ;;  %v1525_v5 = vsel %vm388_vm8, %v1507_v53, 0.0  ;;  %vm5767_vm5 = vcmp.ge.f32.partialorder %v4039_v8, 1.0  ;;  %vm5764_vm3 = vcmp.ge.f32.partialorder %v4029_v3, 2.0  ;;  %vm5720_vm2 = vcmp.ge.f32.partialorder %v4050_v16, 2.0 }
 0x2c7   : > { %v4571_v39 = vpop.permute.xlu0 %3109 }
 0x2c8   : > { %v3085_v4 = vpop.permute.xlu1 %3084  ;;  %1523 = vadd.xlane.f32.xlu0 %v1522_v45  ;;  %v1535_v45 = vmul.f32 %v4478_v44, %v3792_v33  ;;  %v1531_v44 = vsel %vm388_vm8, %v1509_v47, 0.0  ;;  %v1537_v47 = vmul.f32 %v4499_v19, %v3792_v33  ;;  %v1538_v19 = vmul.f32 %v4530_v56, %v3792_v33 }
 0x2c9   : > { %v3087_v59 = vunpack.i.h.bf16 %v3085_v4  ;;  %v3086_v34 = vunpack.i.l.bf16 %v3085_v4  ;;  %1526 = vadd.xlane.f32.xlu1 %v1525_v5 }
 0x2cb   : > { %v4588_v53 = vsel %vm5709_vm4, %v3087_v59, 0.0  ;;  %v4592_v4 = vsel %vm5712_vm12, %v3086_v34, 0.0  ;;  %v3115_v5 = vpop.permute.xlu0 %3114  ;;  %vm5768_vm4 = vcmp.ge.f32.partialorder %v4029_v3, 1.0  ;;  %vm5766_vm12 = vcmp.ge.f32.partialorder %v4041_v9, 1.0 }
 0x2cc   : > { %5807 = vst [vmem:[#allocation14_spill] sm:$0xff] %v4588_v53  ;;  %5808 = vst [vmem:[#allocation15_spill] sm:$0xff] %v4592_v4  ;;  %v3117_v7 = vunpack.i.h.bf16 %v3115_v5  ;;  %v3116_v41 = vunpack.i.l.bf16 %v3115_v5  ;;  %v3090_v50 = vpop.permute.xlu1 %3089  ;;  %1529 = vadd.xlane.f32.xlu0 %v1528_v60  ;;  %v1542_v5 = vsel %vm388_vm8, %v1534_v12, 0.0  ;;  %v1545_v60 = vsel %vm388_vm8, %v1535_v45, 0.0 }
 0x2cd   : > { %v3092_v59 = vunpack.i.h.bf16 %v3090_v50  ;;  %v3091_v21 = vunpack.i.l.bf16 %v3090_v50  ;;  %1532 = vadd.xlane.f32.xlu1 %v1531_v44  ;;  %v1540_v12 = vmul.f32 %v1500_v54, %v3792_v33 }
 0x2ce   : > { %v4602_v34 = vsel %vm5768_vm4, %v3117_v7, 0.0  ;;  %v4606_v61 = vsel %vm5767_vm5, %v3116_v41, 0.0  ;;  %v1536_v41 = vmul.f32 %v4494_v32, %v3792_v33  ;;  %vm5836_vm4 = vcmp.lt.f32.partialorder %v3818_v0, 0.390625 }
 0x2cf   : > { %5809 = vst [vmem:[#allocation16_spill] sm:$0xff] %v4602_v34  ;;  %5810 = vst [vmem:[#allocation17_spill] sm:$0xff] %v4606_v61  ;;  %v4614_v28 = vsel %vm5711_vm10, %v3092_v59, 0.0  ;;  %v4618_v50 = vsel %vm5714_vm6, %v3091_v21, 0.0  ;;  %v3120_v7 = vpop.permute.xlu0 %3119  ;;  %vm5765_vm10 = vcmp.ge.f32.partialorder %v4050_v16, 1.0  ;;  %vm5719_vm6 = vcmp.ge.f32.partialorder %v4039_v8, 2.0 }
 0x2d0   : > { %5811 = vst [vmem:[#allocation18_spill] sm:$0xff] %v4614_v28  ;;  %5812 = vst [vmem:[#allocation19_spill] sm:$0xff] %v4618_v50  ;;  %v3122_v44 = vunpack.i.h.bf16 %v3120_v7  ;;  %v3121_v45 = vunpack.i.l.bf16 %v3120_v7  ;;  %1543 = vadd.xlane.f32.xlu0 %v1542_v5  ;;  %v1548_v5 = vsel %vm388_vm8, %v1536_v41, 0.0  ;;  %v1551_v7 = vsel %vm388_vm8, %v1537_v47, 0.0 }
 0x2d1   : > { %1546 = vadd.xlane.f32.xlu1 %v1545_v60  ;;  %v1539_v60 = vmul.f32 %v4535_v25, %v3792_v33  ;;  %v1541_v41 = vmul.f32 %v4569_v2, %v3792_v33  ;;  %v1560_v47 = vsel %vm388_vm8, %v1540_v12, 0.0 }
 0x2d2   : > { %v4630_v21 = vsel %vm5766_vm12, %v3122_v44, 0.0  ;;  %v4634_v32 = vsel %vm5765_vm10, %v3121_v45, 0.0  ;;  %v1554_v45 = vsel %vm388_vm8, %v1538_v19, 0.0  ;;  %vm1672_vm10 = vcmp.eq.f32.partialorder %v4039_v8, 7.0 }
 0x2d3   : > { %5813 = vst [vmem:[#allocation20_spill] sm:$0xff] %v4630_v21  ;;  %5814 = vst [vmem:[#allocation21_spill] sm:$0xff] %v4634_v32  ;;  %v1557_v59 = vsel %vm388_vm8, %v1539_v60, 0.0  ;;  %v1563_v25 = vsel %vm388_vm8, %v1541_v41, 0.0  ;;  %vm1673_vm12 = vcmp.eq.f32.partialorder %v4029_v3, 7.0 }
 0x2d4   : > { %1549 = vadd.xlane.f32.xlu0 %v1548_v5  ;;  %vm1680_vm5 = vmand %vm331_vm11, %vm1672_vm10  ;;  %vm5790_vm10 = vcmp.ge.f32.partialorder %v3908_v43, 6.0 }
 0x2d5   : > { %1552 = vadd.xlane.f32.xlu1 %v1551_v7  ;;  %vm1681_vm0 = vmand %vm5836_vm4, %vm1673_vm12  ;;  %vm1677_vm12 = vcmp.eq.f32.partialorder %v4041_v9, 7.0  ;;  %vm5838_vm4 = vcmp.lt.f32.partialorder %v3852_v24, 0.390625 }
 0x2d7   : > { %v4644_v44 = vpop.permute.xlu0 %3129 }
 0x2d8   : > { %1555 = vadd.xlane.f32.xlu0 %v1554_v45 }
 0x2d9   : > { %1558 = vadd.xlane.f32.xlu1 %v1557_v59 }
 0x2db   : > { %v3135_v56 = vpop.permute.xlu0 %3134 }
 0x2dc   : > { %v3137_v5 = vunpack.i.h.bf16 %v3135_v56  ;;  %v3136_v50 = vunpack.i.l.bf16 %v3135_v56  ;;  %1561 = vadd.xlane.f32.xlu0 %v1560_v47 }
 0x2dd   : > { %1564 = vadd.xlane.f32.xlu1 %v1563_v25  ;;  %v4679_v25 = vpop.permute.xlu1 %3099 }
 0x2de   : > { %v4657_v54 = vsel %vm5764_vm3, %v3137_v5, 0.0  ;;  %v4661_v2 = vsel %vm5719_vm6, %v3136_v50, 0.0  ;;  %vm5734_vm6 = vcmp.ge.f32.partialorder %v4029_v3, 3.0 }
 0x2df   : > { %5815 = vst [vmem:[#allocation22_spill] sm:$0xff] %v4657_v54  ;;  %5816 = vst [vmem:[#allocation23_spill] sm:$0xff] %v4661_v2  ;;  %v3140_v59 = vpop.permute.xlu0 %3139 }
 0x2e0   : > { %v3142_v19 = vunpack.i.h.bf16 %v3140_v59  ;;  %v3141_v7 = vunpack.i.l.bf16 %v3140_v59 }
 0x2e2   : > { %v4669_v60 = vsel %vm5721_vm7, %v3142_v19, 0.0  ;;  %v4673_v45 = vsel %vm5720_vm2, %v3141_v7, 0.0  ;;  %vm5733_vm2 = vcmp.ge.f32.partialorder %v4050_v16, 3.0  ;;  %vm5728_vm7 = vcmp.ge.f32.partialorder %v4041_v9, 3.0 }
 0x2e3   : > { %5817 = vst [vmem:[#allocation24_spill] sm:$0xff] %v4669_v60  ;;  %5818 = vst [vmem:[#allocation25_spill] sm:$0xff] %v4673_v45 }
 0x2e7   : > { %v4677_v41 = vpop.permute.xlu0 %3149 }
 0x2eb   : > { %v3155_v56 = vpop.permute.xlu0 %3154 }
 0x2ec   : > { %v3157_v47 = vunpack.i.h.bf16 %v3155_v56  ;;  %v3156_v5 = vunpack.i.l.bf16 %v3155_v56 }
 0x2ee   : > { %v4685_v59 = vsel %vm5734_vm6, %v3157_v47, 0.0  ;;  %v4689_v19 = vsel %vm5729_vm1, %v3156_v5, 0.0  ;;  %v4703_v5 = vpop.permute.xlu1 %3104  ;;  %vm5746_vm1 = vcmp.ge.f32.partialorder %v4029_v3, 4.0  ;;  %vm5741_vm6 = vcmp.ge.f32.partialorder %v4041_v9, 4.0 }
 0x2ef   : > { %5819 = vst [vmem:[#allocation26_spill] sm:$0xff] %v4685_v59  ;;  %5820 = vst [vmem:[#allocation27_spill] sm:$0xff] %v4689_v19  ;;  %v3160_v50 = vpop.permute.xlu0 %3159 }
 0x2f0   : > { %v3162_v12 = vunpack.i.h.bf16 %v3160_v50  ;;  %v3161_v56 = vunpack.i.l.bf16 %v3160_v50 }
 0x2f2   : > { %v4697_v28 = vsel %vm5728_vm7, %v3162_v12, 0.0  ;;  %v4701_v47 = vsel %vm5733_vm2, %v3161_v56, 0.0  ;;  %v4709_v50 = vpop.permute.xlu1 %3124  ;;  %vm5740_vm7 = vcmp.ge.f32.partialorder %v4039_v8, 4.0  ;;  %vm5745_vm2 = vcmp.ge.f32.partialorder %v4050_v16, 4.0 }
 0x2f3   : > { %5821 = vst [vmem:[#allocation28_spill] sm:$0xff] %v4697_v28  ;;  %5822 = vst [vmem:[#allocation29_spill] sm:$0xff] %v4701_v47 }
 0x2f6   : > { %v4711_v45 = vpop.permute.xlu1 %3144 }
 0x2f7   : > { %v4707_v4 = vpop.permute.xlu0 %3169 }
 0x2fa   : > { %v4725_v60 = vpop.permute.xlu1 %3164 }
 0x2fb   : > { %v3175_v53 = vpop.permute.xlu0 %3174 }
 0x2fc   : > { %v3177_v19 = vunpack.i.h.bf16 %v3175_v53  ;;  %v3176_v59 = vunpack.i.l.bf16 %v3175_v53 }
 0x2fe   : > { %v4717_v12 = vsel %vm5746_vm1, %v3177_v19, 0.0  ;;  %v4721_v56 = vsel %vm5740_vm7, %v3176_v59, 0.0  ;;  %vm5749_vm7 = vcmp.ge.f32.partialorder %v4039_v8, 5.0  ;;  %vm5763_vm1 = vcmp.ge.f32.partialorder %v3886_v36, 5.0 }
 0x2ff   : > { %5823 = vst [vmem:[#allocation30_spill] sm:$0xff] %v4717_v12  ;;  %5824 = vst [vmem:[#allocation31_spill] sm:$0xff] %v4721_v56  ;;  %v3180_v47 = vpop.permute.xlu0 %3179 }
 0x300   : > { %v3182_v28 = vunpack.i.h.bf16 %v3180_v47  ;;  %v3181_v53 = vunpack.i.l.bf16 %v3180_v47 }
 0x302   : > { %v4731_v19 = vsel %vm5741_vm6, %v3182_v28, 0.0  ;;  %v4735_v59 = vsel %vm5745_vm2, %v3181_v53, 0.0  ;;  %vm5750_vm6 = vcmp.ge.f32.partialorder %v4029_v3, 5.0  ;;  %vm5762_vm2 = vcmp.ge.f32.partialorder %v3892_v37, 5.0 }
 0x303   : > { %5825 = vst [vmem:[#allocation32_spill] sm:$0xff] %v4731_v19  ;;  %5826 = vst [vmem:[#allocation33_spill] sm:$0xff] %v4735_v59  ;;  %v4739_v56 = vpop.permute.xlu1 %3184 }
 0x307   : > { %v4741_v47 = vpop.permute.xlu0 %3189  ;;  %v4743_v12 = vpop.permute.xlu1 %3194 }
 0x308   : > { %5827 = vst [vmem:[#allocation34_spill] sm:$0xff] %v4743_v12 }
 0x30b   : > { %v3200_v2 = vpop.permute.xlu0 %3199 }
 0x30c   : > { %v3202_v54 = vunpack.i.h.bf16 %v3200_v2  ;;  %v3201_v1 = vunpack.i.l.bf16 %v3200_v2 }
 0x30e   : > { %v4749_v28 = vsel %vm5750_vm6, %v3202_v54, 0.0  ;;  %v4753_v53 = vsel %vm5749_vm7, %v3201_v1, 0.0  ;;  %vm5760_vm7 = vcmp.ge.f32.partialorder %v4050_v16, 5.0  ;;  %vm5761_vm6 = vcmp.ge.f32.partialorder %v4041_v9, 5.0 }
 0x30f   : > { %5828 = vst [vmem:[#allocation35_spill] sm:$0xff] %v4749_v28  ;;  %5829 = vst [vmem:[#allocation36_spill] sm:$0xff] %v4753_v53  ;;  %v3205_v59 = vpop.permute.xlu1 %3204 }
 0x310   : > { %v3207_v19 = vunpack.i.h.bf16 %v3205_v59  ;;  %v3206_v12 = vunpack.i.l.bf16 %v3205_v59 }
 0x312   : > { %v4761_v2 = vsel %vm5763_vm1, %v3207_v19, 0.0  ;;  %v4765_v54 = vsel %vm5762_vm2, %v3206_v12, 0.0  ;;  %vm5834_vm1 = vcmp.lt.f32.partialorder %v3802_v49, 0.390625 }
 0x313   : > { %5830 = vst [vmem:[#allocation37_spill] sm:$0xff] %v4761_v2  ;;  %5831 = vst [vmem:[#allocation38_spill] sm:$0xff] %v4765_v54  ;;  %v3210_v52 = vpop.permute.xlu0 %3209 }
 0x314   : > { %v3212_v7 = vunpack.i.h.bf16 %v3210_v52  ;;  %v3211_v53 = vunpack.i.l.bf16 %v3210_v52 }
 0x316   : > { %v4773_v59 = vsel %vm5761_vm6, %v3212_v7, 0.0  ;;  %v4777_v19 = vsel %vm5760_vm7, %v3211_v53, 0.0  ;;  %vm1671_vm7 = vcmp.eq.f32.partialorder %v3866_v27, 7.0  ;;  %vm1670_vm6 = vcmp.eq.f32.partialorder %v3908_v43, 7.0 }
 0x317   : > { %5832 = vst [vmem:[#allocation39_spill] sm:$0xff] %v4773_v59  ;;  %5833 = vst [vmem:[#allocation40_spill] sm:$0xff] %v4777_v19  ;;  %v4952_v59 = vld [vmem:[%s3754_s16 + $0x30] sm:$0xff] }
 0x318   : > { %vm1679_vm2 = vmand %vm330_vm9, %vm1671_vm7  ;;  %vm1675_vm7 = vcmp.eq.f32.partialorder %v3886_v36, 7.0 }
 0x319   : > { %vm1678_vm3 = vmand %vm5834_vm1, %vm1670_vm6 }
 0x31a   : > { %vm1682_vm1 = vmand %vm333_vm13, %vm1674_vm15  ;;  %vm5837_vm15 = vcmp.lt.f32.partialorder %v3850_v23, 0.390625 }
 0x31b   : > { %vm1685_vm6 = vmand %vm5838_vm4, %vm1677_vm12  ;;  %vm5784_vm12 = vcmp.ge.f32.partialorder %v4050_v16, 6.0  ;;  %vm1862_vm4 = vcmp.eq.f32.partialorder %v3908_v43, 8.0 }
 0x349   : > { %v1515_v28 = vpop.xlane.xlu0 %1514 }
 0x34a   : > { %v1575_v1 = vsub.f32 %v4251_v31, %v1515_v28  ;;  %v1512_v54 = vpop.xlane.xlu1 %1511 }
 0x34b   : > { %v1574_v52 = vsub.f32 %v4247_v26, %v1512_v54 }
 0x34d   : > { %v3213_v2 = vpack.i.bf16 %v1575_v1, %v1574_v52  ;;  %v1518_v32 = vpop.xlane.xlu0 %1517 }
 0x34e   : > { %v1576_v21 = vsub.f32 %v4340_v46, %v1518_v32  ;;  %v1521_v58 = vpop.xlane.xlu1 %1520 }
 0x34f   : > { %v1577_v7 = vsub.f32 %v4336_v51, %v1521_v58  ;;  %3214 = vrot.lane.b32.xlu0 %v3213_v2, %s3697_s21 }
 0x351   : > { %v3218_v53 = vpack.i.bf16 %v1577_v7, %v1576_v21  ;;  %v1524_v57 = vpop.xlane.xlu0 %1523 }
 0x352   : > { %v1578_v61 = vsub.f32 %v4237_v15, %v1524_v57  ;;  %v1527_v12 = vpop.xlane.xlu1 %1526 }
 0x353   : > { %v1579_v19 = vsub.f32 %v4241_v20, %v1527_v12  ;;  %3219 = vrot.lane.b32.xlu1 %v3218_v53, %s3697_s21 }
 0x355   : > { %v3223_v28 = vpack.i.bf16 %v1579_v19, %v1578_v61  ;;  %v1530_v54 = vpop.xlane.xlu0 %1529 }
 0x356   : > { %v1580_v1 = vsub.f32 %v4328_v10, %v1530_v54  ;;  %v1533_v52 = vpop.xlane.xlu1 %1532 }
 0x357   : > { %v1581_v32 = vsub.f32 %v4332_v38, %v1533_v52  ;;  %3224 = vrot.lane.b32.xlu1 %v3223_v28, %s3697_s21 }
 0x359   : > { %v3228_v58 = vpack.i.bf16 %v1581_v32, %v1580_v1  ;;  %v1544_v2 = vpop.xlane.xlu0 %1543 }
 0x35a   : > { %v1622_v21 = vsub.f32 %v4247_v26, %v1544_v2  ;;  %v1547_v7 = vpop.xlane.xlu1 %1546 }
 0x35b   : > { %v1623_v57 = vsub.f32 %v4251_v31, %v1547_v7  ;;  %3229 = vrot.lane.b32.xlu0 %v3228_v58, %s3697_s21 }
 0x35d   : > { %v3233_v12 = vpack.i.bf16 %v1623_v57, %v1622_v21  ;;  %v1550_v53 = vpop.xlane.xlu0 %1549 }
 0x35e   : > { %v1624_v61 = vsub.f32 %v4340_v46, %v1550_v53  ;;  %v1553_v19 = vpop.xlane.xlu1 %1552 }
 0x35f   : > { %v1625_v54 = vsub.f32 %v4336_v51, %v1553_v19  ;;  %3234 = vrot.lane.b32.xlu1 %v3233_v12, %s3698_s22 }
 0x361   : > { %v3238_v52 = vpack.i.bf16 %v1625_v54, %v1624_v61  ;;  %v1556_v28 = vpop.xlane.xlu0 %1555 }
 0x362   : > { %v1626_v1 = vsub.f32 %v4237_v15, %v1556_v28  ;;  %v1559_v32 = vpop.xlane.xlu1 %1558  ;;  %v5835_v15 = vmov 0.0  }
 0x363   : > { %v1627_v26 = vsub.f32 %v4241_v20, %v1559_v32  ;;  %3239 = vrot.lane.b32.xlu0 %v3238_v52, %s3698_s22  ;;  %v1687_v20 = vsel %vm1679_vm2, 1.0, %v5835_v15  ;;  %v1688_v57 = vsel %vm1680_vm5, 1.0, %v5835_v15  ;;  %v1689_v12 = vsel %vm1681_vm0, 1.0, %v5835_v15 }
 0x364   : > { %vm1676_vm2 = vcmp.eq.f32.partialorder %v4050_v16, 7.0  ;;  %v1696_v61 = vmul.f32 %v1688_v57, %v3790_v30  ;;  %v1697_v54 = vmul.f32 %v1689_v12, %v3790_v30  ;;  %v1690_v52 = vsel %vm1682_vm1, 1.0, %v5835_v15 }
 0x365   : > { %v3243_v31 = vpack.i.bf16 %v1627_v26, %v1626_v1  ;;  %v1562_v58 = vpop.xlane.xlu0 %1561  ;;  %vm1684_vm0 = vmand %vm5837_vm15, %vm1676_vm2  ;;  %v1698_v32 = vmul.f32 %v1690_v52, %v3790_v30  ;;  %vm5791_vm5 = vcmp.ge.f32.partialorder %v3866_v27, 6.0  ;;  %vm5789_vm1 = vcmp.ge.f32.partialorder %v4029_v3, 6.0 }
 0x366   : > { %v1628_v2 = vsub.f32 %v4328_v10, %v1562_v58  ;;  %v1565_v21 = vpop.xlane.xlu1 %1564  ;;  %v1686_v10 = vsel %vm1678_vm3, 1.0, %v5835_v15  ;;  %vm1683_vm3 = vmand %vm334_vm14, %vm1675_vm7  ;;  %v1708_v1 = vsel %vm388_vm8, %v1696_v61, 0.0  ;;  %v1711_v26 = vsel %vm388_vm8, %v1697_v54, 0.0 }
 0x367   : > { %v1629_v46 = vsub.f32 %v4332_v38, %v1565_v21  ;;  %3244 = vrot.lane.b32.xlu1 %v3243_v31, %s3698_s22  ;;  %v1695_v38 = vmul.f32 %v1687_v20, %v3790_v30  ;;  %v1694_v7 = vmul.f32 %v1686_v10, %v3790_v30  ;;  %v1691_v28 = vsel %vm1683_vm3, 1.0, %v5835_v15 }
 0x368   : > { %v1699_v31 = vmul.f32 %v1691_v28, %v3790_v30  ;;  %v1692_v58 = vsel %vm1684_vm0, 1.0, %v5835_v15  ;;  %v1714_v21 = vsel %vm388_vm8, %v1698_v32, 0.0  ;;  %vm5788_vm7 = vcmp.ge.f32.partialorder %v4039_v8, 6.0 }
 0x369   : > { %v3248_v51 = vpack.i.bf16 %v1629_v46, %v1628_v2  ;;  %v1705_v53 = vsel %vm388_vm8, %v1695_v38, 0.0  ;;  %v1702_v19 = vsel %vm388_vm8, %v1694_v7, 0.0  ;;  %v1693_v2 = vsel %vm1685_vm6, 1.0, %v5835_v15 }
 0x36a   : > { %v1700_v46 = vmul.f32 %v1692_v58, %v3790_v30  ;;  %v1701_v38 = vmul.f32 %v1693_v2, %v3790_v30  ;;  %vm5786_vm3 = vcmp.ge.f32.partialorder %v3892_v37, 6.0  ;;  %vm5787_vm2 = vcmp.ge.f32.partialorder %v3886_v36, 6.0 }
 0x36b   : > { %3249 = vrot.lane.b32.xlu0 %v3248_v51, %s3698_s22  ;;  %v1717_v51 = vsel %vm388_vm8, %v1699_v31, 0.0  ;;  %vm5785_vm15 = vcmp.ge.f32.partialorder %v4041_v9, 6.0  ;;  %vm1863_vm0 = vcmp.eq.f32.partialorder %v3866_v27, 8.0 }
 0x36c   : > { %v1720_v7 = vsel %vm388_vm8, %v1700_v46, 0.0  ;;  %v1723_v61 = vsel %vm388_vm8, %v1701_v38, 0.0  ;;  %vm1871_vm6 = vmand %vm330_vm9, %vm1863_vm0  ;;  %vm1867_vm9 = vcmp.eq.f32.partialorder %v3886_v36, 8.0  ;;  %vm1762_vm0 = vcmp.ge.f32.partialorder %v3892_v37, 7.0 }
 0x38a   : > { %1706 = vadd.xlane.f32.xlu0 %v1705_v53  ;;  %v1726_v53 = vmul.f32 %v1686_v10, %v3792_v33  ;;  %v1730_v10 = vmul.f32 %v1690_v52, %v3792_v33 }
 0x38b   : > { %1703 = vadd.xlane.f32.xlu1 %v1702_v19  ;;  %v1727_v19 = vmul.f32 %v1687_v20, %v3792_v33  ;;  %v1731_v20 = vmul.f32 %v1691_v28, %v3792_v33 }
 0x38c   : > { %v1734_v54 = vsel %vm388_vm8, %v1726_v53, 0.0  ;;  %v1746_v46 = vsel %vm388_vm8, %v1730_v10, 0.0 }
 0x38d   : > { %v1737_v32 = vsel %vm388_vm8, %v1727_v19, 0.0 }
 0x38e   : > { %1709 = vadd.xlane.f32.xlu0 %v1708_v1  ;;  %v1728_v1 = vmul.f32 %v1688_v57, %v3792_v33  ;;  %v1732_v57 = vmul.f32 %v1692_v58, %v3792_v33 }
 0x38f   : > { %1712 = vadd.xlane.f32.xlu1 %v1711_v26  ;;  %v1729_v26 = vmul.f32 %v1689_v12, %v3792_v33  ;;  %v1733_v12 = vmul.f32 %v1693_v2, %v3792_v33 }
 0x390   : > { %v1740_v31 = vsel %vm388_vm8, %v1728_v1, 0.0  ;;  %v1752_v38 = vsel %vm388_vm8, %v1732_v57, 0.0 }
 0x391   : > { %v1755_v52 = vsel %vm388_vm8, %v1733_v12, 0.0 }
 0x392   : > { %1715 = vadd.xlane.f32.xlu0 %v1714_v21  ;;  %v1743_v21 = vsel %vm388_vm8, %v1729_v26, 0.0 }
 0x393   : > { %1718 = vadd.xlane.f32.xlu1 %v1717_v51  ;;  %v1749_v51 = vsel %vm388_vm8, %v1731_v20, 0.0 }
 0x396   : > { %1721 = vadd.xlane.f32.xlu0 %v1720_v7 }
 0x397   : > { %1724 = vadd.xlane.f32.xlu1 %v1723_v61 }
 0x39a   : > { %1735 = vadd.xlane.f32.xlu0 %v1734_v54 }
 0x39b   : > { %1738 = vadd.xlane.f32.xlu1 %v1737_v32 }
 0x39e   : > { %1741 = vadd.xlane.f32.xlu0 %v1740_v31 }
 0x39f   : > { %1744 = vadd.xlane.f32.xlu1 %v1743_v21 }
 0x3a2   : > { %1747 = vadd.xlane.f32.xlu0 %v1746_v46  ;;  %v4930_v46 = vld [vmem:[%s3754_s16] sm:$0xff] }
 0x3a3   : > { %1750 = vadd.xlane.f32.xlu1 %v1749_v51 }
 0x3a6   : > { %1753 = vadd.xlane.f32.xlu0 %v1752_v38 }
 0x3a7   : > { %1756 = vadd.xlane.f32.xlu1 %v1755_v52 }
 0x3c1   : > { %v4871_v28 = vpop.permute.xlu0 %3214 }
 0x3c5   : > { %v4869_v7 = vpop.permute.xlu1 %3219 }
 0x3c9   : > { %v4873_v53 = vpop.permute.xlu1 %3224 }
 0x3cd   : > { %v4875_v61 = vpop.permute.xlu0 %3229 }
 0x3ce   : > { %5839 = vst [vmem:[#allocation41_spill] sm:$0xff] %v4875_v61 }
 0x3d1   : > { %v3235_v58 = vpop.permute.xlu1 %3234 }
 0x3d2   : > { %v3237_v19 = vunpack.i.h.bf16 %v3235_v58  ;;  %v3236_v54 = vunpack.i.l.bf16 %v3235_v58 }
 0x3d4   : > { %v4881_v2 = vsel %vm5791_vm5, %v3237_v19, 0.0  ;;  %v4885_v1 = vsel %vm5790_vm10, %v3236_v54, 0.0  ;;  %vm1866_vm5 = vcmp.eq.f32.partialorder %v3892_v37, 8.0 }
 0x3d5   : > { %5840 = vst [vmem:[#allocation42_spill] sm:$0xff] %v4881_v2  ;;  %5841 = vst [vmem:[#allocation43_spill] sm:$0xff] %v4885_v1  ;;  %v3240_v26 = vpop.permute.xlu0 %3239 }
 0x3d6   : > { %v3242_v31 = vunpack.i.h.bf16 %v3240_v26  ;;  %v3241_v10 = vunpack.i.l.bf16 %v3240_v26 }
 0x3d8   : > { %v4893_v21 = vsel %vm5789_vm1, %v3242_v31, 0.0  ;;  %v4897_v20 = vsel %vm5788_vm7, %v3241_v10, 0.0  ;;  %vm5849_vm1 = vcmp.lt.f32.partialorder %v3818_v0, 0.390625 }
 0x3d9   : > { %5842 = vst [vmem:[#allocation44_spill] sm:$0xff] %v4893_v21  ;;  %5843 = vst [vmem:[#allocation45_spill] sm:$0xff] %v4897_v20  ;;  %v3245_v57 = vpop.permute.xlu1 %3244  ;;  %v4943_v21 = vld [vmem:[%s3754_s16 + $0x20] sm:$0xff] }
 0x3da   : > { %v3247_v51 = vunpack.i.h.bf16 %v3245_v57  ;;  %v3246_v12 = vunpack.i.l.bf16 %v3245_v57 }
 0x3dc   : > { %v4905_v38 = vsel %vm5787_vm2, %v3247_v51, 0.0  ;;  %v4909_v52 = vsel %vm5786_vm3, %v3246_v12, 0.0  ;;  %v4926_v12 = vld [vmem:[%s3754_s16 + $0x8] sm:$0xff]  ;;  %vm1864_vm3 = vcmp.eq.f32.partialorder %v4039_v8, 8.0  ;;  %vm1865_vm2 = vcmp.eq.f32.partialorder %v4029_v3, 8.0 }
 0x3dd   : > { %5844 = vst [vmem:[#allocation46_spill] sm:$0xff] %v4905_v38  ;;  %5845 = vst [vmem:[#allocation47_spill] sm:$0xff] %v4909_v52  ;;  %v3250_v19 = vpop.permute.xlu0 %3249  ;;  %v4934_v38 = vld [vmem:[%s3754_s16 + $0x10] sm:$0xff] }
 0x3de   : > { %v3252_v54 = vunpack.i.h.bf16 %v3250_v19  ;;  %v3251_v26 = vunpack.i.l.bf16 %v3250_v19  ;;  %vm1872_vm7 = vmand %vm331_vm11, %vm1864_vm3  ;;  %vm1869_vm3 = vcmp.eq.f32.partialorder %v4041_v9, 8.0 }
 0x3df   : > { %vm1873_vm10 = vmand %vm5849_vm1, %vm1865_vm2  ;;  %vm1868_vm1 = vcmp.eq.f32.partialorder %v4050_v16, 8.0  ;;  %vm1759_vm2 = vcmp.ge.f32.partialorder %v3866_v27, 7.0 }
 0x3e0   : > { %v4917_v31 = vsel %vm5785_vm15, %v3252_v54, 0.0  ;;  %v4921_v10 = vsel %vm5784_vm12, %v3251_v26, 0.0  ;;  %vm5848_vm12 = vcmp.lt.f32.partialorder %v3802_v49, 0.390625  ;;  %vm1875_vm11 = vmand %vm334_vm14, %vm1867_vm9  ;;  %vm1765_vm9 = vcmp.ge.f32.partialorder %v4041_v9, 7.0 }
 0x3e1   : > { %5846 = vst [vmem:[#allocation48_spill] sm:$0xff] %v4917_v31  ;;  %5847 = vst [vmem:[#allocation49_spill] sm:$0xff] %v4921_v10  ;;  %v4938_v10 = vld [vmem:[%s3754_s16 + $0x18] sm:$0xff]  ;;  %v1883_v13 = vsel %vm1875_vm11, 1.0, %v5835_v15  ;;  %vm5854_vm11 = vcmp.ge.f32.partialorder %v3908_v43, 1.0 }
 0x3e2   : > { %vm1870_vm15 = vmand %vm5848_vm12, %vm1862_vm4  ;;  %vm1763_vm4 = vcmp.ge.f32.partialorder %v3886_v36, 7.0 }
 0x3e3   : > { %vm1874_vm12 = vmand %vm333_vm13, %vm1866_vm5  ;;  %vm5850_vm13 = vcmp.lt.f32.partialorder %v3850_v23, 0.390625 }
 0x3e4   : > { %vm1876_vm14 = vmand %vm5850_vm13, %vm1868_vm1  ;;  %vm5855_vm1 = vcmp.ge.f32.partialorder %v3886_v36, 1.0  ;;  %vm5857_vm13 = vcmp.ge.f32.partialorder %v4029_v3, 1.0 }
 0x413   : > { %v1707_v51 = vpop.xlane.xlu0 %1706 }
 0x414   : > { %v1767_v19 = vsub.f32 %v4926_v12, %v1707_v51  ;;  %v1704_v58 = vpop.xlane.xlu1 %1703 }
 0x415   : > { %v1766_v54 = vsub.f32 %v4930_v46, %v1704_v58 }
 0x417   : > { %v3253_v32 = vpack.i.bf16 %v1767_v19, %v1766_v54  ;;  %v1710_v52 = vpop.xlane.xlu0 %1709  ;;  %v4947_v54 = vld [vmem:[%s3754_s16 + $0x28] sm:$0xff] }
 0x418   : > { %v1768_v26 = vsub.f32 %v4934_v38, %v1710_v52  ;;  %v1713_v57 = vpop.xlane.xlu1 %1712 }
 0x419   : > { %v1769_v31 = vsub.f32 %v4938_v10, %v1713_v57  ;;  %3254 = vrot.lane.b32.xlu0 %v3253_v32, %s3697_s21 }
 0x41b   : > { %v3258_v51 = vpack.i.bf16 %v1769_v31, %v1768_v26  ;;  %v1716_v20 = vpop.xlane.xlu0 %1715  ;;  %v4956_v31 = vld [vmem:[%s3754_s16 + $0x38] sm:$0xff] }
 0x41c   : > { %v1770_v58 = vsub.f32 %v4943_v21, %v1716_v20  ;;  %v1719_v19 = vpop.xlane.xlu1 %1718 }
 0x41d   : > { %v1771_v1 = vsub.f32 %v4947_v54, %v1719_v19  ;;  %3259 = vrot.lane.b32.xlu1 %v3258_v51, %s3697_s21 }
 0x41f   : > { %v3263_v52 = vpack.i.bf16 %v1771_v1, %v1770_v58  ;;  %v1722_v2 = vpop.xlane.xlu0 %1721 }
 0x420   : > { %v1772_v57 = vsub.f32 %v4952_v59, %v1722_v2  ;;  %v1725_v32 = vpop.xlane.xlu1 %1724 }
 0x421   : > { %v1773_v26 = vsub.f32 %v4956_v31, %v1725_v32  ;;  %3264 = vrot.lane.b32.xlu1 %v3263_v52, %s3697_s21 }
 0x423   : > { %v3268_v20 = vpack.i.bf16 %v1773_v26, %v1772_v57  ;;  %v1736_v34 = vpop.xlane.xlu0 %1735 }
 0x424   : > { %v1814_v35 = vsub.f32 %v4930_v46, %v1736_v34  ;;  %v1739_v19 = vpop.xlane.xlu1 %1738 }
 0x425   : > { %v1815_v51 = vsub.f32 %v4926_v12, %v1739_v19  ;;  %3269 = vrot.lane.b32.xlu0 %v3268_v20, %s3697_s21 }
 0x427   : > { %v3273_v1 = vpack.i.bf16 %v1815_v51, %v1814_v35  ;;  %v1742_v58 = vpop.xlane.xlu0 %1741 }
 0x428   : > { %v1816_v2 = vsub.f32 %v4934_v38, %v1742_v58  ;;  %v1745_v42 = vpop.xlane.xlu1 %1744 }
 0x429   : > { %v1817_v61 = vsub.f32 %v4938_v10, %v1745_v42  ;;  %3274 = vrot.lane.b32.xlu1 %v3273_v1, %s3698_s22  ;;  %v1878_v1 = vsel %vm1870_vm15, 1.0, %v5835_v15  ;;  %vm1761_vm15 = vcmp.ge.f32.partialorder %v4029_v3, 7.0 }
 0x42a   : > { %v1886_v49 = vmul.f32 %v1878_v1, %v3790_v30 }
 0x42b   : > { %v3278_v32 = vpack.i.bf16 %v1817_v61, %v1816_v2  ;;  %v1748_v52 = vpop.xlane.xlu0 %1747  ;;  %v1879_v61 = vsel %vm1871_vm6, 1.0, %v5835_v15  ;;  %v1880_v2 = vsel %vm1872_vm7, 1.0, %v5835_v15  ;;  %vm1758_vm7 = vcmp.ge.f32.partialorder %v3908_v43, 7.0 }
 0x42c   : > { %v1818_v57 = vsub.f32 %v4943_v21, %v1748_v52  ;;  %v1751_v26 = vpop.xlane.xlu1 %1750  ;;  %v1887_v48 = vmul.f32 %v1879_v61, %v3790_v30  ;;  %v1888_v0 = vmul.f32 %v1880_v2, %v3790_v30  ;;  %v1894_v52 = vsel %vm388_vm8, %v1886_v49, 0.0 }
 0x42d   : > { %v1819_v34 = vsub.f32 %v4947_v54, %v1751_v26  ;;  %3279 = vrot.lane.b32.xlu0 %v3278_v32, %s3698_s22  ;;  %v1881_v32 = vsel %vm1873_vm10, 1.0, %v5835_v15  ;;  %v1882_v26 = vsel %vm1874_vm12, 1.0, %v5835_v15  ;;  %vm5851_vm10 = vcmp.lt.f32.partialorder %v3852_v24, 0.390625 }
 0x42e   : > { %v1897_v63 = vsel %vm388_vm8, %v1887_v48, 0.0  ;;  %vm1877_vm5 = vmand %vm5851_vm10, %vm1869_vm3  ;;  %v1900_v14 = vsel %vm388_vm8, %v1888_v0, 0.0  ;;  %v1918_v49 = vmul.f32 %v1878_v1, %v3792_v33  ;;  %v1919_v0 = vmul.f32 %v1879_v61, %v3792_v33 }
 0x42f   : > { %v3283_v19 = vpack.i.bf16 %v1819_v34, %v1818_v57  ;;  %v1754_v20 = vpop.xlane.xlu0 %1753  ;;  %v1889_v57 = vmul.f32 %v1881_v32, %v3790_v30  ;;  %v1890_v34 = vmul.f32 %v1882_v26, %v3790_v30  ;;  %v1922_v1 = vmul.f32 %v1882_v26, %v3792_v33 }
 0x430   : > { %v1820_v35 = vsub.f32 %v4952_v59, %v1754_v20  ;;  %v1757_v51 = vpop.xlane.xlu1 %1756  ;;  %v1891_v20 = vmul.f32 %v1883_v13, %v3790_v30  ;;  %v1923_v61 = vmul.f32 %v1883_v13, %v3792_v33  ;;  %vm1764_vm6 = vcmp.ge.f32.partialorder %v4050_v16, 7.0 }
 0x431   : > { %v1821_v58 = vsub.f32 %v4956_v31, %v1757_v51  ;;  %3284 = vrot.lane.b32.xlu1 %v3283_v19, %s3698_s22  ;;  %v1903_v19 = vsel %vm388_vm8, %v1889_v57, 0.0  ;;  %v1885_v51 = vsel %vm1877_vm5, 1.0, %v5835_v15  ;;  %v1906_v23 = vsel %vm388_vm8, %v1890_v34, 0.0 }
 0x432   : > { %v1909_v24 = vsel %vm388_vm8, %v1891_v20, 0.0  ;;  %v1929_v57 = vsel %vm388_vm8, %v1919_v0, 0.0  ;;  %v1941_v20 = vsel %vm388_vm8, %v1923_v61, 0.0  ;;  %vm5853_vm12 = vcmp.ge.f32.partialorder %v3866_v27, 1.0 }
 0x433   : > { %v3288_v42 = vpack.i.bf16 %v1821_v58, %v1820_v35  ;;  %v1884_v35 = vsel %vm1876_vm14, 1.0, %v5835_v15  ;;  %v1926_v15 = vsel %vm388_vm8, %v1918_v49, 0.0  ;;  %vm5856_vm3 = vcmp.ge.f32.partialorder %v3892_v37, 1.0 }
 0x434   : > { %v1892_v58 = vmul.f32 %v1884_v35, %v3790_v30  ;;  %vm5858_vm14 = vcmp.ge.f32.partialorder %v4039_v8, 1.0  ;;  %vm5859_vm10 = vcmp.ge.f32.partialorder %v3866_v27, 2.0  ;;  %vm5860_vm5 = vcmp.ge.f32.partialorder %v3908_v43, 2.0 }
 0x435   : > { %3289 = vrot.lane.b32.xlu0 %v3288_v42, %s3698_s22  ;;  %v1893_v42 = vmul.f32 %v1885_v51, %v3790_v30  ;;  %v1921_v30 = vmul.f32 %v1881_v32, %v3792_v33  ;;  %v1925_v32 = vmul.f32 %v1885_v51, %v3792_v33 }
 0x436   : > { %v1912_v48 = vsel %vm388_vm8, %v1892_v58, 0.0 }
 0x437   : > { %v1935_v34 = vsel %vm388_vm8, %v1921_v30, 0.0  ;;  %v1947_v26 = vsel %vm388_vm8, %v1925_v32, 0.0 }
 0x454   : > { %1898 = vadd.xlane.f32.xlu0 %v1897_v63  ;;  %v1915_v63 = vsel %vm388_vm8, %v1893_v42, 0.0 }
 0x455   : > { %1895 = vadd.xlane.f32.xlu1 %v1894_v52  ;;  %v1920_v52 = vmul.f32 %v1880_v2, %v3792_v33  ;;  %v1924_v2 = vmul.f32 %v1884_v35, %v3792_v33 }
 0x458   : > { %1901 = vadd.xlane.f32.xlu0 %v1900_v14  ;;  %v1932_v14 = vsel %vm388_vm8, %v1920_v52, 0.0 }
 0x459   : > { %1904 = vadd.xlane.f32.xlu1 %v1903_v19  ;;  %v1938_v19 = vsel %vm388_vm8, %v1922_v1, 0.0 }
 0x45c   : > { %1907 = vadd.xlane.f32.xlu0 %v1906_v23  ;;  %v1944_v23 = vsel %vm388_vm8, %v1924_v2, 0.0  ;;  %vm1760_vm8 = vcmp.ge.f32.partialorder %v4039_v8, 7.0 }
 0x45d   : > { %1910 = vadd.xlane.f32.xlu1 %v1909_v24 }
 0x460   : > { %1913 = vadd.xlane.f32.xlu0 %v1912_v48 }
 0x461   : > { %1916 = vadd.xlane.f32.xlu1 %v1915_v63 }
 0x464   : > { %1927 = vadd.xlane.f32.xlu0 %v1926_v15 }
 0x465   : > { %1930 = vadd.xlane.f32.xlu1 %v1929_v57 }
 0x468   : > { %1933 = vadd.xlane.f32.xlu0 %v1932_v14 }
 0x469   : > { %1936 = vadd.xlane.f32.xlu1 %v1935_v34 }
 0x46c   : > { %1939 = vadd.xlane.f32.xlu0 %v1938_v19 }
 0x46d   : > { %1942 = vadd.xlane.f32.xlu1 %v1941_v20 }
 0x470   : > { %1945 = vadd.xlane.f32.xlu0 %v1944_v23 }
 0x471   : > { %1948 = vadd.xlane.f32.xlu1 %v1947_v26 }
 0x48b   : > { %v5039_v13 = vpop.permute.xlu0 %3254 }
 0x48f   : > { %v5037_v58 = vpop.permute.xlu1 %3259 }
 0x493   : > { %v5041_v24 = vpop.permute.xlu1 %3264 }
 0x497   : > { %v5043_v42 = vpop.permute.xlu0 %3269 }
 0x49b   : > { %v3275_v35 = vpop.permute.xlu1 %3274 }
 0x49c   : > { %v3277_v48 = vunpack.i.h.bf16 %v3275_v35  ;;  %v3276_v49 = vunpack.i.l.bf16 %v3275_v35 }
 0x49e   : > { %v5049_v33 = vsel %vm1759_vm2, %v3277_v48, 0.0  ;;  %v5053_v51 = vsel %vm1758_vm7, %v3276_v49, 0.0 }
 0x49f   : > { %v3280_v0 = vpop.permute.xlu0 %3279 }
 0x4a0   : > { %v3282_v15 = vunpack.i.h.bf16 %v3280_v0  ;;  %v3281_v52 = vunpack.i.l.bf16 %v3280_v0 }
 0x4a2   : > { %v5061_v57 = vsel %vm1761_vm15, %v3282_v15, 0.0  ;;  %v5065_v30 = vsel %vm1760_vm8, %v3281_v52, 0.0 }
 0x4a3   : > { %v3285_v1 = vpop.permute.xlu1 %3284 }
 0x4a4   : > { %v3287_v34 = vunpack.i.h.bf16 %v3285_v1  ;;  %v3286_v61 = vunpack.i.l.bf16 %v3285_v1 }
 0x4a6   : > { %v5073_v19 = vsel %vm1763_vm4, %v3287_v34, 0.0  ;;  %v5077_v2 = vsel %vm1762_vm0, %v3286_v61, 0.0 }
 0x4a7   : > { %v3290_v32 = vpop.permute.xlu0 %3289 }
 0x4a8   : > { %v3292_v23 = vunpack.i.h.bf16 %v3290_v32  ;;  %v3291_v26 = vunpack.i.l.bf16 %v3290_v32 }
 0x4aa   : > { %v5085_v35 = vsel %vm1765_vm9, %v3292_v23, 0.0  ;;  %v5089_v48 = vsel %vm1764_vm6, %v3291_v26, 0.0 }
 0x4ab   : > { %5852 = vst [vmem:[#allocation50_spill] sm:$0xff] %v5089_v48 }
 0x4dd   : > { %v1899_v0 = vpop.xlane.xlu0 %1898 }
 0x4de   : > { %v1959_v15 = vsub.f32 %v4926_v12, %v1899_v0  ;;  %v1896_v52 = vpop.xlane.xlu1 %1895 }
 0x4df   : > { %v1958_v1 = vsub.f32 %v4930_v46, %v1896_v52 }
 0x4e1   : > { %v3293_v34 = vpack.i.bf16 %v1959_v15, %v1958_v1  ;;  %v1902_v61 = vpop.xlane.xlu0 %1901 }
 0x4e2   : > { %v1960_v32 = vsub.f32 %v4934_v38, %v1902_v61  ;;  %v1905_v20 = vpop.xlane.xlu1 %1904 }
 0x4e3   : > { %v1961_v23 = vsub.f32 %v4938_v10, %v1905_v20  ;;  %3294 = vrot.lane.b32.xlu0 %v3293_v34, %s3697_s21 }
 0x4e5   : > { %v3298_v26 = vpack.i.bf16 %v1961_v23, %v1960_v32  ;;  %v1908_v14 = vpop.xlane.xlu0 %1907 }
 0x4e6   : > { %v1962_v63 = vsub.f32 %v4943_v21, %v1908_v14  ;;  %v1911_v49 = vpop.xlane.xlu1 %1910 }
 0x4e7   : > { %v1963_v48 = vsub.f32 %v4947_v54, %v1911_v49  ;;  %3299 = vrot.lane.b32.xlu1 %v3298_v26, %s3697_s21 }
 0x4e9   : > { %v3303_v0 = vpack.i.bf16 %v1963_v48, %v1962_v63  ;;  %v1914_v52 = vpop.xlane.xlu0 %1913 }
 0x4ea   : > { %v1964_v15 = vsub.f32 %v4952_v59, %v1914_v52  ;;  %v1917_v1 = vpop.xlane.xlu1 %1916 }
 0x4eb   : > { %v1965_v61 = vsub.f32 %v4956_v31, %v1917_v1  ;;  %3304 = vrot.lane.b32.xlu1 %v3303_v0, %s3697_s21  ;;  %v3017_v0 = vunpack.i.h.bf16 %v4437_v17 }
 0x4ed   : > { %v3308_v20 = vpack.i.bf16 %v1965_v61, %v1964_v15  ;;  %v1928_v34 = vpop.xlane.xlu0 %1927 }
 0x4ee   : > { %v2006_v32 = vsub.f32 %v4930_v46, %v1928_v34  ;;  %v1931_v23 = vpop.xlane.xlu1 %1930  ;;  %v3016_v46 = vunpack.i.l.bf16 %v4437_v17  ;;  %v3021_v34 = vunpack.i.l.bf16 %v4408_v18  ;;  %v3107_v17 = vunpack.i.h.bf16 %v4703_v5 }
 0x4ef   : > { %v2007_v14 = vsub.f32 %v4926_v12, %v1931_v23  ;;  %3309 = vrot.lane.b32.xlu0 %v3308_v20, %s3697_s21 }
 0x4f1   : > { %v3313_v49 = vpack.i.bf16 %v2007_v14, %v2006_v32  ;;  %v1934_v26 = vpop.xlane.xlu0 %1933  ;;  %v654_v14 = vsel %vm5854_vm11, %v3016_v46, 0.0  ;;  %v3042_v46 = vunpack.i.h.bf16 %v4435_v55  ;;  %vm5862_vm11 = vcmp.ge.f32.partialorder %v4050_v16, 1.0 }
 0x4f2   : > { %v2008_v63 = vsub.f32 %v4934_v38, %v1934_v26  ;;  %v1937_v48 = vpop.xlane.xlu1 %1936  ;;  %v3022_v38 = vunpack.i.h.bf16 %v4408_v18 }
 0x4f3   : > { %v2009_v52 = vsub.f32 %v4938_v10, %v1937_v48  ;;  %3314 = vrot.lane.b32.xlu1 %v3313_v49, %s3698_s22  ;;  %v655_v10 = vsel %vm5853_vm12, %v3017_v0, 0.0  ;;  %v3036_v0 = vunpack.i.l.bf16 %v4450_v11  ;;  %vm5861_vm12 = vcmp.ge.f32.partialorder %v4041_v9, 1.0 }
 0x4f4   : > { %v659_v18 = vsel %vm5855_vm1, %v3022_v38, 0.0  ;;  %v3333_v48 = vpack.i.bf16 %v655_v10, %v654_v14  ;;  %v3127_v10 = vunpack.i.h.bf16 %v4709_v50  ;;  %vm5863_vm1 = vcmp.ge.f32.partialorder %v3886_v36, 2.0 }
 0x4f5   : > { %v3318_v15 = vpack.i.bf16 %v2009_v52, %v2008_v63  ;;  %v1940_v1 = vpop.xlane.xlu0 %1939  ;;  %v658_v63 = vsel %vm5856_vm3, %v3021_v34, 0.0  ;;  %v3037_v52 = vunpack.i.h.bf16 %v4450_v11  ;;  %vm5864_vm3 = vcmp.ge.f32.partialorder %v3892_v37, 2.0 }
 0x4f6   : > { %v2010_v61 = vsub.f32 %v4943_v21, %v1940_v1  ;;  %v1943_v12 = vpop.xlane.xlu1 %1942  ;;  %v3106_v21 = vunpack.i.l.bf16 %v4703_v5  ;;  %v3112_v5 = vunpack.i.h.bf16 %v4571_v39  ;;  %v3343_v11 = vpack.i.bf16 %v659_v18, %v658_v63 }
 0x4f7   : > { %v2011_v20 = vsub.f32 %v4947_v54, %v1943_v12  ;;  %3319 = vrot.lane.b32.xlu0 %v3318_v15, %s3698_s22  ;;  %v847_v12 = vsel %vm5859_vm10, %v3037_v52, 0.0  ;;  %vm5867_vm10 = vcmp.ge.f32.partialorder %v3866_v27, 3.0 }
 0x4f8   : > { %v656_v1 = vsel %vm5858_vm14, %v3106_v21, 0.0  ;;  %v661_v38 = vsel %vm5861_vm12, %v3112_v5, 0.0  ;;  %v3056_v21 = vunpack.i.l.bf16 %v4470_v62  ;;  %vm5866_vm14 = vcmp.ge.f32.partialorder %v4039_v8, 2.0 }
 0x4f9   : > { %v3323_v32 = vpack.i.bf16 %v2011_v20, %v2010_v61  ;;  %v1946_v23 = vpop.xlane.xlu0 %1945  ;;  %v3041_v61 = vunpack.i.l.bf16 %v4435_v55  ;;  %v851_v55 = vsel %vm5863_vm1, %v3042_v46, 0.0  ;;  %vm5869_vm12 = vcmp.ge.f32.partialorder %v4041_v9, 2.0 }
 0x4fa   : > { %v2012_v54 = vsub.f32 %v4952_v59, %v1946_v23  ;;  %v1949_v49 = vpop.xlane.xlu1 %1948  ;;  %v3111_v59 = vunpack.i.l.bf16 %v4571_v39  ;;  %v846_v39 = vsel %vm5860_vm5, %v3036_v0, 0.0  ;;  %vm5868_vm5 = vcmp.ge.f32.partialorder %v3908_v43, 3.0 }
 0x4fb   : > { %v2013_v26 = vsub.f32 %v4956_v31, %v1949_v49  ;;  %3324 = vrot.lane.b32.xlu1 %v3323_v32, %s3698_s22  ;;  %v657_v31 = vsel %vm5857_vm13, %v3107_v17, 0.0  ;;  %v3126_v32 = vunpack.i.l.bf16 %v4709_v50  ;;  %v850_v23 = vsel %vm5864_vm3, %v3041_v61, 0.0 }
 0x4fc   : > { %v3338_v20 = vpack.i.bf16 %v657_v31, %v656_v1  ;;  %v660_v34 = vsel %vm5862_vm11, %v3111_v59, 0.0  ;;  %v3353_v14 = vpack.i.bf16 %v847_v12, %v846_v39  ;;  %v3057_v17 = vunpack.i.h.bf16 %v4470_v62 }
 0x4fd   : > { %v3328_v15 = vpack.i.bf16 %v2013_v26, %v2012_v54  ;;  %v3348_v54 = vpack.i.bf16 %v661_v38, %v660_v34  ;;  %v3132_v49 = vunpack.i.h.bf16 %v4644_v44  ;;  %v3131_v26 = vunpack.i.l.bf16 %v4644_v44 }
 0x4fe   : > { %vm5865_vm13 = vcmp.ge.f32.partialorder %v4029_v3, 2.0  ;;  %v848_v18 = vsel %vm5866_vm14, %v3126_v32, 0.0  ;;  %v3363_v63 = vpack.i.bf16 %v851_v55, %v850_v23  ;;  %v1039_v62 = vsel %vm5867_vm10, %v3057_v17, 0.0 }
 0x4ff   : > { %3329 = vrot.lane.b32.xlu0 %v3328_v15, %s3698_s22  ;;  %3334 = vrot.lane.b32.xlu1 %v3333_v48, %s3699_s23  ;;  %v849_v50 = vsel %vm5865_vm13, %v3127_v10, 0.0  ;;  %v3062_v48 = vunpack.i.h.bf16 %v4475_v22  ;;  %v1038_v52 = vsel %vm5868_vm5, %v3056_v21, 0.0  ;;  %v3061_v44 = vunpack.i.l.bf16 %v4475_v22 }
 0x500   : > { %v3358_v0 = vpack.i.bf16 %v849_v50, %v848_v18  ;;  %v853_v15 = vsel %vm5869_vm12, %v3132_v49, 0.0  ;;  %vm5870_vm11 = vcmp.ge.f32.partialorder %v4050_v16, 2.0  ;;  %v3147_v59 = vunpack.i.h.bf16 %v4711_v45 }
 0x501   : > { %v852_v5 = vsel %vm5870_vm11, %v3131_v26, 0.0  ;;  %v3146_v31 = vunpack.i.l.bf16 %v4711_v45  ;;  %v3373_v1 = vpack.i.bf16 %v1039_v62, %v1038_v52  ;;  %v3077_v46 = vunpack.i.h.bf16 %v4496_v40 }
 0x502   : > { %vm5871_vm1 = vcmp.ge.f32.partialorder %v3886_v36, 3.0  ;;  %vm5872_vm3 = vcmp.ge.f32.partialorder %v3892_v37, 3.0  ;;  %v3368_v12 = vpack.i.bf16 %v853_v15, %v852_v5  ;;  %vm5873_vm13 = vcmp.ge.f32.partialorder %v4029_v3, 3.0 }
 0x503   : > { %3339 = vrot.lane.b32.xlu0 %v3338_v20, %s3699_s23  ;;  %3344 = vrot.lane.b32.xlu1 %v3343_v11, %s3699_s23  ;;  %v1043_v61 = vsel %vm5871_vm1, %v3062_v48, 0.0  ;;  %v1042_v22 = vsel %vm5872_vm3, %v3061_v44, 0.0  ;;  %v3076_v11 = vunpack.i.l.bf16 %v4496_v40  ;;  %v1041_v39 = vsel %vm5873_vm13, %v3147_v59, 0.0 }
 0x504   : > { %vm5874_vm14 = vcmp.ge.f32.partialorder %v4039_v8, 3.0  ;;  %v3152_v20 = vunpack.i.h.bf16 %v4677_v41  ;;  %v3151_v38 = vunpack.i.l.bf16 %v4677_v41  ;;  %v3383_v34 = vpack.i.bf16 %v1043_v61, %v1042_v22 }
 0x505   : > { %v1040_v45 = vsel %vm5874_vm14, %v3146_v31, 0.0  ;;  %vm5875_vm10 = vcmp.ge.f32.partialorder %v3866_v27, 4.0  ;;  %vm5876_vm5 = vcmp.ge.f32.partialorder %v3908_v43, 4.0  ;;  %v3082_v32 = vunpack.i.h.bf16 %v4562_v6 }
 0x506   : > { %v1231_v10 = vsel %vm5875_vm10, %v3077_v46, 0.0  ;;  %v1230_v40 = vsel %vm5876_vm5, %v3076_v11, 0.0  ;;  %v3081_v55 = vunpack.i.l.bf16 %v4562_v6  ;;  %v3378_v23 = vpack.i.bf16 %v1041_v39, %v1040_v45 }
 0x507   : > { %3349 = vrot.lane.b32.xlu0 %v3348_v54, %s3699_s23  ;;  %3354 = vrot.lane.b32.xlu1 %v3353_v14, %s3700_s24  ;;  %vm5877_vm12 = vcmp.ge.f32.partialorder %v4041_v9, 3.0  ;;  %vm5878_vm11 = vcmp.ge.f32.partialorder %v4050_v16, 3.0  ;;  %v3167_v17 = vunpack.i.h.bf16 %v4725_v60  ;;  %v3166_v21 = vunpack.i.l.bf16 %v4725_v60 }
 0x508   : > { %v1045_v14 = vsel %vm5877_vm12, %v3152_v20, 0.0  ;;  %v1044_v41 = vsel %vm5878_vm11, %v3151_v38, 0.0  ;;  %v3393_v54 = vpack.i.bf16 %v1231_v10, %v1230_v40  ;;  %v3097_v49 = vunpack.i.h.bf16 %v4547_v29 }
 0x509   : > { %v3096_v26 = vunpack.i.l.bf16 %v4547_v29  ;;  %vm5879_vm1 = vcmp.ge.f32.partialorder %v3886_v36, 4.0  ;;  %vm5880_vm3 = vcmp.ge.f32.partialorder %v3892_v37, 4.0  ;;  %v3388_v18 = vpack.i.bf16 %v1045_v14, %v1044_v41 }
 0x50a   : > { %v1235_v6 = vsel %vm5879_vm1, %v3082_v32, 0.0  ;;  %v1234_v50 = vsel %vm5880_vm3, %v3081_v55, 0.0  ;;  %vm5881_vm13 = vcmp.ge.f32.partialorder %v4029_v3, 4.0  ;;  %vm5882_vm14 = vcmp.ge.f32.partialorder %v4039_v8, 4.0 }
 0x50b   : > { %3359 = vrot.lane.b32.xlu0 %v3358_v0, %s3700_s24  ;;  %3364 = vrot.lane.b32.xlu1 %v3363_v63, %s3700_s24  ;;  %v1233_v63 = vsel %vm5881_vm13, %v3167_v17, 0.0  ;;  %v1232_v60 = vsel %vm5882_vm14, %v3166_v21, 0.0  ;;  %v3172_v48 = vunpack.i.h.bf16 %v4707_v4  ;;  %v3171_v62 = vunpack.i.l.bf16 %v4707_v4 }
 0x50c   : > { %v3102_v52 = vunpack.i.h.bf16 %v4679_v25  ;;  %v3101_v29 = vunpack.i.l.bf16 %v4679_v25  ;;  %v3187_v44 = vunpack.i.h.bf16 %v4739_v56  ;;  %v3186_v0 = vunpack.i.l.bf16 %v4739_v56 }
 0x50d   : > { %vm1374_vm10 = vcmp.ge.f32.partialorder %v3908_v43, 5.0  ;;  %vm1375_vm5 = vcmp.ge.f32.partialorder %v3866_v27, 5.0  ;;  %v3403_v15 = vpack.i.bf16 %v1235_v6, %v1234_v50  ;;  %v3398_v5 = vpack.i.bf16 %v1233_v63, %v1232_v60 }
 0x50e   : > { %v1423_v4 = vsel %vm1375_vm5, %v3097_v49, 0.0  ;;  %v1422_v59 = vsel %vm1374_vm10, %v3096_v26, 0.0  ;;  %vm5883_vm12 = vcmp.ge.f32.partialorder %v4041_v9, 4.0  ;;  %vm5884_vm11 = vcmp.ge.f32.partialorder %v4050_v16, 4.0  ;;  %v5897_v26 = vld [vmem:[#allocation41_spill] sm:$0xff] }
 0x50f   : > { %3369 = vrot.lane.b32.xlu0 %v3368_v12, %s3700_s24  ;;  %3374 = vrot.lane.b32.xlu1 %v3373_v1, %s3701_s25  ;;  %v1237_v25 = vsel %vm5883_vm12, %v3172_v48, 0.0  ;;  %v1236_v31 = vsel %vm5884_vm11, %v3171_v62, 0.0  ;;  %vm5885_vm1 = vcmp.ge.f32.partialorder %v3886_v36, 5.0  ;;  %vm5886_vm3 = vcmp.ge.f32.partialorder %v3892_v37, 5.0 }
 0x510   : > { %v1427_v56 = vsel %vm5885_vm1, %v3102_v52, 0.0  ;;  %v1426_v1 = vsel %vm5886_vm3, %v3101_v29, 0.0  ;;  %vm5887_vm13 = vcmp.ge.f32.partialorder %v4029_v3, 5.0  ;;  %vm5888_vm14 = vcmp.ge.f32.partialorder %v4039_v8, 5.0 }
 0x511   : > { %v1425_v46 = vsel %vm5887_vm13, %v3187_v44, 0.0  ;;  %v1424_v61 = vsel %vm5888_vm14, %v3186_v0, 0.0  ;;  %v3192_v22 = vunpack.i.h.bf16 %v4741_v47  ;;  %v3191_v11 = vunpack.i.l.bf16 %v4741_v47 }
 0x512   : > { %v3413_v12 = vpack.i.bf16 %v1423_v4, %v1422_v59  ;;  %v3408_v39 = vpack.i.bf16 %v1237_v25, %v1236_v31  ;;  %v3217_v45 = vunpack.i.h.bf16 %v4871_v28  ;;  %v3216_v20 = vunpack.i.l.bf16 %v4871_v28 }
 0x513   : > { %3379 = vrot.lane.b32.xlu0 %v3378_v23, %s3701_s25  ;;  %3384 = vrot.lane.b32.xlu1 %v3383_v34, %s3701_s25  ;;  %v3423_v38 = vpack.i.bf16 %v1427_v56, %v1426_v1  ;;  %v3418_v34 = vpack.i.bf16 %v1425_v46, %v1424_v61  ;;  %vm5889_vm12 = vcmp.ge.f32.partialorder %v4041_v9, 5.0  ;;  %vm5890_vm11 = vcmp.ge.f32.partialorder %v4050_v16, 5.0 }
 0x514   : > { %v1429_v10 = vsel %vm5889_vm12, %v3192_v22, 0.0  ;;  %v1428_v40 = vsel %vm5890_vm11, %v3191_v11, 0.0  ;;  %v3222_v32 = vunpack.i.h.bf16 %v4869_v7  ;;  %v3221_v47 = vunpack.i.l.bf16 %v4869_v7 }
 0x515   : > { %vm5891_vm1 = vcmp.ge.f32.partialorder %v3866_v27, 6.0  ;;  %vm5892_vm3 = vcmp.ge.f32.partialorder %v3908_v43, 6.0  ;;  %v3227_v23 = vunpack.i.h.bf16 %v4873_v53  ;;  %v3226_v14 = vunpack.i.l.bf16 %v4873_v53 }
 0x516   : > { %v1615_v55 = vsel %vm5891_vm1, %v3217_v45, 0.0  ;;  %v1614_v28 = vsel %vm5892_vm3, %v3216_v20, 0.0  ;;  %v3428_v41 = vpack.i.bf16 %v1429_v10, %v1428_v40  ;;  %vm5893_vm13 = vcmp.ge.f32.partialorder %v4029_v3, 6.0 }
 0x517   : > { %3389 = vrot.lane.b32.xlu0 %v3388_v18, %s3701_s25  ;;  %3394 = vrot.lane.b32.xlu1 %v3393_v54, %s3702_s26  ;;  %v3433_v17 = vpack.i.bf16 %v1615_v55, %v1614_v28  ;;  %v1617_v21 = vsel %vm5893_vm13, %v3222_v32, 0.0  ;;  %vm5894_vm14 = vcmp.ge.f32.partialorder %v4039_v8, 6.0  ;;  %vm5895_vm12 = vcmp.ge.f32.partialorder %v3886_v36, 6.0 }
 0x518   : > { %v1616_v7 = vsel %vm5894_vm14, %v3221_v47, 0.0  ;;  %v1619_v54 = vsel %vm5895_vm12, %v3227_v23, 0.0  ;;  %vm5896_vm11 = vcmp.ge.f32.partialorder %v3892_v37, 6.0  ;;  %v3232_v6 = vunpack.i.h.bf16 %v5897_v26 }
 0x519   : > { %v1618_v49 = vsel %vm5896_vm11, %v3226_v14, 0.0  ;;  %v3231_v53 = vunpack.i.l.bf16 %v5897_v26  ;;  %v3257_v50 = vunpack.i.h.bf16 %v5039_v13  ;;  %v3256_v18 = vunpack.i.l.bf16 %v5039_v13 }
 0x51a   : > { %v3438_v63 = vpack.i.bf16 %v1617_v21, %v1616_v7  ;;  %v3443_v60 = vpack.i.bf16 %v1619_v54, %v1618_v49  ;;  %vm5898_vm1 = vcmp.ge.f32.partialorder %v4041_v9, 6.0  ;;  %vm5899_vm3 = vcmp.ge.f32.partialorder %v4050_v16, 6.0 }
 0x51b   : > { %3399 = vrot.lane.b32.xlu0 %v3398_v5, %s3702_s26  ;;  %3404 = vrot.lane.b32.xlu1 %v3403_v15, %s3702_s26  ;;  %v1621_v48 = vsel %vm5898_vm1, %v3232_v6, 0.0  ;;  %v1620_v62 = vsel %vm5899_vm3, %v3231_v53, 0.0  ;;  %v3262_v52 = vunpack.i.h.bf16 %v5037_v58  ;;  %v3261_v29 = vunpack.i.l.bf16 %v5037_v58 }
 0x51c   : > { %v1807_v44 = vsel %vm1759_vm2, %v3257_v50, 0.0  ;;  %v1806_v13 = vsel %vm1758_vm7, %v3256_v18, 0.0  ;;  %v3267_v0 = vunpack.i.h.bf16 %v5041_v24  ;;  %v3266_v15 = vunpack.i.l.bf16 %v5041_v24 }
 0x51d   : > { %v3448_v5 = vpack.i.bf16 %v1621_v48, %v1620_v62  ;;  %v3453_v4 = vpack.i.bf16 %v1807_v44, %v1806_v13  ;;  %v1809_v59 = vsel %vm1761_vm15, %v3262_v52, 0.0  ;;  %v1808_v58 = vsel %vm1760_vm8, %v3261_v29, 0.0  ;;  %v5901_v48 = vld [vmem:[#allocation3_spill] sm:$0xff] }
 0x51e   : > { %v1811_v25 = vsel %vm1763_vm4, %v3267_v0, 0.0  ;;  %v1810_v31 = vsel %vm1762_vm0, %v3266_v15, 0.0  ;;  %v3272_v56 = vunpack.i.h.bf16 %v5043_v42  ;;  %v3271_v24 = vunpack.i.l.bf16 %v5043_v42 }
 0x51f   : > { %3409 = vrot.lane.b32.xlu0 %v3408_v39, %s3702_s26  ;;  %3414 = vrot.lane.b32.xlu1 %v3413_v12, %s3703_s27  ;;  %v3458_v1 = vpack.i.bf16 %v1809_v59, %v1808_v58  ;;  %v3463_v46 = vpack.i.bf16 %v1811_v25, %v1810_v31  ;;  %vm1950_vm7 = vcmp.ge.f32.partialorder %v3908_v43, 8.0  ;;  %vm1951_vm2 = vcmp.ge.f32.partialorder %v3866_v27, 8.0  ;;  %v5906_v58 = vld [vmem:[#allocation4_spill] sm:$0xff]  ;;  %v5907_v25 = vld [vmem:[#allocation5_spill] sm:$0xff] }
 0x520   : > { %v1813_v61 = vsel %vm1765_vm9, %v3272_v56, 0.0  ;;  %v1812_v22 = vsel %vm1764_vm6, %v3271_v24, 0.0  ;;  %vm1952_vm8 = vcmp.ge.f32.partialorder %v4039_v8, 8.0  ;;  %vm1953_vm15 = vcmp.ge.f32.partialorder %v4029_v3, 8.0 }
 0x521   : > { %v3468_v11 = vpack.i.bf16 %v1813_v61, %v1812_v22  ;;  %vm1954_vm0 = vcmp.ge.f32.partialorder %v3892_v37, 8.0  ;;  %vm1955_vm4 = vcmp.ge.f32.partialorder %v3886_v36, 8.0  ;;  %vm1956_vm6 = vcmp.ge.f32.partialorder %v4050_v16, 8.0 }
 0x522   : > { %vm1957_vm9 = vcmp.ge.f32.partialorder %v4041_v9, 8.0  ;;  %v5908_v31 = vpack.i.bf16 %v5906_v58, %v5907_v25  ;;  %vm2566_vm13 = vcmask 7168   ;;  %vm2593_vm14 = vcmask 31744  }
 0x523   : > { %3419 = vrot.lane.b32.xlu0 %v3418_v34, %s3703_s27  ;;  %3424 = vrot.lane.b32.xlu1 %v3423_v38, %s3703_s27  ;;  %vm2602_vm12 = vcmask 39936   ;;  %vm2611_vm11 = vcmask 48128   ;;  %vm2620_vm1 = vcmask 56320   ;;  %vm2629_vm3 = vcmask 64512  }
 0x527   : > { %3429 = vrot.lane.b32.xlu0 %v3428_v41, %s3703_s27  ;;  %3434 = vrot.lane.b32.xlu1 %v3433_v17, %s3704_s28 }
 0x52b   : > { %3439 = vrot.lane.b32.xlu0 %v3438_v63, %s3704_s28  ;;  %3444 = vrot.lane.b32.xlu1 %v3443_v60, %s3704_s28  ;;  %v5900_v60 = vld [vmem:[#allocation2_spill] sm:$0xff] }
 0x52c   : > { %v5902_v62 = vpack.i.bf16 %v5900_v60, %v5901_v48 }
 0x52f   : > { %3449 = vrot.lane.b32.xlu0 %v3448_v5, %s3704_s28  ;;  %3454 = vrot.lane.b32.xlu1 %v3453_v4, %s3705_s29  ;;  %v5903_v5 = vld [vmem:[#allocation16_spill] sm:$0xff]  ;;  %v5904_v4 = vld [vmem:[#allocation17_spill] sm:$0xff] }
 0x530   : > { %v5905_v59 = vpack.i.bf16 %v5903_v5, %v5904_v4  ;;  %v5931_v4 = vld [vmem:[#allocation12_spill] sm:$0xff] }
 0x533   : > { %3459 = vrot.lane.b32.xlu0 %v3458_v1, %s3705_s29  ;;  %3464 = vrot.lane.b32.xlu1 %v3463_v46, %s3705_s29 }
 0x537   : > { %3469 = vrot.lane.b32.xlu0 %v3468_v11, %s3705_s29  ;;  %v5909_v11 = vld [vmem:[#allocation20_spill] sm:$0xff] }
 0x555   : > { %v3295_v12 = vpop.permute.xlu0 %3294 }
 0x556   : > { %v3297_v39 = vunpack.i.h.bf16 %v3295_v12  ;;  %v3296_v45 = vunpack.i.l.bf16 %v3295_v12  ;;  %v5910_v12 = vld [vmem:[#allocation21_spill] sm:$0xff] }
 0x558   : > { %v1999_v42 = vsel %vm1951_vm2, %v3297_v39, 0.0  ;;  %v1998_v20 = vsel %vm1950_vm7, %v3296_v45, 0.0  ;;  %v5911_v39 = vpack.i.bf16 %v5909_v11, %v5910_v12  ;;  %v5912_v45 = vld [vmem:[#allocation6_spill] sm:$0xff] }
 0x559   : > { %v3473_v38 = vpack.i.bf16 %v1999_v42, %v1998_v20  ;;  %v3300_v34 = vpop.permute.xlu1 %3299  ;;  %v5913_v42 = vld [vmem:[#allocation7_spill] sm:$0xff] }
 0x55a   : > { %v3302_v10 = vunpack.i.h.bf16 %v3300_v34  ;;  %v3301_v40 = vunpack.i.l.bf16 %v3300_v34  ;;  %v5914_v3 = vpack.i.bf16 %v5912_v45, %v5913_v42 }
 0x55b   : > { %3474 = vrot.lane.b32.xlu1 %v3473_v38, %s3706_s30 }
 0x55c   : > { %v2001_v32 = vsel %vm1953_vm15, %v3302_v10, 0.0  ;;  %v2000_v47 = vsel %vm1952_vm8, %v3301_v40, 0.0 }
 0x55d   : > { %v3478_v55 = vpack.i.bf16 %v2001_v32, %v2000_v47  ;;  %v3305_v28 = vpop.permute.xlu1 %3304  ;;  %v5915_v47 = vld [vmem:[#allocation22_spill] sm:$0xff] }
 0x55e   : > { %v3307_v23 = vunpack.i.h.bf16 %v3305_v28  ;;  %v3306_v14 = vunpack.i.l.bf16 %v3305_v28 }
 0x55f   : > { %3479 = vrot.lane.b32.xlu0 %v3478_v55, %s3706_s30  ;;  %v5916_v55 = vld [vmem:[#allocation23_spill] sm:$0xff] }
 0x560   : > { %v2003_v41 = vsel %vm1955_vm4, %v3307_v23, 0.0  ;;  %v2002_v17 = vsel %vm1954_vm0, %v3306_v14, 0.0  ;;  %v5917_v28 = vpack.i.bf16 %v5915_v47, %v5916_v55  ;;  %v5918_v23 = vld [vmem:[#allocation8_spill] sm:$0xff]  ;;  %v5919_v14 = vld [vmem:[#allocation9_spill] sm:$0xff] }
 0x561   : > { %v3483_v21 = vpack.i.bf16 %v2003_v41, %v2002_v17  ;;  %v3310_v7 = vpop.permute.xlu0 %3309  ;;  %v5920_v36 = vpack.i.bf16 %v5918_v23, %v5919_v14  ;;  %v5935_v47 = vld [vmem:[#allocation29_spill] sm:$0xff]  ;;  %v5938_v23 = vld [vmem:[#allocation15_spill] sm:$0xff] }
 0x562   : > { %v3312_v54 = vunpack.i.h.bf16 %v3310_v7  ;;  %v3311_v49 = vunpack.i.l.bf16 %v3310_v7 }
 0x563   : > { %3484 = vrot.lane.b32.xlu1 %v3483_v21, %s3706_s30 }
 0x564   : > { %v2005_v26 = vsel %vm1957_vm9, %v3312_v54, 0.0  ;;  %v2004_v6 = vsel %vm1956_vm6, %v3311_v49, 0.0  ;;  %v5921_v54 = vld [vmem:[#allocation24_spill] sm:$0xff]  ;;  %v5922_v49 = vld [vmem:[#allocation25_spill] sm:$0xff] }
 0x565   : > { %v3488_v53 = vpack.i.bf16 %v2005_v26, %v2004_v6  ;;  %v3315_v50 = vpop.permute.xlu1 %3314  ;;  %v5923_v26 = vpack.i.bf16 %v5921_v54, %v5922_v49  ;;  %v5924_v6 = vld [vmem:[#allocation10_spill] sm:$0xff] }
 0x566   : > { %v3317_v18 = vunpack.i.h.bf16 %v3315_v50  ;;  %v3316_v63 = vunpack.i.l.bf16 %v3315_v50 }
 0x567   : > { %3489 = vrot.lane.b32.xlu0 %v3488_v53, %s3706_s30  ;;  %3494 = vrot.lane.b32.xlu1 %v5902_v62, %s3707_s3  ;;  %v5925_v53 = vld [vmem:[#allocation11_spill] sm:$0xff]  ;;  %v5927_v62 = vld [vmem:[#allocation34_spill] sm:$0xff] }
 0x568   : > { %v5316_v52 = vsel %vm1951_vm2, %v3317_v18, 0.0  ;;  %v5320_v29 = vsel %vm1950_vm7, %v3316_v63, 0.0  ;;  %v5926_v50 = vpack.i.bf16 %v5924_v6, %v5925_v53  ;;  %v3196_v25 = vunpack.i.l.bf16 %v5927_v62 }
 0x569   : > { %v3633_v44 = vpack.i.bf16 %v5316_v52, %v5320_v29  ;;  %v3320_v13 = vpop.permute.xlu0 %3319  ;;  %vm2638_vm7 = vcmask 72704   ;;  %vm2647_vm2 = vcmask 80896  }
 0x56a   : > { %v3322_v0 = vunpack.i.h.bf16 %v3320_v13  ;;  %v3321_v15 = vunpack.i.l.bf16 %v3320_v13  ;;  %v3197_v13 = vunpack.i.h.bf16 %v5927_v62  ;;  %v1470_v27 = vsel %vm1374_vm10, %v3196_v25, 0.0 }
 0x56b   : > { %3499 = vrot.lane.b32.xlu0 %v5905_v59, %s3707_s3  ;;  %3504 = vrot.lane.b32.xlu1 %v5908_v31, %s3707_s3  ;;  %v5932_v59 = vld [vmem:[#allocation13_spill] sm:$0xff]  ;;  %vm2584_vm10 = vcmask 23552  }
 0x56c   : > { %v5332_v56 = vsel %vm1953_vm15, %v3322_v0, 0.0  ;;  %v5336_v24 = vsel %vm1952_vm8, %v3321_v15, 0.0  ;;  %v5928_v0 = vld [vmem:[#allocation26_spill] sm:$0xff]  ;;  %v5929_v15 = vld [vmem:[#allocation27_spill] sm:$0xff]  ;;  %v5933_v58 = vpack.i.bf16 %v5931_v4, %v5932_v59  ;;  %vm2656_vm8 = vcmask 89088  }
 0x56d   : > { %v3638_v1 = vpack.i.bf16 %v5332_v56, %v5336_v24  ;;  %v3325_v46 = vpop.permute.xlu1 %3324  ;;  %v5930_v5 = vpack.i.bf16 %v5928_v0, %v5929_v15  ;;  %v5944_v0 = vld [vmem:[#allocation19_spill] sm:$0xff]  ;;  %vm2665_vm15 = vcmask 97280  }
 0x56e   : > { %v3327_v61 = vunpack.i.h.bf16 %v3325_v46  ;;  %v3326_v22 = vunpack.i.l.bf16 %v3325_v46 }
 0x56f   : > { %3509 = vrot.lane.b32.xlu0 %v5911_v39, %s3707_s3  ;;  %3514 = vrot.lane.b32.xlu1 %v5914_v3, %s3708_s4 }
 0x570   : > { %v5348_v8 = vsel %vm1955_vm4, %v3327_v61, 0.0  ;;  %v5352_v20 = vsel %vm1954_vm0, %v3326_v22, 0.0  ;;  %vm2674_vm0 = vcmask 105472   ;;  %vm2683_vm4 = vcmask 113664  }
 0x571   : > { %v3643_v38 = vpack.i.bf16 %v5348_v8, %v5352_v20  ;;  %v3330_v34 = vpop.permute.xlu0 %3329  ;;  %v3335_v10 = vpop.permute.xlu1 %3334 }
 0x572   : > { %v3332_v40 = vunpack.i.h.bf16 %v3330_v34  ;;  %v3331_v32 = vunpack.i.l.bf16 %v3330_v34  ;;  %v3337_v16 = vunpack.i.h.bf16 %v3335_v10  ;;  %v3336_v63 = vunpack.i.l.bf16 %v3335_v10 }
 0x573   : > { %3519 = vrot.lane.b32.xlu0 %v5917_v28, %s3708_s4  ;;  %3524 = vrot.lane.b32.xlu1 %v5920_v36, %s3708_s4  ;;  %v5937_v28 = vld [vmem:[#allocation14_spill] sm:$0xff] }
 0x574   : > { %v5364_v37 = vsel %vm1957_vm9, %v3332_v40, 0.0  ;;  %v5368_v41 = vsel %vm1956_vm6, %v3331_v32, 0.0  ;;  %v1471_v40 = vsel %vm1375_vm5, %v3197_v13, 0.0  ;;  %v5934_v32 = vld [vmem:[#allocation28_spill] sm:$0xff]  ;;  %v5939_v14 = vpack.i.bf16 %v5937_v28, %v5938_v23  ;;  %v5943_v13 = vld [vmem:[#allocation18_spill] sm:$0xff]  ;;  %v5949_v23 = vld [vmem:[#allocation35_spill] sm:$0xff] }
 0x575   : > { %v3648_v17 = vpack.i.bf16 %v5364_v37, %v5368_v41  ;;  %v3340_v21 = vpop.permute.xlu0 %3339  ;;  %v3345_v7 = vpop.permute.xlu1 %3344  ;;  %v5936_v55 = vpack.i.bf16 %v5934_v32, %v5935_v47  ;;  %vm2575_vm5 = vcmask 15360   ;;  %v5945_v15 = vpack.i.bf16 %v5943_v13, %v5944_v0  ;;  %v5958_v0 = vld [vmem:[#allocation42_spill] sm:$0xff] }
 0x576   : > { %v3342_v61 = vunpack.i.h.bf16 %v3340_v21  ;;  %v3341_v22 = vunpack.i.l.bf16 %v3340_v21  ;;  %v3347_v11 = vunpack.i.h.bf16 %v3345_v7  ;;  %v3346_v12 = vunpack.i.l.bf16 %v3345_v7 }
 0x577   : > { %3529 = vrot.lane.b32.xlu0 %v5923_v26, %s3708_s4  ;;  %3534 = vrot.lane.b32.xlu1 %v5926_v50, %s3709_s5  ;;  %v3573_v59 = vpack.i.bf16 %v1471_v40, %v1470_v27  ;;  %vm2692_vm6 = vcmask 121856   ;;  %vm2733_vm9 = vcmask 125952  }
 0x579   : > { %v3350_v9 = vpop.permute.xlu0 %3349  ;;  %v3355_v18 = vpop.permute.xlu1 %3354 }
 0x57a   : > { %v3357_v60 = vunpack.i.h.bf16 %v3355_v18  ;;  %v3356_v48 = vunpack.i.l.bf16 %v3355_v18  ;;  %v3352_v49 = vunpack.i.h.bf16 %v3350_v9  ;;  %v3351_v26 = vunpack.i.l.bf16 %v3350_v9 }
 0x57b   : > { %3539 = vrot.lane.b32.xlu0 %v5930_v5, %s3709_s5  ;;  %3544 = vrot.lane.b32.xlu1 %v5933_v58, %s3709_s5 }
 0x57c   : > { %v2567_v31 = vsel %vm2566_vm13, %v3336_v63, %v3356_v48  ;;  %v2568_v46 = vsel %vm2566_vm13, %v3337_v16, %v3357_v60  ;;  %v5940_v60 = vld [vmem:[#allocation30_spill] sm:$0xff]  ;;  %v5941_v48 = vld [vmem:[#allocation31_spill] sm:$0xff] }
 0x57d   : > { %v3360_v39 = vpop.permute.xlu0 %3359  ;;  %v3365_v45 = vpop.permute.xlu1 %3364  ;;  %v5942_v62 = vpack.i.bf16 %v5940_v60, %v5941_v48  ;;  %v5955_v48 = vld [vmem:[#allocation39_spill] sm:$0xff] }
 0x57e   : > { %v3362_v42 = vunpack.i.h.bf16 %v3360_v39  ;;  %v3361_v3 = vunpack.i.l.bf16 %v3360_v39  ;;  %v3367_v34 = vunpack.i.h.bf16 %v3365_v45  ;;  %v3366_v10 = vunpack.i.l.bf16 %v3365_v45  ;;  %v5946_v39 = vld [vmem:[#allocation32_spill] sm:$0xff]  ;;  %v5947_v45 = vld [vmem:[#allocation33_spill] sm:$0xff] }
 0x57f   : > { %3549 = vrot.lane.b32.xlu0 %v5936_v55, %s3709_s5  ;;  %3554 = vrot.lane.b32.xlu1 %v5939_v14, %s3710_s6  ;;  %v5950_v14 = vld [vmem:[#allocation36_spill] sm:$0xff] }
 0x580   : > { %v2570_v36 = vsel %vm2566_vm13, %v3342_v61, %v3362_v42  ;;  %v2569_v21 = vsel %vm2566_vm13, %v3341_v22, %v3361_v3  ;;  %v2571_v7 = vsel %vm2566_vm13, %v3346_v12, %v3366_v10  ;;  %v2572_v54 = vsel %vm2566_vm13, %v3347_v11, %v3367_v34 }
 0x581   : > { %v3370_v6 = vpop.permute.xlu0 %3369  ;;  %v3375_v53 = vpop.permute.xlu1 %3374  ;;  %v5948_v42 = vpack.i.bf16 %v5946_v39, %v5947_v45  ;;  %v5951_v27 = vpack.i.bf16 %v5949_v23, %v5950_v14  ;;  %v5961_v39 = vld [vmem:[#allocation44_spill] sm:$0xff]  ;;  %v5962_v45 = vld [vmem:[#allocation45_spill] sm:$0xff] }
 0x582   : > { %v3372_v50 = vunpack.i.h.bf16 %v3370_v6  ;;  %v3371_v18 = vunpack.i.l.bf16 %v3370_v6  ;;  %v3377_v16 = vunpack.i.h.bf16 %v3375_v53  ;;  %v3376_v63 = vunpack.i.l.bf16 %v3375_v53 }
 0x583   : > { %3559 = vrot.lane.b32.xlu0 %v5942_v62, %s3710_s6  ;;  %3564 = vrot.lane.b32.xlu1 %v5945_v15, %s3710_s6  ;;  %v5956_v62 = vld [vmem:[#allocation40_spill] sm:$0xff]  ;;  %v5959_v15 = vld [vmem:[#allocation43_spill] sm:$0xff] }
 0x584   : > { %v2573_v43 = vsel %vm2566_vm13, %v3351_v26, %v3371_v18  ;;  %v2574_v5 = vsel %vm2566_vm13, %v3352_v49, %v3372_v50  ;;  %v2576_v9 = vsel %vm2575_vm5, %v2567_v31, %v3376_v63  ;;  %v2577_v4 = vsel %vm2575_vm5, %v2568_v46, %v3377_v16  ;;  %v5952_v49 = vld [vmem:[#allocation37_spill] sm:$0xff]  ;;  %v5953_v26 = vld [vmem:[#allocation38_spill] sm:$0xff] }
 0x585   : > { %v3380_v58 = vpop.permute.xlu0 %3379  ;;  %v3385_v25 = vpop.permute.xlu1 %3384  ;;  %v5957_v13 = vpack.i.bf16 %v5955_v48, %v5956_v62  ;;  %v5971_v62 = vpack.i.bf16 %v5061_v57, %v5065_v30  ;;  %v5973_v57 = vld [vmem:[#allocation50_spill] sm:$0xff] }
 0x586   : > { %v3382_v61 = vunpack.i.h.bf16 %v3380_v58  ;;  %v3381_v22 = vunpack.i.l.bf16 %v3380_v58  ;;  %v3387_v11 = vunpack.i.h.bf16 %v3385_v25  ;;  %v3386_v12 = vunpack.i.l.bf16 %v3385_v25 }
 0x587   : > { %3569 = vrot.lane.b32.xlu0 %v5948_v42, %s3710_s6  ;;  %3574 = vrot.lane.b32.xlu1 %v3573_v59, %s3711_s7  ;;  %v5963_v42 = vpack.i.bf16 %v5961_v39, %v5962_v45  ;;  %v5974_v30 = vpack.i.bf16 %v5085_v35, %v5973_v57 }
 0x588   : > { %v2578_v3 = vsel %vm2575_vm5, %v2569_v21, %v3381_v22  ;;  %v2579_v34 = vsel %vm2575_vm5, %v2570_v36, %v3382_v61  ;;  %v2580_v31 = vsel %vm2575_vm5, %v2571_v7, %v3386_v12  ;;  %v2581_v46 = vsel %vm2575_vm5, %v2572_v54, %v3387_v11 }
 0x589   : > { %v3390_v10 = vpop.permute.xlu0 %3389  ;;  %v3395_v40 = vpop.permute.xlu1 %3394  ;;  %v5954_v21 = vpack.i.bf16 %v5952_v49, %v5953_v26  ;;  %v5967_v49 = vld [vmem:[#allocation48_spill] sm:$0xff]  ;;  %v5968_v26 = vld [vmem:[#allocation49_spill] sm:$0xff] }
 0x58a   : > { %v3392_v32 = vunpack.i.h.bf16 %v3390_v10  ;;  %v3391_v47 = vunpack.i.l.bf16 %v3390_v10  ;;  %v3397_v55 = vunpack.i.h.bf16 %v3395_v40  ;;  %v3396_v28 = vunpack.i.l.bf16 %v3395_v40  ;;  %v5964_v10 = vld [vmem:[#allocation46_spill] sm:$0xff]  ;;  %v5965_v40 = vld [vmem:[#allocation47_spill] sm:$0xff] }
 0x58b   : > { %3579 = vrot.lane.b32.xlu0 %v5951_v27, %s3711_s7  ;;  %3584 = vrot.lane.b32.xlu1 %v5954_v21, %s3711_s7  ;;  %v5969_v21 = vpack.i.bf16 %v5967_v49, %v5968_v26 }
 0x58c   : > { %v2582_v36 = vsel %vm2575_vm5, %v2573_v43, %v3391_v47  ;;  %v2583_v7 = vsel %vm2575_vm5, %v2574_v5, %v3392_v32  ;;  %v2585_v54 = vsel %vm2584_vm10, %v2576_v9, %v3396_v28  ;;  %v2586_v6 = vsel %vm2584_vm10, %v2577_v4, %v3397_v55 }
 0x58d   : > { %v3400_v53 = vpop.permute.xlu0 %3399  ;;  %v3405_v50 = vpop.permute.xlu1 %3404  ;;  %v5960_v43 = vpack.i.bf16 %v5958_v0, %v5959_v15 }
 0x58e   : > { %v3402_v18 = vunpack.i.h.bf16 %v3400_v53  ;;  %v3401_v16 = vunpack.i.l.bf16 %v3400_v53  ;;  %v3407_v63 = vunpack.i.h.bf16 %v3405_v50  ;;  %v3406_v60 = vunpack.i.l.bf16 %v3405_v50 }
 0x58f   : > { %3589 = vrot.lane.b32.xlu0 %v5957_v13, %s3711_s7  ;;  %3594 = vrot.lane.b32.xlu1 %v5960_v43, %s3712_s8 }
 0x590   : > { %v2587_v5 = vsel %vm2584_vm10, %v2578_v3, %v3401_v16  ;;  %v2588_v9 = vsel %vm2584_vm10, %v2579_v34, %v3402_v18  ;;  %v2589_v4 = vsel %vm2584_vm10, %v2580_v31, %v3406_v60  ;;  %v2590_v59 = vsel %vm2584_vm10, %v2581_v46, %v3407_v63 }
 0x591   : > { %v3410_v58 = vpop.permute.xlu0 %3409  ;;  %v3415_v25 = vpop.permute.xlu1 %3414  ;;  %v5966_v3 = vpack.i.bf16 %v5964_v10, %v5965_v40 }
 0x592   : > { %v3412_v61 = vunpack.i.h.bf16 %v3410_v58  ;;  %v3411_v22 = vunpack.i.l.bf16 %v3410_v58  ;;  %v3417_v11 = vunpack.i.h.bf16 %v3415_v25  ;;  %v3416_v12 = vunpack.i.l.bf16 %v3415_v25 }
 0x593   : > { %3599 = vrot.lane.b32.xlu0 %v5963_v42, %s3712_s8  ;;  %3604 = vrot.lane.b32.xlu1 %v5966_v3, %s3712_s8 }
 0x594   : > { %v2591_v34 = vsel %vm2584_vm10, %v2582_v36, %v3411_v22  ;;  %v2592_v31 = vsel %vm2584_vm10, %v2583_v7, %v3412_v61  ;;  %v2594_v46 = vsel %vm2593_vm14, %v2585_v54, %v3416_v12  ;;  %v2595_v32 = vsel %vm2593_vm14, %v2586_v6, %v3417_v11 }
 0x595   : > { %v3420_v47 = vpop.permute.xlu0 %3419  ;;  %v3425_v55 = vpop.permute.xlu1 %3424  ;;  %v5970_v36 = vpack.i.bf16 %v5049_v33, %v5053_v51  ;;  %v5972_v33 = vpack.i.bf16 %v5073_v19, %v5077_v2 }
 0x596   : > { %v3422_v28 = vunpack.i.h.bf16 %v3420_v47  ;;  %v3421_v23 = vunpack.i.l.bf16 %v3420_v47  ;;  %v3427_v14 = vunpack.i.h.bf16 %v3425_v55  ;;  %v3426_v27 = vunpack.i.l.bf16 %v3425_v55 }
 0x597   : > { %3609 = vrot.lane.b32.xlu0 %v5969_v21, %s3712_s8  ;;  %3614 = vrot.lane.b32.xlu1 %v5970_v36, %s3713_s13 }
 0x598   : > { %v2596_v7 = vsel %vm2593_vm14, %v2587_v5, %v3421_v23  ;;  %v2597_v54 = vsel %vm2593_vm14, %v2588_v9, %v3422_v28  ;;  %v2598_v6 = vsel %vm2593_vm14, %v2589_v4, %v3426_v27  ;;  %v2599_v53 = vsel %vm2593_vm14, %v2590_v59, %v3427_v14 }
 0x599   : > { %v3430_v50 = vpop.permute.xlu0 %3429  ;;  %v3435_v18 = vpop.permute.xlu1 %3434 }
 0x59a   : > { %v3432_v16 = vunpack.i.h.bf16 %v3430_v50  ;;  %v3431_v63 = vunpack.i.l.bf16 %v3430_v50  ;;  %v3437_v60 = vunpack.i.h.bf16 %v3435_v18  ;;  %v3436_v48 = vunpack.i.l.bf16 %v3435_v18 }
 0x59b   : > { %3619 = vrot.lane.b32.xlu0 %v5971_v62, %s3713_s13  ;;  %3624 = vrot.lane.b32.xlu1 %v5972_v33, %s3713_s13 }
 0x59c   : > { %v2600_v51 = vsel %vm2593_vm14, %v2591_v34, %v3431_v63  ;;  %v2601_v13 = vsel %vm2593_vm14, %v2592_v31, %v3432_v16  ;;  %v2603_v0 = vsel %vm2602_vm12, %v2594_v46, %v3436_v48  ;;  %v2604_v15 = vsel %vm2602_vm12, %v2595_v32, %v3437_v60 }
 0x59d   : > { %v3440_v43 = vpop.permute.xlu0 %3439  ;;  %v3445_v5 = vpop.permute.xlu1 %3444 }
 0x59e   : > { %v3442_v9 = vunpack.i.h.bf16 %v3440_v43  ;;  %v3441_v4 = vunpack.i.l.bf16 %v3440_v43  ;;  %v3447_v59 = vunpack.i.h.bf16 %v3445_v5  ;;  %v3446_v58 = vunpack.i.l.bf16 %v3445_v5 }
 0x59f   : > { %3629 = vrot.lane.b32.xlu0 %v5974_v30, %s3713_s13  ;;  %3634 = vrot.lane.b32.xlu1 %v3633_v44, %s3714_s14 }
 0x5a0   : > { %v2605_v19 = vsel %vm2602_vm12, %v2596_v7, %v3441_v4  ;;  %v2606_v2 = vsel %vm2602_vm12, %v2597_v54, %v3442_v9  ;;  %v2607_v25 = vsel %vm2602_vm12, %v2598_v6, %v3446_v58  ;;  %v2608_v61 = vsel %vm2602_vm12, %v2599_v53, %v3447_v59 }
 0x5a1   : > { %v3450_v22 = vpop.permute.xlu0 %3449  ;;  %v3455_v29 = vpop.permute.xlu1 %3454 }
 0x5a2   : > { %v3452_v11 = vunpack.i.h.bf16 %v3450_v22  ;;  %v3451_v12 = vunpack.i.l.bf16 %v3450_v22  ;;  %v3457_v46 = vunpack.i.h.bf16 %v3455_v29  ;;  %v3456_v32 = vunpack.i.l.bf16 %v3455_v29 }
 0x5a3   : > { %3639 = vrot.lane.b32.xlu0 %v3638_v1, %s3714_s14  ;;  %3644 = vrot.lane.b32.xlu1 %v3643_v38, %s3714_s14 }
 0x5a4   : > { %v2609_v35 = vsel %vm2602_vm12, %v2600_v51, %v3451_v12  ;;  %v2610_v52 = vsel %vm2602_vm12, %v2601_v13, %v3452_v11  ;;  %v2612_v7 = vsel %vm2611_vm11, %v2603_v0, %v3456_v32  ;;  %v2613_v54 = vsel %vm2611_vm11, %v2604_v15, %v3457_v46 }
 0x5a5   : > { %v3460_v44 = vpop.permute.xlu0 %3459  ;;  %v3465_v39 = vpop.permute.xlu1 %3464 }
 0x5a6   : > { %v3462_v28 = vunpack.i.h.bf16 %v3460_v44  ;;  %v3461_v23 = vunpack.i.l.bf16 %v3460_v44  ;;  %v3467_v14 = vunpack.i.h.bf16 %v3465_v39  ;;  %v3466_v27 = vunpack.i.l.bf16 %v3465_v39 }
 0x5a7   : > { %3649 = vrot.lane.b32.xlu0 %v3648_v17, %s3714_s14 }
 0x5a8   : > { %v2614_v16 = vsel %vm2611_vm11, %v2605_v19, %v3461_v23  ;;  %v2615_v63 = vsel %vm2611_vm11, %v2606_v2, %v3462_v28  ;;  %v2616_v62 = vsel %vm2611_vm11, %v2607_v25, %v3466_v27  ;;  %v2617_v33 = vsel %vm2611_vm11, %v2608_v61, %v3467_v14 }
 0x5a9   : > { %v3470_v45 = vpop.permute.xlu0 %3469 }
 0x5aa   : > { %v3472_v49 = vunpack.i.h.bf16 %v3470_v45  ;;  %v3471_v26 = vunpack.i.l.bf16 %v3470_v45 }
 0x5ac   : > { %v2618_v0 = vsel %vm2611_vm11, %v2609_v35, %v3471_v26  ;;  %v2619_v15 = vsel %vm2611_vm11, %v2610_v52, %v3472_v49 }
 0x5cd   : > { %v3475_v42 = vpop.permute.xlu1 %3474 }
 0x5ce   : > { %v3477_v21 = vunpack.i.h.bf16 %v3475_v42  ;;  %v3476_v36 = vunpack.i.l.bf16 %v3475_v42 }
 0x5d0   : > { %v2621_v43 = vsel %vm2620_vm1, %v2612_v7, %v3476_v36  ;;  %v2622_v5 = vsel %vm2620_vm1, %v2613_v54, %v3477_v21 }
 0x5d1   : > { %v3480_v10 = vpop.permute.xlu0 %3479 }
 0x5d2   : > { %v3482_v6 = vunpack.i.h.bf16 %v3480_v10  ;;  %v3481_v53 = vunpack.i.l.bf16 %v3480_v10 }
 0x5d4   : > { %v2623_v9 = vsel %vm2620_vm1, %v2614_v16, %v3481_v53  ;;  %v2624_v4 = vsel %vm2620_vm1, %v2615_v63, %v3482_v6 }
 0x5d5   : > { %v3485_v56 = vpop.permute.xlu1 %3484 }
 0x5d6   : > { %v3487_v60 = vunpack.i.h.bf16 %v3485_v56  ;;  %v3486_v48 = vunpack.i.l.bf16 %v3485_v56 }
 0x5d8   : > { %v2625_v19 = vsel %vm2620_vm1, %v2616_v62, %v3486_v48  ;;  %v2626_v2 = vsel %vm2620_vm1, %v2617_v33, %v3487_v60 }
 0x5d9   : > { %v3490_v24 = vpop.permute.xlu0 %3489  ;;  %v5490_v1 = vpop.permute.xlu1 %3494 }
 0x5da   : > { %v3492_v51 = vunpack.i.h.bf16 %v3490_v24  ;;  %v3491_v13 = vunpack.i.l.bf16 %v3490_v24  ;;  %v3497_v59 = vunpack.i.h.bf16 %v5490_v1  ;;  %v3496_v58 = vunpack.i.l.bf16 %v5490_v1 }
 0x5dc   : > { %v2627_v22 = vsel %vm2620_vm1, %v2618_v0, %v3491_v13  ;;  %v2628_v11 = vsel %vm2620_vm1, %v2619_v15, %v3492_v51  ;;  %v2630_v45 = vsel %vm2629_vm3, %v2621_v43, %v3496_v58  ;;  %v2631_v42 = vsel %vm2629_vm3, %v2622_v5, %v3497_v59 }
 0x5dd   : > { %v5492_v8 = vpop.permute.xlu0 %3499  ;;  %v5494_v20 = vpop.permute.xlu1 %3504 }
 0x5de   : > { %v3502_v25 = vunpack.i.h.bf16 %v5492_v8  ;;  %v3501_v61 = vunpack.i.l.bf16 %v5492_v8  ;;  %v3507_v12 = vunpack.i.h.bf16 %v5494_v20  ;;  %v3506_v35 = vunpack.i.l.bf16 %v5494_v20 }
 0x5e0   : > { %v2632_v8 = vsel %vm2629_vm3, %v2623_v9, %v3501_v61  ;;  %v2633_v20 = vsel %vm2629_vm3, %v2624_v4, %v3502_v25  ;;  %v2634_v46 = vsel %vm2629_vm3, %v2625_v19, %v3506_v35  ;;  %v2635_v32 = vsel %vm2629_vm3, %v2626_v2, %v3507_v12 }
 0x5e1   : > { %v5496_v38 = vpop.permute.xlu0 %3509  ;;  %v5498_v40 = vpop.permute.xlu1 %3514 }
 0x5e2   : > { %v3512_v52 = vunpack.i.h.bf16 %v5496_v38  ;;  %v3511_v29 = vunpack.i.l.bf16 %v5496_v38  ;;  %v3517_v44 = vunpack.i.h.bf16 %v5498_v40  ;;  %v3516_v39 = vunpack.i.l.bf16 %v5498_v40 }
 0x5e4   : > { %v2636_v23 = vsel %vm2629_vm3, %v2627_v22, %v3511_v29  ;;  %v2637_v14 = vsel %vm2629_vm3, %v2628_v11, %v3512_v52  ;;  %v2639_v27 = vsel %vm2638_vm7, %v2630_v45, %v3516_v39  ;;  %v2640_v49 = vsel %vm2638_vm7, %v2631_v42, %v3517_v44 }
 0x5e5   : > { %v5500_v37 = vpop.permute.xlu0 %3519  ;;  %v5502_v41 = vpop.permute.xlu1 %3524 }
 0x5e6   : > { %v3522_v10 = vunpack.i.h.bf16 %v5500_v37  ;;  %v3521_v56 = vunpack.i.l.bf16 %v5500_v37  ;;  %v3527_v38 = vunpack.i.h.bf16 %v5502_v41  ;;  %v3526_v40 = vunpack.i.l.bf16 %v5502_v41 }
 0x5e8   : > { %v2641_v26 = vsel %vm2638_vm7, %v2632_v8, %v3521_v56  ;;  %v2642_v41 = vsel %vm2638_vm7, %v2633_v20, %v3522_v10  ;;  %v2644_v6 = vsel %vm2638_vm7, %v2635_v32, %v3527_v38 }
 0x5e9   : > { %v5504_v17 = vpop.permute.xlu0 %3529  ;;  %v5506_v3 = vpop.permute.xlu1 %3534 }
 0x5ea   : > { %v3532_v28 = vunpack.i.h.bf16 %v5504_v17  ;;  %v3531_v37 = vunpack.i.l.bf16 %v5504_v17  ;;  %v3537_v21 = vunpack.i.h.bf16 %v5506_v3  ;;  %v3536_v36 = vunpack.i.l.bf16 %v5506_v3 }
 0x5eb   : > { %v2643_v17 = vsel %vm2638_vm7, %v2634_v46, %v3526_v40 }
 0x5ec   : > { %v2645_v63 = vsel %vm2638_vm7, %v2636_v23, %v3531_v37  ;;  %v2646_v60 = vsel %vm2638_vm7, %v2637_v14, %v3532_v28  ;;  %v2648_v0 = vsel %vm2647_vm2, %v2639_v27, %v3536_v36 }
 0x5ed   : > { %v5508_v34 = vpop.permute.xlu0 %3539  ;;  %v5510_v31 = vpop.permute.xlu1 %3544 }
 0x5ee   : > { %v3542_v53 = vunpack.i.h.bf16 %v5508_v34  ;;  %v3541_v16 = vunpack.i.l.bf16 %v5508_v34  ;;  %v3547_v48 = vunpack.i.h.bf16 %v5510_v31  ;;  %v3546_v3 = vunpack.i.l.bf16 %v5510_v31 }
 0x5ef   : > { %v2649_v34 = vsel %vm2647_vm2, %v2640_v49, %v3537_v21 }
 0x5f0   : > { %v2650_v31 = vsel %vm2647_vm2, %v2641_v26, %v3541_v16  ;;  %v2651_v4 = vsel %vm2647_vm2, %v2642_v41, %v3542_v53  ;;  %v2653_v58 = vsel %vm2647_vm2, %v2644_v6, %v3547_v48 }
 0x5f1   : > { %v5512_v47 = vpop.permute.xlu0 %3549  ;;  %v5514_v55 = vpop.permute.xlu1 %3554 }
 0x5f2   : > { %v3552_v62 = vunpack.i.h.bf16 %v5512_v47  ;;  %v3551_v33 = vunpack.i.l.bf16 %v5512_v47  ;;  %v3557_v51 = vunpack.i.h.bf16 %v5514_v55  ;;  %v3556_v13 = vunpack.i.l.bf16 %v5514_v55 }
 0x5f3   : > { %v2652_v55 = vsel %vm2647_vm2, %v2643_v17, %v3546_v3 }
 0x5f4   : > { %v2655_v25 = vsel %vm2647_vm2, %v2646_v60, %v3552_v62  ;;  %v2657_v61 = vsel %vm2656_vm8, %v2648_v0, %v3556_v13  ;;  %v2658_v22 = vsel %vm2656_vm8, %v2649_v34, %v3557_v51 }
 0x5f5   : > { %v5518_v50 = vpop.permute.xlu0 %3559  ;;  %v5520_v18 = vpop.permute.xlu1 %3564 }
 0x5f6   : > { %v3562_v15 = vunpack.i.h.bf16 %v5518_v50  ;;  %v3561_v43 = vunpack.i.l.bf16 %v5518_v50  ;;  %v3567_v47 = vunpack.i.h.bf16 %v5520_v18  ;;  %v3566_v59 = vunpack.i.l.bf16 %v5520_v18 }
 0x5f7   : > { %v2654_v50 = vsel %vm2647_vm2, %v2645_v63, %v3551_v33 }
 0x5f8   : > { %v2659_v11 = vsel %vm2656_vm8, %v2650_v31, %v3561_v43  ;;  %v2660_v18 = vsel %vm2656_vm8, %v2651_v4, %v3562_v15  ;;  %v2661_v29 = vsel %vm2656_vm8, %v2652_v55, %v3566_v59  ;;  %v2662_v44 = vsel %vm2656_vm8, %v2653_v58, %v3567_v47 }
 0x5f9   : > { %v5534_v57 = vpop.permute.xlu0 %3569  ;;  %v5536_v30 = vpop.permute.xlu1 %3574 }
 0x5fa   : > { %v3572_v19 = vunpack.i.h.bf16 %v5534_v57  ;;  %v3571_v2 = vunpack.i.l.bf16 %v5534_v57  ;;  %v3577_v12 = vunpack.i.h.bf16 %v5536_v30  ;;  %v3576_v35 = vunpack.i.l.bf16 %v5536_v30 }
 0x5fc   : > { %v2663_v42 = vsel %vm2656_vm8, %v2654_v50, %v3571_v2  ;;  %v2664_v10 = vsel %vm2656_vm8, %v2655_v25, %v3572_v19  ;;  %v2666_v46 = vsel %vm2665_vm15, %v2657_v61, %v3576_v35 }
 0x5fd   : > { %v5554_v24 = vpop.permute.xlu0 %3579  ;;  %v5556_v1 = vpop.permute.xlu1 %3584 }
 0x5fe   : > { %v3582_v39 = vunpack.i.h.bf16 %v5554_v24  ;;  %v3581_v45 = vunpack.i.l.bf16 %v5554_v24  ;;  %v3587_v56 = vunpack.i.h.bf16 %v5556_v1  ;;  %v3586_v30 = vunpack.i.l.bf16 %v5556_v1 }
 0x5ff   : > { %v2667_v24 = vsel %vm2665_vm15, %v2658_v22, %v3577_v12 }
 0x600   : > { %v2668_v14 = vsel %vm2665_vm15, %v2659_v11, %v3581_v45  ;;  %v2669_v1 = vsel %vm2665_vm15, %v2660_v18, %v3582_v39  ;;  %v2670_v26 = vsel %vm2665_vm15, %v2661_v29, %v3586_v30  ;;  %v2671_v41 = vsel %vm2665_vm15, %v2662_v44, %v3587_v56 }
 0x601   : > { %v5574_v7 = vpop.permute.xlu0 %3589  ;;  %v5576_v54 = vpop.permute.xlu1 %3594 }
 0x602   : > { %v3592_v8 = vunpack.i.h.bf16 %v5574_v7  ;;  %v3591_v20 = vunpack.i.l.bf16 %v5574_v7  ;;  %v3597_v38 = vunpack.i.h.bf16 %v5576_v54  ;;  %v3596_v40 = vunpack.i.l.bf16 %v5576_v54 }
 0x604   : > { %v2672_v7 = vsel %vm2665_vm15, %v2663_v42, %v3591_v20  ;;  %v2673_v54 = vsel %vm2665_vm15, %v2664_v10, %v3592_v8  ;;  %v2675_v17 = vsel %vm2674_vm0, %v2666_v46, %v3596_v40  ;;  %v2676_v6 = vsel %vm2674_vm0, %v2667_v24, %v3597_v38 }
 0x605   : > { %v3600_v5 = vpop.permute.xlu0 %3599  ;;  %v3605_v9 = vpop.permute.xlu1 %3604 }
 0x606   : > { %v3602_v32 = vunpack.i.h.bf16 %v3600_v5  ;;  %v3601_v28 = vunpack.i.l.bf16 %v3600_v5  ;;  %v3607_v27 = vunpack.i.h.bf16 %v3605_v9  ;;  %v3606_v49 = vunpack.i.l.bf16 %v3605_v9 }
 0x608   : > { %v2677_v53 = vsel %vm2674_vm0, %v2668_v14, %v3601_v28  ;;  %v2678_v16 = vsel %vm2674_vm0, %v2669_v1, %v3602_v32  ;;  %v2679_v62 = vsel %vm2674_vm0, %v2670_v26, %v3606_v49  ;;  %v2680_v33 = vsel %vm2674_vm0, %v2671_v41, %v3607_v27 }
 0x609   : > { %v5610_v52 = vpop.permute.xlu0 %3609  ;;  %v3615_v57 = vpop.permute.xlu1 %3614 }
 0x60a   : > { %v3617_v21 = vunpack.i.h.bf16 %v3615_v57  ;;  %v3616_v36 = vunpack.i.l.bf16 %v3615_v57  ;;  %v3612_v5 = vunpack.i.h.bf16 %v5610_v52  ;;  %v3611_v9 = vunpack.i.l.bf16 %v5610_v52 }
 0x60c   : > { %v2684_v0 = vsel %vm2683_vm4, %v2675_v17, %v3616_v36  ;;  %v2685_v34 = vsel %vm2683_vm4, %v2676_v6, %v3617_v21  ;;  %v2681_v30 = vsel %vm2674_vm0, %v2672_v7, %v3611_v9  ;;  %v2682_v8 = vsel %vm2674_vm0, %v2673_v54, %v3612_v5 }
 0x60d   : > { %v3620_v37 = vpop.permute.xlu0 %3619  ;;  %v3625_v23 = vpop.permute.xlu1 %3624 }
 0x60e   : > { %v3622_v63 = vunpack.i.h.bf16 %v3620_v37  ;;  %v3621_v60 = vunpack.i.l.bf16 %v3620_v37  ;;  %v3627_v15 = vunpack.i.h.bf16 %v3625_v23  ;;  %v3626_v43 = vunpack.i.l.bf16 %v3625_v23 }
 0x610   : > { %v2686_v47 = vsel %vm2683_vm4, %v2677_v53, %v3621_v60  ;;  %v2687_v59 = vsel %vm2683_vm4, %v2678_v16, %v3622_v63  ;;  %v2688_v11 = vsel %vm2683_vm4, %v2679_v62, %v3626_v43  ;;  %v2689_v18 = vsel %vm2683_vm4, %v2680_v33, %v3627_v15 }
 0x611   : > { %v3630_v48 = vpop.permute.xlu0 %3629  ;;  %v3635_v3 = vpop.permute.xlu1 %3634 }
 0x612   : > { %v3637_v51 = vunpack.i.h.bf16 %v3635_v3  ;;  %v3636_v13 = vunpack.i.l.bf16 %v3635_v3  ;;  %v3632_v12 = vunpack.i.h.bf16 %v3630_v48  ;;  %v3631_v35 = vunpack.i.l.bf16 %v3630_v48 }
 0x614   : > { %v2693_v31 = vsel %vm2692_vm6, %v2684_v0, %v3636_v13  ;;  %v2694_v4 = vsel %vm2692_vm6, %v2685_v34, %v3637_v51  ;;  %v2690_v40 = vsel %vm2683_vm4, %v2681_v30, %v3631_v35  ;;  %v2691_v46 = vsel %vm2683_vm4, %v2682_v8, %v3632_v12 }
 0x615   : > { %v2895_v55 = vpack.c.bf16 %v2693_v31, %v2693_v31  ;;  %v2896_v58 = vpack.c.bf16 %v2694_v4, %v2694_v4  ;;  %v3640_v19 = vpop.permute.xlu0 %3639  ;;  %v3645_v2 = vpop.permute.xlu1 %3644 }
 0x616   : > { %v3642_v50 = vunpack.i.h.bf16 %v3640_v19  ;;  %v3641_v25 = vunpack.i.l.bf16 %v3640_v19  ;;  %v3647_v61 = vunpack.i.h.bf16 %v3645_v2  ;;  %v3646_v22 = vunpack.i.l.bf16 %v3645_v2 }
 0x617   : > { %2734 = vst.msk [vmem:[%s5646_s9] sm:$0xf] %vm2733_vm9, %v2895_v55  ;;  %2735 = vst.msk [vmem:[%s5646_s9 + $0x4] sm:$0xf] %vm2733_vm9, %v2896_v58 }
 0x618   : > { %v2695_v52 = vsel %vm2692_vm6, %v2686_v47, %v3641_v25  ;;  %v2696_v57 = vsel %vm2692_vm6, %v2687_v59, %v3642_v50  ;;  %v2697_v29 = vsel %vm2692_vm6, %v2688_v11, %v3646_v22  ;;  %v2698_v44 = vsel %vm2692_vm6, %v2689_v18, %v3647_v61 }
 0x619   : > { %v2897_v39 = vpack.c.bf16 %v2695_v52, %v2695_v52  ;;  %v2898_v45 = vpack.c.bf16 %v2696_v57, %v2696_v57  ;;  %v2899_v42 = vpack.c.bf16 %v2697_v29, %v2697_v29  ;;  %v2900_v10 = vpack.c.bf16 %v2698_v44, %v2698_v44  ;;  %v3650_v56 = vpop.permute.xlu0 %3649 }
 0x61a   : > { %v3652_v20 = vunpack.i.h.bf16 %v3650_v56  ;;  %v3651_v38 = vunpack.i.l.bf16 %v3650_v56 }
 0x61b   : > { %2736 = vst.msk [vmem:[%s5646_s9 + $0x8] sm:$0xf] %vm2733_vm9, %v2897_v39  ;;  %2737 = vst.msk [vmem:[%s5646_s9 + $0xc] sm:$0xf] %vm2733_vm9, %v2898_v45 }
 0x61c   : > { %2738 = vst.msk [vmem:[%s5646_s9 + $0x10] sm:$0xf] %vm2733_vm9, %v2899_v42  ;;  %2739 = vst.msk [vmem:[%s5646_s9 + $0x14] sm:$0xf] %vm2733_vm9, %v2900_v10  ;;  %v2699_v24 = vsel %vm2692_vm6, %v2690_v40, %v3651_v38  ;;  %v2700_v32 = vsel %vm2692_vm6, %v2691_v46, %v3652_v20 }
 0x61d   : > { %v2901_v28 = vpack.c.bf16 %v2699_v24, %v2699_v24  ;;  %v2902_v37 = vpack.c.bf16 %v2700_v32, %v2700_v32 }
 0x61f   : > { %2740 = vst.msk [vmem:[%s5646_s9 + $0x18] sm:$0xf] %vm2733_vm9, %v2901_v28  ;;  %2741 = vst.msk [vmem:[%s5646_s9 + $0x1c] sm:$0xf] %vm2733_vm9, %v2902_v37 }
 0x620 PF: > { %s12_s11 = sadd.s32 1, %s3691_s11   ;;  %s5975_s9 = smov %s3687_s10 }
 0x621   : > { %p9_p5 = scmp.ge.s32.totalorder %s12_s11, 4   ;;  %s5976_s10 = smov %s5978_s12 }
 0x623   :  { %11 = sbr.rel (!%p9_p5) target bundleno = 2 (0x2), region = 61 }

</bundles_post_ra>
